<compile_context>
chip_gen: v6e
topology: v6e:2x2x1
jax: 0.10.0
libtpu: 0.0.40
codegen_flags: <defaults>
</compile_context>

<pallas_src>
import functools

import jax
import jax.numpy as jnp
from jax.experimental import pallas as pl
from jax.experimental.pallas import tpu as pltpu

LANE = 128
SUBLANE = 8


def _round_up(x, m):
    return (x + m - 1) // m * m


def encoder_kernel(x_ref, w_ref, b_ref, zf_ref, zb_ref, *, h, w, k):
    """Fused conv-kxk(same) + bias + ReLU + global-average-pool for ONE batch image.

    x_ref : [1, h+k-1, w+k-1, C] bf16   zero-padded NHWC image
    w_ref : [k*k, C, D]          bf16   conv weights, (kh, kw)-major, C-minor
    b_ref : [1, D]               f32    conv bias
    zf_ref: [1, 1, D]            f32    pooled features (module output z_w)
    zb_ref: [1, 1, D]            bf16   same, pre-cast once for the predictor matmul
    """
    c = x_ref.shape[3]
    d = w_ref.shape[2]
    p = h * w

    # im2col folded in: k*k shifted [h*w, C] x [C, D] MXU matmuls, f32 accumulation.
    acc = jnp.zeros((p, d), jnp.float32)
    for dh in range(k):
        for dw in range(k):
            patch = x_ref[0, dh:dh + h, dw:dw + w, :].reshape(p, c)
            acc = acc + jnp.dot(patch, w_ref[dh * k + dw],
                                preferred_element_type=jnp.float32)

    feat = jnp.maximum(acc + b_ref[...], 0.0)                 # bias + ReLU in f32 (VPU)
    z = jnp.sum(feat, axis=0, keepdims=True) * (1.0 / p)      # mean pool (XLU row reduce)
    zf_ref[...] = z[None]
    zb_ref[...] = z[None].astype(jnp.bfloat16)


def predictor_kernel(z_ref, wp_ref, bp_ref, out_ref):
    """One lane-dense num_data tile of the predictor Linear: [Bp, D] x [D, TN] + bias."""
    out_ref[...] = (jnp.dot(z_ref[...], wp_ref[...],
                            preferred_element_type=jnp.float32) + bp_ref[...])


@jax.jit
def diet_forward(x_nchw, w_conv, b_conv, w_pred, b_pred):
    """x_nchw [B,C,H,W] f32; w_conv [D,C,k,k]; b_conv [D]; w_pred [N,D]; b_pred [N]."""
    B, C, H, W = x_nchw.shape
    D, _, k, _ = w_conv.shape
    num_data = w_pred.shape[0]
    pad = k // 2
    Hp, Wp = H + 2 * pad, W + 2 * pad
    P = H * W
    Bp = _round_up(B, SUBLANE)           # full sublane group -> unmasked predictor stores

    # Predictor N tile: size so each [D, TN] bf16 weight tile is ~1 MiB, keeping the
    # HBM-streaming-bound predictor above the ~0.35 us per-grid-step overhead.
    tile_cols = max(2048, (1 << 20) // max(2 * D, 1))
    TN = min(_round_up(num_data, LANE), _round_up(tile_cols, LANE))
    Np = _round_up(num_data, TN)
    NT = Np // TN

    # ---- wrapper-side prep: layout / dtype only (1x the input bytes, no k*k blow-up) ----
    x_pad = jnp.pad(jnp.transpose(x_nchw, (0, 2, 3, 1)),
                    ((0, 0), (pad, pad), (pad, pad), (0, 0))).astype(jnp.bfloat16)
    # PyTorch conv weight [D, C, k, k] -> (kh, kw)-major, C-minor [k*k, C, D].
    wc = jnp.transpose(w_conv, (2, 3, 1, 0)).reshape(k * k, C, D).astype(jnp.bfloat16)
    bc = b_conv.reshape(1, D).astype(jnp.float32)
    # PyTorch linear weight [N, D] -> [D, Np] bf16; N lane-padded, D left unpadded.
    wp = jnp.pad(jnp.transpose(w_pred),
                 ((0, 0), (0, Np - num_data))).astype(jnp.bfloat16)
    bp = jnp.pad(b_pred.reshape(1, num_data),
                 ((0, 0), (0, Np - num_data))).astype(jnp.float32)

    # ---- encoder: grid over batch, "parallel" (both TCs on v7x) ----
    enc_cost = pl.CostEstimate(
        flops=2 * B * P * (k * k * C) * D + 2 * B * P * D,
        transcendentals=0,
        bytes_accessed=int(x_pad.nbytes + wc.nbytes + bc.nbytes + B * D * (4 + 2)))
    z_f32, z_bf16 = pl.pallas_call(
        functools.partial(encoder_kernel, h=H, w=W, k=k),
        grid=(B,),
        in_specs=[
            pl.BlockSpec((1, Hp, Wp, C), lambda b: (b, 0, 0, 0)),
            pl.BlockSpec((k * k, C, D), lambda b: (0, 0, 0)),
            pl.BlockSpec((1, D), lambda b: (0, 0)),
        ],
        out_specs=[
            pl.BlockSpec((1, 1, D), lambda b: (b, 0, 0)),
            pl.BlockSpec((1, 1, D), lambda b: (b, 0, 0)),
        ],
        out_shape=[
            jax.ShapeDtypeStruct((B, 1, D), jnp.float32),
            jax.ShapeDtypeStruct((B, 1, D), jnp.bfloat16),
        ],
        compiler_params=pltpu.CompilerParams(dimension_semantics=("parallel",)),
        cost_estimate=enc_cost,
    )(x_pad, wc, bc)

    z_w = z_f32.reshape(B, D)                                       # module output (f32)
    z_in = jnp.pad(z_bf16.reshape(B, D), ((0, Bp - B), (0, 0)))     # [Bp, D] bf16

    # ---- predictor: stream lane-dense [D, TN] weight tiles over a 1-D "parallel" grid ----
    pred_cost = pl.CostEstimate(
        flops=2 * Bp * D * Np,
        transcendentals=0,
        bytes_accessed=int(z_in.nbytes + wp.nbytes + bp.nbytes + Bp * Np * 4))
    out_pad = pl.pallas_call(
        predictor_kernel,
        grid=(NT,),
        in_specs=[
            pl.BlockSpec((Bp, D), lambda j: (0, 0)),      # z resident across all N tiles
            pl.BlockSpec((D, TN), lambda j: (0, j)),      # streamed weight tile
            pl.BlockSpec((1, TN), lambda j: (0, j)),      # streamed bias tile
        ],
        out_specs=pl.BlockSpec((Bp, TN), lambda j: (0, j)),   # lane-dense, unmasked stores
        out_shape=jax.ShapeDtypeStruct((Bp, Np), jnp.float32),
        compiler_params=pltpu.CompilerParams(dimension_semantics=("parallel",)),
        cost_estimate=pred_cost,
    )(z_in, wp, bp)

    return z_w, out_pad[:B, :num_data]


if __name__ == "__main__":
    # Small shapes consistent with the module: batch=2, channels=4, spatial=16,
    # args.dim=32, num_data=64.
    B, C, H, W = 2, 4, 16, 16
    DIM, NUM_DATA, K = 32, 64, 3

    key = jax.random.PRNGKey(0)
    kx, kwc, kbc, kwp, kbp = jax.random.split(key, 5)

    x = jax.random.normal(kx, (B, C, H, W), dtype=jnp.float32)
    # PyTorch-convention parameter shapes (nn.Conv2d / nn.Linear).
    w_conv = jax.random.normal(kwc, (DIM, C, K, K), dtype=jnp.float32) * 0.1
    b_conv = jax.random.normal(kbc, (DIM,), dtype=jnp.float32) * 0.01
    w_pred = jax.random.normal(kwp, (NUM_DATA, DIM), dtype=jnp.float32) * 0.1
    b_pred = jax.random.normal(kbp, (NUM_DATA,), dtype=jnp.float32) * 0.01

    z_w, output = diet_forward(x, w_conv, b_conv, w_pred, b_pred)
    jax.block_until_ready((z_w, output))

    assert z_w.shape == (B, DIM), z_w.shape
    assert output.shape == (B, NUM_DATA), output.shape

    def ref_forward(xf, wc_f, bc_f, wp_f, bp_f, dtype):
        """Same math in plain JAX; dtype = matmul-operand dtype (accumulation in f32)."""
        xn = jnp.transpose(xf, (0, 2, 3, 1))
        xp_ = jnp.pad(xn, ((0, 0), (1, 1), (1, 1), (0, 0))).astype(dtype)
        wkk = jnp.transpose(wc_f, (2, 3, 1, 0)).reshape(K * K, C, DIM).astype(dtype)
        acc = jnp.zeros((B, H * W, DIM), jnp.float32)
        for dh in range(K):
            for dw in range(K):
                patch = xp_[:, dh:dh + H, dw:dw + W, :].reshape(B, H * W, C)
                acc = acc + jnp.einsum("bpc,cd->bpd", patch, wkk[dh * K + dw],
                                       preferred_element_type=jnp.float32)
        feat = jnp.maximum(acc + bc_f.reshape(1, 1, DIM), 0.0)
        z = jnp.mean(feat, axis=1)
        out = (jnp.dot(z.astype(dtype), jnp.transpose(wp_f).astype(dtype),
                       preferred_element_type=jnp.float32) + bp_f.reshape(1, -1))
        return z, out

    # Matched-precision reference (bf16 MXU operands, f32 accumulation) -> tight check.
    z_ref, out_ref = ref_forward(x, w_conv, b_conv, w_pred, b_pred, jnp.bfloat16)
    assert jnp.allclose(z_w, z_ref, atol=2e-3), float(jnp.abs(z_w - z_ref).max())
    assert jnp.allclose(output, out_ref, atol=2e-2), float(jnp.abs(output - out_ref).max())

    # Loose sanity check against full-f32 module math.
    z32, out32 = ref_forward(x, w_conv, b_conv, w_pred, b_pred, jnp.float32)
    assert jnp.allclose(z_w, z32, atol=1e-1, rtol=1e-1)
    assert jnp.allclose(output, out32, atol=1e-1, rtol=1e-1)

    print("KERNEL_OK")
</pallas_src>

<mosaic_0001>
module attributes {stable_mosaic.version = 11 : i64} {
  func.func @encoder_kernel(%arg0: i32, %arg1: memref<1x18x18x4xbf16, #tpu.memory_space<vmem>>, %arg2: memref<9x4x32xbf16, #tpu.memory_space<vmem>>, %arg3: memref<1x32xf32, #tpu.memory_space<vmem>>, %arg4: memref<1x1x32xf32, #tpu.memory_space<vmem>>, %arg5: memref<1x1x32xbf16, #tpu.memory_space<vmem>>) attributes {dimension_semantics = [#tpu.dimension_semantics<parallel>], iteration_bounds = array<i64: 2>, scalar_prefetch = 0 : i64, scratch_operands = 0 : i64, tpu.core_type = #tpu.core_type<tc>, window_params = [{transform_indices = @transform_0, window_bounds = array<i64: 1, 18, 18, 4>}, {pipeline_mode = #tpu.pipeline_mode<synchronous>, transform_indices = @transform_1, window_bounds = array<i64: 9, 4, 32>}, {pipeline_mode = #tpu.pipeline_mode<synchronous>, transform_indices = @transform_2, window_bounds = array<i64: 1, 32>}, {transform_indices = @transform_3, window_bounds = array<i64: 1, 1, 32>}, {transform_indices = @transform_4, window_bounds = array<i64: 1, 1, 32>}]} {
    %cst = arith.constant 0.000000e+00 : f32
    %0 = vector.broadcast %cst : f32 to vector<256x32xf32>
    %c0 = arith.constant 0 : index
    %c0_0 = arith.constant 0 : index
    %c0_1 = arith.constant 0 : index
    %c0_2 = arith.constant 0 : index
    %1 = vector.load %arg1[%c0, %c0_0, %c0_1, %c0_2] : memref<1x18x18x4xbf16, #tpu.memory_space<vmem>>, vector<1x16x16x4xbf16>
    %2 = vector.shape_cast %1 : vector<1x16x16x4xbf16> to vector<16x16x4xbf16>
    %3 = vector.shape_cast %2 : vector<16x16x4xbf16> to vector<256x4xbf16>
    %c0_3 = arith.constant 0 : index
    %c0_4 = arith.constant 0 : index
    %c0_5 = arith.constant 0 : index
    %4 = vector.load %arg2[%c0_3, %c0_4, %c0_5] : memref<9x4x32xbf16, #tpu.memory_space<vmem>>, vector<1x4x32xbf16>
    %5 = vector.shape_cast %4 : vector<1x4x32xbf16> to vector<4x32xbf16>
    %cst_6 = arith.constant dense<0.000000e+00> : vector<256x32xf32>
    %6 = tpu.matmul %3, %5, %cst_6 {dimension_numbers = #tpu.dot_dimension_numbers<[1], [0], [0], [1], [0, 0, 1, 1], [], []>} : vector<256x4xbf16>, vector<4x32xbf16>, vector<256x32xf32> -> vector<256x32xf32>
    %7 = arith.addf %0, %6 : vector<256x32xf32>
    %c0_7 = arith.constant 0 : index
    %c0_8 = arith.constant 0 : index
    %c1 = arith.constant 1 : index
    %c0_9 = arith.constant 0 : index
    %8 = vector.load %arg1[%c0_7, %c0_8, %c1, %c0_9] : memref<1x18x18x4xbf16, #tpu.memory_space<vmem>>, vector<1x16x16x4xbf16>
    %9 = vector.shape_cast %8 : vector<1x16x16x4xbf16> to vector<16x16x4xbf16>
    %10 = vector.shape_cast %9 : vector<16x16x4xbf16> to vector<256x4xbf16>
    %c1_10 = arith.constant 1 : index
    %c0_11 = arith.constant 0 : index
    %c0_12 = arith.constant 0 : index
    %11 = vector.load %arg2[%c1_10, %c0_11, %c0_12] : memref<9x4x32xbf16, #tpu.memory_space<vmem>>, vector<1x4x32xbf16>
    %12 = vector.shape_cast %11 : vector<1x4x32xbf16> to vector<4x32xbf16>
    %cst_13 = arith.constant dense<0.000000e+00> : vector<256x32xf32>
    %13 = tpu.matmul %10, %12, %cst_13 {dimension_numbers = #tpu.dot_dimension_numbers<[1], [0], [0], [1], [0, 0, 1, 1], [], []>} : vector<256x4xbf16>, vector<4x32xbf16>, vector<256x32xf32> -> vector<256x32xf32>
    %14 = arith.addf %7, %13 : vector<256x32xf32>
    %c0_14 = arith.constant 0 : index
    %c0_15 = arith.constant 0 : index
    %c2 = arith.constant 2 : index
    %c0_16 = arith.constant 0 : index
    %15 = vector.load %arg1[%c0_14, %c0_15, %c2, %c0_16] : memref<1x18x18x4xbf16, #tpu.memory_space<vmem>>, vector<1x16x16x4xbf16>
    %16 = vector.shape_cast %15 : vector<1x16x16x4xbf16> to vector<16x16x4xbf16>
    %17 = vector.shape_cast %16 : vector<16x16x4xbf16> to vector<256x4xbf16>
    %c2_17 = arith.constant 2 : index
    %c0_18 = arith.constant 0 : index
    %c0_19 = arith.constant 0 : index
    %18 = vector.load %arg2[%c2_17, %c0_18, %c0_19] : memref<9x4x32xbf16, #tpu.memory_space<vmem>>, vector<1x4x32xbf16>
    %19 = vector.shape_cast %18 : vector<1x4x32xbf16> to vector<4x32xbf16>
    %cst_20 = arith.constant dense<0.000000e+00> : vector<256x32xf32>
    %20 = tpu.matmul %17, %19, %cst_20 {dimension_numbers = #tpu.dot_dimension_numbers<[1], [0], [0], [1], [0, 0, 1, 1], [], []>} : vector<256x4xbf16>, vector<4x32xbf16>, vector<256x32xf32> -> vector<256x32xf32>
    %21 = arith.addf %14, %20 : vector<256x32xf32>
    %c0_21 = arith.constant 0 : index
    %c1_22 = arith.constant 1 : index
    %c0_23 = arith.constant 0 : index
    %c0_24 = arith.constant 0 : index
    %22 = vector.load %arg1[%c0_21, %c1_22, %c0_23, %c0_24] : memref<1x18x18x4xbf16, #tpu.memory_space<vmem>>, vector<1x16x16x4xbf16>
    %23 = vector.shape_cast %22 : vector<1x16x16x4xbf16> to vector<16x16x4xbf16>
    %24 = vector.shape_cast %23 : vector<16x16x4xbf16> to vector<256x4xbf16>
    %c3 = arith.constant 3 : index
    %c0_25 = arith.constant 0 : index
    %c0_26 = arith.constant 0 : index
    %25 = vector.load %arg2[%c3, %c0_25, %c0_26] : memref<9x4x32xbf16, #tpu.memory_space<vmem>>, vector<1x4x32xbf16>
    %26 = vector.shape_cast %25 : vector<1x4x32xbf16> to vector<4x32xbf16>
    %cst_27 = arith.constant dense<0.000000e+00> : vector<256x32xf32>
    %27 = tpu.matmul %24, %26, %cst_27 {dimension_numbers = #tpu.dot_dimension_numbers<[1], [0], [0], [1], [0, 0, 1, 1], [], []>} : vector<256x4xbf16>, vector<4x32xbf16>, vector<256x32xf32> -> vector<256x32xf32>
    %28 = arith.addf %21, %27 : vector<256x32xf32>
    %c0_28 = arith.constant 0 : index
    %c1_29 = arith.constant 1 : index
    %c1_30 = arith.constant 1 : index
    %c0_31 = arith.constant 0 : index
    %29 = vector.load %arg1[%c0_28, %c1_29, %c1_30, %c0_31] : memref<1x18x18x4xbf16, #tpu.memory_space<vmem>>, vector<1x16x16x4xbf16>
    %30 = vector.shape_cast %29 : vector<1x16x16x4xbf16> to vector<16x16x4xbf16>
    %31 = vector.shape_cast %30 : vector<16x16x4xbf16> to vector<256x4xbf16>
    %c4 = arith.constant 4 : index
    %c0_32 = arith.constant 0 : index
    %c0_33 = arith.constant 0 : index
    %32 = vector.load %arg2[%c4, %c0_32, %c0_33] : memref<9x4x32xbf16, #tpu.memory_space<vmem>>, vector<1x4x32xbf16>
    %33 = vector.shape_cast %32 : vector<1x4x32xbf16> to vector<4x32xbf16>
    %cst_34 = arith.constant dense<0.000000e+00> : vector<256x32xf32>
    %34 = tpu.matmul %31, %33, %cst_34 {dimension_numbers = #tpu.dot_dimension_numbers<[1], [0], [0], [1], [0, 0, 1, 1], [], []>} : vector<256x4xbf16>, vector<4x32xbf16>, vector<256x32xf32> -> vector<256x32xf32>
    %35 = arith.addf %28, %34 : vector<256x32xf32>
    %c0_35 = arith.constant 0 : index
    %c1_36 = arith.constant 1 : index
    %c2_37 = arith.constant 2 : index
    %c0_38 = arith.constant 0 : index
    %36 = vector.load %arg1[%c0_35, %c1_36, %c2_37, %c0_38] : memref<1x18x18x4xbf16, #tpu.memory_space<vmem>>, vector<1x16x16x4xbf16>
    %37 = vector.shape_cast %36 : vector<1x16x16x4xbf16> to vector<16x16x4xbf16>
    %38 = vector.shape_cast %37 : vector<16x16x4xbf16> to vector<256x4xbf16>
    %c5 = arith.constant 5 : index
    %c0_39 = arith.constant 0 : index
    %c0_40 = arith.constant 0 : index
    %39 = vector.load %arg2[%c5, %c0_39, %c0_40] : memref<9x4x32xbf16, #tpu.memory_space<vmem>>, vector<1x4x32xbf16>
    %40 = vector.shape_cast %39 : vector<1x4x32xbf16> to vector<4x32xbf16>
    %cst_41 = arith.constant dense<0.000000e+00> : vector<256x32xf32>
    %41 = tpu.matmul %38, %40, %cst_41 {dimension_numbers = #tpu.dot_dimension_numbers<[1], [0], [0], [1], [0, 0, 1, 1], [], []>} : vector<256x4xbf16>, vector<4x32xbf16>, vector<256x32xf32> -> vector<256x32xf32>
    %42 = arith.addf %35, %41 : vector<256x32xf32>
    %c0_42 = arith.constant 0 : index
    %c2_43 = arith.constant 2 : index
    %c0_44 = arith.constant 0 : index
    %c0_45 = arith.constant 0 : index
    %43 = vector.load %arg1[%c0_42, %c2_43, %c0_44, %c0_45] : memref<1x18x18x4xbf16, #tpu.memory_space<vmem>>, vector<1x16x16x4xbf16>
    %44 = vector.shape_cast %43 : vector<1x16x16x4xbf16> to vector<16x16x4xbf16>
    %45 = vector.shape_cast %44 : vector<16x16x4xbf16> to vector<256x4xbf16>
    %c6 = arith.constant 6 : index
    %c0_46 = arith.constant 0 : index
    %c0_47 = arith.constant 0 : index
    %46 = vector.load %arg2[%c6, %c0_46, %c0_47] : memref<9x4x32xbf16, #tpu.memory_space<vmem>>, vector<1x4x32xbf16>
    %47 = vector.shape_cast %46 : vector<1x4x32xbf16> to vector<4x32xbf16>
    %cst_48 = arith.constant dense<0.000000e+00> : vector<256x32xf32>
    %48 = tpu.matmul %45, %47, %cst_48 {dimension_numbers = #tpu.dot_dimension_numbers<[1], [0], [0], [1], [0, 0, 1, 1], [], []>} : vector<256x4xbf16>, vector<4x32xbf16>, vector<256x32xf32> -> vector<256x32xf32>
    %49 = arith.addf %42, %48 : vector<256x32xf32>
    %c0_49 = arith.constant 0 : index
    %c2_50 = arith.constant 2 : index
    %c1_51 = arith.constant 1 : index
    %c0_52 = arith.constant 0 : index
    %50 = vector.load %arg1[%c0_49, %c2_50, %c1_51, %c0_52] : memref<1x18x18x4xbf16, #tpu.memory_space<vmem>>, vector<1x16x16x4xbf16>
    %51 = vector.shape_cast %50 : vector<1x16x16x4xbf16> to vector<16x16x4xbf16>
    %52 = vector.shape_cast %51 : vector<16x16x4xbf16> to vector<256x4xbf16>
    %c7 = arith.constant 7 : index
    %c0_53 = arith.constant 0 : index
    %c0_54 = arith.constant 0 : index
    %53 = vector.load %arg2[%c7, %c0_53, %c0_54] : memref<9x4x32xbf16, #tpu.memory_space<vmem>>, vector<1x4x32xbf16>
    %54 = vector.shape_cast %53 : vector<1x4x32xbf16> to vector<4x32xbf16>
    %cst_55 = arith.constant dense<0.000000e+00> : vector<256x32xf32>
    %55 = tpu.matmul %52, %54, %cst_55 {dimension_numbers = #tpu.dot_dimension_numbers<[1], [0], [0], [1], [0, 0, 1, 1], [], []>} : vector<256x4xbf16>, vector<4x32xbf16>, vector<256x32xf32> -> vector<256x32xf32>
    %56 = arith.addf %49, %55 : vector<256x32xf32>
    %c0_56 = arith.constant 0 : index
    %c2_57 = arith.constant 2 : index
    %c2_58 = arith.constant 2 : index
    %c0_59 = arith.constant 0 : index
    %57 = vector.load %arg1[%c0_56, %c2_57, %c2_58, %c0_59] : memref<1x18x18x4xbf16, #tpu.memory_space<vmem>>, vector<1x16x16x4xbf16>
    %58 = vector.shape_cast %57 : vector<1x16x16x4xbf16> to vector<16x16x4xbf16>
    %59 = vector.shape_cast %58 : vector<16x16x4xbf16> to vector<256x4xbf16>
    %c8 = arith.constant 8 : index
    %c0_60 = arith.constant 0 : index
    %c0_61 = arith.constant 0 : index
    %60 = vector.load %arg2[%c8, %c0_60, %c0_61] : memref<9x4x32xbf16, #tpu.memory_space<vmem>>, vector<1x4x32xbf16>
    %61 = vector.shape_cast %60 : vector<1x4x32xbf16> to vector<4x32xbf16>
    %cst_62 = arith.constant dense<0.000000e+00> : vector<256x32xf32>
    %62 = tpu.matmul %59, %61, %cst_62 {dimension_numbers = #tpu.dot_dimension_numbers<[1], [0], [0], [1], [0, 0, 1, 1], [], []>} : vector<256x4xbf16>, vector<4x32xbf16>, vector<256x32xf32> -> vector<256x32xf32>
    %63 = arith.addf %56, %62 : vector<256x32xf32>
    %c0_63 = arith.constant 0 : index
    %c0_64 = arith.constant 0 : index
    %64 = vector.load %arg3[%c0_63, %c0_64] : memref<1x32xf32, #tpu.memory_space<vmem>>, vector<1x32xf32>
    %65 = vector.broadcast %64 : vector<1x32xf32> to vector<256x32xf32>
    %66 = arith.addf %63, %65 : vector<256x32xf32>
    %cst_65 = arith.constant 0.000000e+00 : f32
    %67 = vector.broadcast %cst_65 : f32 to vector<256x32xf32>
    %68 = arith.maximumf %66, %67 : vector<256x32xf32>
    %cst_66 = arith.constant dense<0.000000e+00> : vector<32xf32>
    %69 = vector.multi_reduction <add>, %68, %cst_66 [0] : vector<256x32xf32> to vector<32xf32>
    %70 = vector.shape_cast %69 : vector<32xf32> to vector<1x32xf32>
    %cst_67 = arith.constant 3.906250e-03 : f32
    %71 = vector.broadcast %cst_67 : f32 to vector<1x32xf32>
    %72 = arith.mulf %70, %71 : vector<1x32xf32>
    %73 = vector.shape_cast %72 : vector<1x32xf32> to vector<1x1x32xf32>
    %c0_68 = arith.constant 0 : index
    %c0_69 = arith.constant 0 : index
    %c0_70 = arith.constant 0 : index
    %74 = vector.load %arg4[%c0_68, %c0_69, %c0_70] : memref<1x1x32xf32, #tpu.memory_space<vmem>>, vector<1x1x32xf32>
    tpu.vector_store %arg4[%c0_68, %c0_69, %c0_70], %73 {strides = array<i32>} : memref<1x1x32xf32, #tpu.memory_space<vmem>>, vector<1x1x32xf32>,
    %75 = vector.shape_cast %72 : vector<1x32xf32> to vector<1x1x32xf32>
    %76 = arith.truncf %75 : vector<1x1x32xf32> to vector<1x1x32xbf16>
    %c0_71 = arith.constant 0 : index
    %c0_72 = arith.constant 0 : index
    %c0_73 = arith.constant 0 : index
    %77 = vector.load %arg5[%c0_71, %c0_72, %c0_73] : memref<1x1x32xbf16, #tpu.memory_space<vmem>>, vector<1x1x32xbf16>
    tpu.vector_store %arg5[%c0_71, %c0_72, %c0_73], %76 {strides = array<i32>} : memref<1x1x32xbf16, #tpu.memory_space<vmem>>, vector<1x1x32xbf16>,
    return
  }
  func.func @transform_0(%arg0: i32) -> (i32, i32, i32, i32) {
    %c0_i32 = arith.constant 0 : i32
    %c0_i32_0 = arith.constant 0 : i32
    %c0_i32_1 = arith.constant 0 : i32
    %c0_i32_2 = arith.constant 0 : i32
    return %arg0, %c0_i32, %c0_i32_0, %c0_i32_1 : i32, i32, i32, i32
  }
  func.func @transform_1(%arg0: i32) -> (i32, i32, i32) {
    %c0_i32 = arith.constant 0 : i32
    %c0_i32_0 = arith.constant 0 : i32
    %c0_i32_1 = arith.constant 0 : i32
    %c0_i32_2 = arith.constant 0 : i32
    return %c0_i32, %c0_i32_0, %c0_i32_1 : i32, i32, i32
  }
  func.func @transform_2(%arg0: i32) -> (i32, i32) {
    %c0_i32 = arith.constant 0 : i32
    %c0_i32_0 = arith.constant 0 : i32
    %c0_i32_1 = arith.constant 0 : i32
    return %c0_i32, %c0_i32_0 : i32, i32
  }
  func.func @transform_3(%arg0: i32) -> (i32, i32, i32) {
    %c0_i32 = arith.constant 0 : i32
    %c0_i32_0 = arith.constant 0 : i32
    %c0_i32_1 = arith.constant 0 : i32
    return %arg0, %c0_i32, %c0_i32_0 : i32, i32, i32
  }
  func.func @transform_4(%arg0: i32) -> (i32, i32, i32) {
    %c0_i32 = arith.constant 0 : i32
    %c0_i32_0 = arith.constant 0 : i32
    %c0_i32_1 = arith.constant 0 : i32
    return %arg0, %c0_i32, %c0_i32_0 : i32, i32, i32
  }
}

module attributes {stable_mosaic.version = 11 : i64} {
  func.func @predictor_kernel(%arg0: i32, %arg1: memref<8x32xbf16, #tpu.memory_space<vmem>>, %arg2: memref<32x128xbf16, #tpu.memory_space<vmem>>, %arg3: memref<1x128xf32, #tpu.memory_space<vmem>>, %arg4: memref<8x128xf32, #tpu.memory_space<vmem>>) attributes {dimension_semantics = [#tpu.dimension_semantics<parallel>], iteration_bounds = array<i64: 1>, scalar_prefetch = 0 : i64, scratch_operands = 0 : i64, tpu.core_type = #tpu.core_type<tc>, window_params = [{pipeline_mode = #tpu.pipeline_mode<synchronous>, transform_indices = @transform_0, window_bounds = array<i64: 8, 32>}, {transform_indices = @transform_1, window_bounds = array<i64: 32, 128>}, {transform_indices = @transform_2, window_bounds = array<i64: 1, 128>}, {transform_indices = @transform_3, window_bounds = array<i64: 8, 128>}]} {
    %c0 = arith.constant 0 : index
    %c0_0 = arith.constant 0 : index
    %0 = vector.load %arg1[%c0, %c0_0] : memref<8x32xbf16, #tpu.memory_space<vmem>>, vector<8x32xbf16>
    %c0_1 = arith.constant 0 : index
    %c0_2 = arith.constant 0 : index
    %1 = vector.load %arg2[%c0_1, %c0_2] : memref<32x128xbf16, #tpu.memory_space<vmem>>, vector<32x128xbf16>
    %cst = arith.constant dense<0.000000e+00> : vector<8x128xf32>
    %2 = tpu.matmul %0, %1, %cst {dimension_numbers = #tpu.dot_dimension_numbers<[1], [0], [0], [1], [0, 0, 1, 1], [], []>} : vector<8x32xbf16>, vector<32x128xbf16>, vector<8x128xf32> -> vector<8x128xf32>
    %c0_3 = arith.constant 0 : index
    %c0_4 = arith.constant 0 : index
    %3 = vector.load %arg3[%c0_3, %c0_4] : memref<1x128xf32, #tpu.memory_space<vmem>>, vector<1x128xf32>
    %4 = vector.broadcast %3 : vector<1x128xf32> to vector<8x128xf32>
    %5 = arith.addf %2, %4 : vector<8x128xf32>
    %c0_5 = arith.constant 0 : index
    %c0_6 = arith.constant 0 : index
    %6 = vector.load %arg4[%c0_5, %c0_6] : memref<8x128xf32, #tpu.memory_space<vmem>>, vector<8x128xf32>
    tpu.vector_store %arg4[%c0_5, %c0_6], %5 {strides = array<i32>} : memref<8x128xf32, #tpu.memory_space<vmem>>, vector<8x128xf32>,
    return
  }
  func.func @transform_0(%arg0: i32) -> (i32, i32) {
    %c0_i32 = arith.constant 0 : i32
    %c0_i32_0 = arith.constant 0 : i32
    %c0_i32_1 = arith.constant 0 : i32
    return %c0_i32, %c0_i32_0 : i32, i32
  }
  func.func @transform_1(%arg0: i32) -> (i32, i32) {
    %c0_i32 = arith.constant 0 : i32
    %c0_i32_0 = arith.constant 0 : i32
    return %c0_i32, %arg0 : i32, i32
  }
  func.func @transform_2(%arg0: i32) -> (i32, i32) {
    %c0_i32 = arith.constant 0 : i32
    %c0_i32_0 = arith.constant 0 : i32
    return %c0_i32, %arg0 : i32, i32
  }
  func.func @transform_3(%arg0: i32) -> (i32, i32) {
    %c0_i32 = arith.constant 0 : i32
    %c0_i32_0 = arith.constant 0 : i32
    return %c0_i32, %arg0 : i32, i32
  }
}

</mosaic_0001>

<bundles_post_ra>
// kernel: diet_forward.3
= control target key start
LH: loop header
LB: loop body
LE: loop exit
PB: predicated region body
PF: predicated region fallthrough
CT: control target
= control target key end

     0   :  { %v107_v0 = vmov 0.0   ;;  %vm108_vm0 = vmmov 0   ;;  %vm39_vm1 = vcmask 261120   ;;  %s144_s1 = inlined_call_operand.vmem [shape: bf16[32,128], index: 1, kind: input, shape index: {}]   ;;  %s145_s0 = inlined_call_operand.vmem [shape: bf16[8,32], index: 0, kind: input, shape index: {}]   ;;  %s146_s2 = inlined_call_operand.vmem [shape: f32[1,128], index: 2, kind: input, shape index: {}]   ;;  %s147_s3 = inlined_call_operand.vmem [shape: f32[8,128], index: 3, kind: output, shape index: {}]  }
   0x1   :  { %95 = vmatprep.subr.bf16.mxu0 %v107_v0  ;;  %v105_v1 = vld [vmem:[%s144_s1 + $0x8] sm:$0xff]   ;;  %99 = vmatprep.mubr.msk.bf16.mxu0 %vm108_vm0, %v107_v0  ;;  %v106_v2 = vld [vmem:[%s144_s1] sm:$0xff]  }
   0x2   :  { %96 = vmatpush3.bf16.msra.mxu0 %v105_v1  ;;  %v15_v3 = vld [vmem:[%s145_s0] sm:$0xf] }
   0x3   :  { %97 = vmatprep.subr.bf16.mxu0 %v107_v0  ;;  %v88_v4 = vld [vmem:[%s146_s2] ss:$0 sm:$0xff] }
   0x6   :  { %98 = vmatpush3.bf16.msra.mxu0 %v106_v2 }
   0x9   :  { %100 = vmatmul.mubr.msk.bf16.vlgmr.msra.gmra.mxu0 %vm39_vm1, %v15_v3 }
  0xc9   :  { %v77_v5 = vpop.f32.mrf.mxu0 }
  0xca   :  { %v78_v6 = vadd.f32 %v88_v4, %v77_v5 }
  0xcb   :  { %v101_v7 = vpop.f32.mrf.mxu0 }
  0xcc   :  { %83 = vst [vmem:[%s147_s3] sm:$0xff] %v78_v6 }
  0xcd   :  { %v80_v8 = vpop.f32.mrf.mxu0 }
  0xcf   :  { %v102_v9 = vpop.f32.mrf.mxu0 }

// kernel: diet_forward.2
= control target key start
LH: loop header
LB: loop body
LE: loop exit
PB: predicated region body
PF: predicated region fallthrough
CT: control target
= control target key end

     0   :  { %10 = vsyncpa [#allocation3], 0  ;;  %s8898_s0 = inlined_call_operand.vmem [shape: bf16[2,18,18,4], index: 0, kind: input, shape index: {}]   ;;  %s8899_s1 = inlined_call_operand.vmem [shape: bf16[9,4,32], index: 1, kind: input, shape index: {}]   ;;  %s8900_s2 = inlined_call_operand.vmem [shape: f32[1,32], index: 2, kind: input, shape index: {}]   ;;  %s8901_s3 = inlined_call_operand.hbm [shape: f32[2,1,32], index: 3, kind: output, shape index: {0}]   ;;  %s8902_s4 = inlined_call_operand.vmem [shape: bf16[2,1,32], index: 4, kind: output, shape index: {1}]  }
   0x1   :  { %12 = vsyncpa [#allocation3 + $0x1], 0  ;;  %s6202_s15 = smov 0   ;;  %s6204_s16 = smov 0  }
   0x2   :  { %s6206_s17 = smov 0   ;;  %s6208_s18 = smov 0  }
   0x3 LB: > { %s6223_s19 = sadd.s32 4294967295, %s6174_s18   ;;  %s5008_s20 = sadd.s32 4294967294, %s6174_s18   ;;  %s6174_s18 = sphi %s6208_s18, %s9128_s18   ;;  %s6170_s17 = sphi %s6206_s17, %s9127_s17   ;;  %s6166_s16 = sphi %s6204_s16, %s9126_s16   ;;  %s6162_s15 = sphi %s6202_s15, %s9125_s15  }
   0x4   : > { %s6227_s21 = sadd.s32 1, %s6174_s18   ;;  %s93_s22 = sadd.s32 1, %s6170_s17 }
   0x5   : > { %s90_s23 = ssub.s32 %s6174_s18, %s6227_s21  ;;  %p103_p0 = scmp.ne.s32.totalorder %s6170_s17, %s6166_s16 }
   0x6   : > { %p91_p1 = scmp.eq.s32.totalorder %s90_s23, 0  ;;  %p104_p2 = scmp.eq.s32.totalorder %s6223_s19, 1 }
   0x7   : > { %p109_p3 = scmp.ne.s32.totalorder %s6166_s16, %s6162_s15  ;;  %p110_p4 = scmp.eq.s32.totalorder %s5008_s20, 1 }
   0x8   : > { %s6238_s24 = scalar_select %p91_p1, %s6170_s17, %s93_s22  }
   0x9   : > { %p6240_p5 = por %p104_p2, %p103_p0  ;;  %p6244_p6 = por %p110_p4, %p109_p3 }
   0xa   : > { %p5011_p7 = scmp.ge.s32.totalorder %s6174_s18, 1  ;;  %p168_p8 = scmp.lt.s32.totalorder %s6174_s18, 3 }
   0xc   : > { %p169_p9 = pnand %p5011_p7, %p168_p8 }
   0xe   : > { %172 = sbr.rel (%p169_p9) target bundleno = 599 (0x257), region = 32 }
  0x13   : > { %v5013_v0 = vld [vmem:[%s8899_s1 + $0x2] sm:$0x3]  ;;  %vm740_vm0 = vcmask 1041408   ;;  %p196_p10 = scmp.lt.s32.totalorder %s6223_s19, 1  ;;  %v237_v2 = vld [vmem:[%s8899_s1] sm:$0x3] }
  0x14   : > { %6015 = vmatprep.subr.msk.bf16.mxu1 %vm740_vm0, %v5013_v0  ;;  %6014 = vmatprep.subr.msk.bf16.mxu0 %vm740_vm0, %v5013_v0  ;;  %v742_v1 = vsel %vm740_vm0, %v5013_v0, 0  ;;  %v5094_v3 = vld [vmem:[%s8899_s1 + $0x4] sm:$0x3]  ;;  %vm254_vm1 = vsmask.f32 3328  ;;  %v6275_v4 = vsel %vm740_vm0, %v237_v2, 0 }
  0x15   : > { %6013 = vmatpush3.bf16.msra.mxu1 %v742_v1  ;;  %5707 = vmatpush3.bf16.msra.mxu0 %v742_v1  ;;  %s6261_s5 = scalar_select %p196_p10, %s6223_s19, 1  ;;  %vm255_vm2 = vsmask.f32 7440  ;;  %vm691_vm3 = vcmask 31744   ;;  %v6301_v16 = vsel %vm740_vm0, %v5094_v3, 0  ;;  %vm1245_vm5 = vcmask 1042432  }
  0x16   : > { %6016 = vmatprep.subr.msk.bf16.mxu1 %vm740_vm0, %v237_v2  ;;  %6017 = vmatprep.subr.msk.bf16.mxu0 %vm740_vm0, %v5094_v3  ;;  %vm6316_vm4 = vmor %vm254_vm1, %vm255_vm2  ;;  %vm1246_vm6 = vcmask 1046532   ;;  %vm4835_vm8 = vcmask 261120   ;;  %s189_s10 = sand.u32 1, %s6166_s16   ;;  %vm4906_vm9 = vcmask 253952   ;;  %vm4910_vm10 = vsmask.f32 256 }
  0x17   : > { %s6024_s8 = smul.u32 216, %s6261_s5  ;;  %vm6602_vm7 = vmor %vm1245_vm5, %vm1246_vm6  ;;  %s190_s12 = scalar_lea.vmem [#allocation2], %s189_s10 }
  0x18   : > { %s4931_s13 = sshll.u32 %s190_s12, 4  ;;  %s8844_s22 = scalar_lea.vmem %s8902_s4, %s6261_s5  ;;  %vm8853_vm11 = vmand %vm4906_vm9, %vm4910_vm10  ;;  %s8851_s13 = int_to_ptr.vmem [resolvable:$true] %s4931_s13 }
  0x19   : > { %s6272_s11 = scalar_lea.vmem %s8898_s0, %s6024_s8  ;;  %s6114_s5 = scalar_lea.vmem %s8851_s13, 16 }
  0x1a   : > { %v6278_v5 = vld [vmem:[%s6272_s11] sm:$0xf]  ;;  %v6281_v6 = vld [vmem:[%s6272_s11 + $0x4] sm:$0xf]  ;;  %v6284_v7 = vld [vmem:[%s6272_s11 + $0x8] sm:$0x1]  ;;  %p6115_p11 = scmp.ne.s32.totalorder %s8851_s13, %s6114_s5 }
  0x1b   : > { %v258_v8 = vshrl.u32 %v6278_v5, 16  ;;  %v261_v9 = vshll.u32 %v6278_v5, 16  ;;  %v267_v10 = vshll.u32 %v6281_v6, 16  ;;  %v271_v11 = vshrl.u32 %v6281_v6, 16  ;;  %v6291_v12 = vld [vmem:[%s6272_s11 + $0x60] sm:$0xf] }
  0x1c   : > { %v277_v13 = vshll.u32 %v6284_v7, 16  ;;  %v6295_v14 = vld [vmem:[%s6272_s11 + $0x64] sm:$0xf]  ;;  %v6298_v15 = vld [vmem:[%s6272_s11 + $0x68] sm:$0x1]  ;;  %v450_v22 = vshrl.u32 %v6291_v12, 16  ;;  %p6116_p12 = pnand %p6115_p11, %p6240_p5 }
  0x1d   : > { %v260_v17 = vrot.slane %v258_v8, 4  ;;  %v263_v18 = vrot.slane %v261_v9, 5  ;;  %v269_v19 = vrot.slane %v267_v10, 5  ;;  %v273_v20 = vrot.slane %v271_v11, 4  ;;  %v6309_v29 = vld [vmem:[%s6272_s11 + $0xc] sm:$0xf] }
  0x1e   : > { %v279_v21 = vrot.slane %v277_v13, 5  ;;  %v453_v23 = vshll.u32 %v6291_v12, 16  ;;  %v459_v24 = vshll.u32 %v6295_v14, 16  ;;  %v463_v27 = vshrl.u32 %v6295_v14, 16  ;;  %v6312_v30 = vld [vmem:[%s6272_s11 + $0x10] sm:$0xf]  ;;  %p6117_p13 = pneg %p6116_p12 }
  0x1f   : > { %v264_v25 = vor.u32 %v263_v18, %v260_v17  ;;  %v274_v26 = vor.u32 %v273_v20, %v269_v19  ;;  %v469_v28 = vshll.u32 %v6298_v15, 16  ;;  %v452_v33 = vrot.slane %v450_v22, 4  ;;  %v6322_v41 = vld [vmem:[%s6272_s11 + $0x14] sm:$0x1]  ;;  %v6333_v53 = vld [vmem:[%s6272_s11 + $0x6c] sm:$0xf] }
  0x20   : > { %v455_v34 = vrot.slane %v453_v23, 5  ;;  %v461_v35 = vrot.slane %v459_v24, 5  ;;  %v465_v38 = vrot.slane %v463_v27, 4  ;;  %v282_v42 = vshrl.u32 %v6309_v29, 16  ;;  %v6337_v58 = vld [vmem:[%s6272_s11 + $0x70] sm:$0xf] }
  0x21   : > { %v265_v36 = vrot.slane %v264_v25, 4  ;;  %v275_v37 = vrot.slane %v274_v26, 4  ;;  %v471_v39 = vrot.slane %v469_v28, 5  ;;  %v285_v43 = vshll.u32 %v6309_v29, 16  ;;  %v6345_v63 = vld [vmem:[%s6272_s11 + $0x74] sm:$0x1] }
  0x22   : > { %v456_v40 = vor.u32 %v455_v34, %v452_v33  ;;  %v291_v44 = vshll.u32 %v6312_v30, 16  ;;  %v466_v47 = vor.u32 %v465_v38, %v461_v35  ;;  %v295_v48 = vshrl.u32 %v6312_v30, 16  ;;  %v6351_v8 = vld [vmem:[%s6272_s11 + $0x18] sm:$0xf]  ;;  %v6364_v25 = vld [vmem:[%s6272_s11 + $0x20] sm:$0x1] }
  0x23   : > { %v270_v45 = vsel %vm6316_vm4, %v265_v36, %v269_v19  ;;  %v280_v46 = vsel %vm6316_vm4, %v275_v37, %v279_v21  ;;  %v284_v51 = vrot.slane %v282_v42, 4  ;;  %v287_v52 = vrot.slane %v285_v43, 5  ;;  %v6358_v21 = vld [vmem:[%s6272_s11 + $0x1c] sm:$0xf]  ;;  %s6176_s29 = smov [#allocation2]  }
  0x24   : > { %v5014_v49 = vcombine.low %v270_v45, %v280_v46  ;;  %v457_v50 = vrot.slane %v456_v40, 4  ;;  %v467_v54 = vrot.slane %v466_v47, 4  ;;  %v293_v55 = vrot.slane %v291_v44, 5  ;;  %v6377_v40 = vld [vmem:[%s8899_s1 + $0x8] sm:$0x3]  ;;  %s6118_s30 = sshll.u32 %s6176_s29, 4  ;;  %s6119_s30 = int_to_ptr.vmem [resolvable:$false] %s6118_s30 }
  0x25   : > { %v297_v56 = vrot.slane %v295_v48, 4  ;;  %v301_v57 = vshll.u32 %v6322_v41, 16  ;;  %v288_v60 = vor.u32 %v287_v52, %v284_v51  ;;  %v474_v3 = vshrl.u32 %v6333_v53, 16  ;;  %v6382_v46 = vld [vmem:[%s6272_s11 + $0x7c] sm:$0xf]  ;;  %s6120_s6 = scalar_lea.vmem %s6119_s30, 32  ;;  %p6121_p0 = scmp.lt.s32.totalorder %s8851_s13, %s6119_s30 }
  0x26   : > { %5708 = vmatprep.mubr.msk.bf16.mxu0 %vm691_vm3, %v5014_v49  ;;  %v462_v59 = vsel %vm6316_vm4, %v457_v50, %v461_v35  ;;  %v472_v0 = vsel %vm6316_vm4, %v467_v54, %v471_v39  ;;  %v477_v11 = vshll.u32 %v6333_v53, 16  ;;  %v483_v13 = vshll.u32 %v6337_v58, 16  ;;  %v6371_v35 = vld [vmem:[%s6272_s11 + $0x78] sm:$0xf]  ;;  %p6122_p1 = scmp.lt.s32.totalorder %s6120_s6, %s6114_s5 }
  0x27   : > { %v298_v1 = vor.u32 %v297_v56, %v293_v55  ;;  %v303_v2 = vrot.slane %v301_v57, 5  ;;  %v5022_v9 = vcombine.low %v462_v59, %v472_v0  ;;  %v289_v10 = vrot.slane %v288_v60, 4  ;;  %v6389_v56 = vld [vmem:[%s6272_s11 + $0x80] sm:$0x1] }
  0x28   : > { %v476_v18 = vrot.slane %v474_v3, 4  ;;  %v487_v19 = vshrl.u32 %v6337_v58, 16  ;;  %v493_v20 = vshll.u32 %v6345_v63, 16  ;;  %v479_v23 = vrot.slane %v477_v11, 5  ;;  %8940 = vst [vmem:[#allocation5_spill] sm:$0xff] %v6389_v56  ;;  %p6123_p2 = por %p6122_p1, %p6121_p0 }
  0x29   : > { %v299_v17 = vrot.slane %v298_v1, 4  ;;  %5724 = vmatprep.mubr.msk.bf16.mxu1 %vm691_vm3, %v5022_v9  ;;  %v294_v22 = vsel %vm6316_vm4, %v289_v10, %v293_v55  ;;  %v485_v24 = vrot.slane %v483_v13, 5  ;;  %v306_v26 = vshrl.u32 %v6351_v8, 16  ;;  %v6395_v1 = vld [vmem:[%s6272_s11 + $0x24] sm:$0xf] }
  0x2a   : > { %v489_v28 = vrot.slane %v487_v19, 4  ;;  %v495_v33 = vrot.slane %v493_v20, 5  ;;  %v309_v34 = vshll.u32 %v6351_v8, 16  ;;  %v480_v37 = vor.u32 %v479_v23, %v476_v18  ;;  %v6403_v10 = vld [vmem:[%s6272_s11 + $0x28] sm:$0xf]  ;;  %p6124_p3 = pnand %p6123_p2, %p6117_p13 }
  0x2b   : > { %v304_v27 = vsel %vm6316_vm4, %v299_v17, %v303_v2  ;;  %v308_v38 = vrot.slane %v306_v26, 4  ;;  %v315_v39 = vshll.u32 %v6358_v21, 16  ;;  %v319_v44 = vshrl.u32 %v6358_v21, 16  ;;  %v6409_v19 = vld [vmem:[%s8899_s1 + $0x6] sm:$0x3] }
  0x2c   : > { %v5015_v36 = vcombine.low %v294_v22, %v304_v27  ;;  %v490_v42 = vor.u32 %v489_v28, %v485_v24  ;;  %v311_v43 = vrot.slane %v309_v34, 5  ;;  %v325_v45 = vshll.u32 %v6364_v25, 16 }
  0x2d   : > { %v481_v47 = vrot.slane %v480_v37, 4  ;;  %v317_v48 = vrot.slane %v315_v39, 5  ;;  %v498_v49 = vshrl.u32 %v6371_v35, 16  ;;  %v501_v50 = vshll.u32 %v6371_v35, 16 }
  0x2e   : > { %5709 = vmatmul.mubr.msk.bf16.vlgmr.msra.gmra.mxu0 %vm691_vm3, %v5015_v36  ;;  %v491_v51 = vrot.slane %v490_v42, 4  ;;  %v312_v52 = vor.u32 %v311_v43, %v308_v38  ;;  %v321_v54 = vrot.slane %v319_v44, 4  ;;  %v327_v55 = vrot.slane %v325_v45, 5  ;;  %v6421_v36 = vld [vmem:[%s6272_s11 + $0x84] sm:$0xf] }
  0x2f   : > { %5775 = vmatpush3.bf16.msra.mxu0 %v6301_v16  ;;  %v486_v57 = vsel %vm6316_vm4, %v481_v47, %v485_v24  ;;  %v500_v59 = vrot.slane %v498_v49, 4  ;;  %v503_v60 = vrot.slane %v501_v50, 5  ;;  %v507_v0 = vshll.u32 %v6382_v46, 16  ;;  %v6414_v24 = vld [vmem:[%s6272_s11 + $0x2c] sm:$0x1] }
  0x30   : > { %6019 = vmatprep.subr.msk.bf16.mxu0 %vm740_vm0, %v6377_v40  ;;  %v496_v16 = vsel %vm6316_vm4, %v491_v51, %v495_v33  ;;  %v313_v2 = vrot.slane %v312_v52, 4  ;;  %v322_v3 = vor.u32 %v321_v54, %v317_v48  ;;  %v511_v9 = vshrl.u32 %v6382_v46, 16  ;;  %v6428_v43 = vld [vmem:[%s6272_s11 + $0x88] sm:$0xf]  ;;  %v6436_v51 = vld [vmem:[%s6272_s11 + $0x8c] sm:$0x1] }
  0x31   : > { %v5023_v11 = vcombine.low %v486_v57, %v496_v16  ;;  %v504_v13 = vor.u32 %v503_v60, %v500_v59  ;;  %v509_v17 = vrot.slane %v507_v0, 5  ;;  %v517_v18 = vshll.u32 %v6389_v56, 16  ;;  %8941 = vst [vmem:[#allocation6_spill] sm:$0xff] %v6436_v51  ;;  %v6444_v60 = vld [vmem:[%s6272_s11 + $0x30] sm:$0xf] }
  0x32   : > { %v318_v20 = vsel %vm6316_vm4, %v313_v2, %v317_v48  ;;  %v323_v22 = vrot.slane %v322_v3, 4  ;;  %v513_v23 = vrot.slane %v511_v9, 4  ;;  %v330_v26 = vshrl.u32 %v6395_v1, 16  ;;  %v6449_v9 = vld [vmem:[%s6272_s11 + $0x34] sm:$0xf] }
  0x33   : > { %5725 = vmatmul.mubr.msk.bf16.vlgmr.msra.gmra.mxu1 %vm691_vm3, %v5023_v11  ;;  %v505_v27 = vrot.slane %v504_v13, 4  ;;  %v519_v28 = vrot.slane %v517_v18, 5  ;;  %v333_v33 = vshll.u32 %v6395_v1, 16  ;;  %v339_v34 = vshll.u32 %v6403_v10, 16 }
  0x34   : > { %5741 = vmatpush3.bf16.msra.mxu1 %v6275_v4  ;;  %v328_v37 = vsel %vm6316_vm4, %v323_v22, %v327_v55  ;;  %v514_v38 = vor.u32 %v513_v23, %v509_v17  ;;  %v332_v39 = vrot.slane %v330_v26, 4  ;;  %v343_v42 = vshrl.u32 %v6403_v10, 16 }
  0x35   : > { %v5016_v44 = vcombine.low %v318_v20, %v328_v37  ;;  %v510_v45 = vsel %vm6316_vm4, %v505_v27, %v509_v17  ;;  %v335_v47 = vrot.slane %v333_v33, 5  ;;  %v341_v48 = vrot.slane %v339_v34, 5  ;;  %6018 = vmatprep.subr.msk.bf16.mxu1 %vm740_vm0, %v6409_v19  ;;  %v6457_v33 = vld [vmem:[%s6272_s11 + $0x38] sm:$0x1] }
  0x36   : > { %v515_v4 = vrot.slane %v514_v38, 4  ;;  %v345_v49 = vrot.slane %v343_v42, 4  ;;  %v349_v50 = vshll.u32 %v6414_v24, 16  ;;  %v522_v52 = vshrl.u32 %v6421_v36, 16  ;;  %v6462_v38 = vld [vmem:[%s6272_s11 + $0x90] sm:$0xf] }
  0x37   : > { %5712 = vmatprep.mubr.msk.bf16.mxu0 %vm691_vm3, %v5016_v44  ;;  %v336_v54 = vor.u32 %v335_v47, %v332_v39  ;;  %v525_v55 = vshll.u32 %v6421_v36, 16  ;;  %v531_v57 = vshll.u32 %v6428_v43, 16  ;;  %v535_v59 = vshrl.u32 %v6428_v43, 16  ;;  %8942 = vst [vmem:[#allocation7_spill] sm:$0xff] %v6462_v38  ;;  %v6467_v47 = vld [vmem:[%s6272_s11 + $0x94] sm:$0xf] }
  0x38   : > { %v520_v0 = vsel %vm6316_vm4, %v515_v4, %v519_v28  ;;  %v346_v16 = vor.u32 %v345_v49, %v341_v48  ;;  %v351_v2 = vrot.slane %v349_v50, 5  ;;  %v524_v3 = vrot.slane %v522_v52, 4  ;;  %8943 = vst [vmem:[#allocation8_spill] sm:$0xff] %v6467_v47 }
  0x39   : > { %v5024_v11 = vcombine.low %v510_v45, %v520_v0  ;;  %v337_v13 = vrot.slane %v336_v54, 4  ;;  %v527_v17 = vrot.slane %v525_v55, 5  ;;  %v533_v18 = vrot.slane %v531_v57, 5 }
  0x3a   : > { %v347_v20 = vrot.slane %v346_v16, 4  ;;  %v537_v22 = vrot.slane %v535_v59, 4  ;;  %v541_v23 = vshll.u32 %v6436_v51, 16  ;;  %v354_v26 = vshrl.u32 %v6444_v60, 16  ;;  %v6476_v16 = vld [vmem:[%s6272_s11 + $0x98] sm:$0x1] }
  0x3b   : > { %5728 = vmatprep.mubr.msk.bf16.mxu1 %vm691_vm3, %v5024_v11  ;;  %v342_v27 = vsel %vm6316_vm4, %v337_v13, %v341_v48  ;;  %v528_v28 = vor.u32 %v527_v17, %v524_v3  ;;  %v357_v34 = vshll.u32 %v6444_v60, 16  ;;  %v363_v37 = vshll.u32 %v6449_v9, 16  ;;  %8944 = vst [vmem:[#allocation9_spill] sm:$0xff] %v6476_v16  ;;  %v6481_v11 = vld [vmem:[%s6272_s11 + $0x3c] sm:$0xf] }
  0x3c   : > { %v352_v39 = vsel %vm6316_vm4, %v347_v20, %v351_v2  ;;  %v538_v42 = vor.u32 %v537_v22, %v533_v18  ;;  %v543_v44 = vrot.slane %v541_v23, 5  ;;  %v356_v45 = vrot.slane %v354_v26, 4  ;;  %v6486_v23 = vld [vmem:[%s6272_s11 + $0x40] sm:$0xf]  ;;  %v1198_v51 = vld [vmem:[%s6272_s11 + $0xc] sm:$0xe] }
  0x3d   : > { %v5017_v48 = vcombine.low %v342_v27, %v352_v39  ;;  %v529_v4 = vrot.slane %v528_v28, 4  ;;  %v359_v49 = vrot.slane %v357_v34, 5  ;;  %v365_v50 = vrot.slane %v363_v37, 5 }
  0x3e   : > { %v539_v52 = vrot.slane %v538_v42, 4  ;;  %v367_v54 = vshrl.u32 %v6449_v9, 16  ;;  %v373_v55 = vshll.u32 %v6457_v33, 16  ;;  %v546_v57 = vshrl.u32 %v6462_v38, 16 }
  0x3f   : > { %5713 = vmatmul.mubr.msk.bf16.gmra.mxu0 %vm691_vm3, %v5017_v48  ;;  %v534_v59 = vsel %vm6316_vm4, %v529_v4, %v533_v18  ;;  %v360_v0 = vor.u32 %v359_v49, %v356_v45  ;;  %v549_v2 = vshll.u32 %v6462_v38, 16  ;;  %v555_v3 = vshll.u32 %v6467_v47, 16  ;;  %v6495_v48 = vld [vmem:[%s6272_s11 + $0x44] sm:$0x1] }
  0x40   : > { %v544_v13 = vsel %vm6316_vm4, %v539_v52, %v543_v44  ;;  %v369_v17 = vrot.slane %v367_v54, 4  ;;  %v375_v20 = vrot.slane %v373_v55, 5  ;;  %v548_v22 = vrot.slane %v546_v57, 4  ;;  %v6500_v52 = vld [vmem:[%s6272_s11 + $0x9c] sm:$0xf] }
  0x41   : > { %v5025_v18 = vcombine.low %v534_v59, %v544_v13  ;;  %v361_v26 = vrot.slane %v360_v0, 4  ;;  %v551_v27 = vrot.slane %v549_v2, 5  ;;  %v557_v28 = vrot.slane %v555_v3, 5  ;;  %8945 = vst [vmem:[#allocation10_spill] sm:$0xff] %v6500_v52  ;;  %v6504_v13 = vld [vmem:[%s6272_s11 + $0xa0] sm:$0xf] }
  0x42   : > { %v370_v34 = vor.u32 %v369_v17, %v365_v50  ;;  %v559_v37 = vshrl.u32 %v6467_v47, 16  ;;  %v565_v39 = vshll.u32 %v6476_v16, 16  ;;  %v378_v42 = vshrl.u32 %v6481_v11, 16  ;;  %8946 = vst [vmem:[#allocation11_spill] sm:$0xff] %v6504_v13 }
  0x43   : > { %5729 = vmatmul.mubr.msk.bf16.gmra.mxu1 %vm691_vm3, %v5025_v18  ;;  %v366_v44 = vsel %vm6316_vm4, %v361_v26, %v365_v50  ;;  %v552_v45 = vor.u32 %v551_v27, %v548_v22  ;;  %v381_v4 = vshll.u32 %v6481_v11, 16  ;;  %v387_v49 = vshll.u32 %v6486_v23, 16  ;;  %v6510_v26 = vld [vmem:[%s6272_s11 + $0xa4] sm:$0x1] }
  0x44   : > { %v371_v54 = vrot.slane %v370_v34, 4  ;;  %v561_v55 = vrot.slane %v559_v37, 4  ;;  %v567_v57 = vrot.slane %v565_v39, 5  ;;  %v380_v59 = vrot.slane %v378_v42, 4  ;;  %8947 = vst [vmem:[#allocation12_spill] sm:$0xff] %v6510_v26 }
  0x45   : > { %v553_v0 = vrot.slane %v552_v45, 4  ;;  %v383_v2 = vrot.slane %v381_v4, 5  ;;  %v389_v3 = vrot.slane %v387_v49, 5  ;;  %v391_v50 = vshrl.u32 %v6486_v23, 16  ;;  %v6514_v34 = vld [vmem:[%s6272_s11 + $0x48] sm:$0xf] }
  0x46   : > { %v376_v17 = vsel %vm6316_vm4, %v371_v54, %v375_v20  ;;  %v562_v22 = vor.u32 %v561_v55, %v557_v28  ;;  %v397_v18 = vshll.u32 %v6495_v48, 16  ;;  %v570_v27 = vshrl.u32 %v6500_v52, 16 }
  0x47   : > { %v5018_v37 = vcombine.low %v366_v44, %v376_v17  ;;  %v558_v39 = vsel %vm6316_vm4, %v553_v0, %v557_v28  ;;  %v384_v42 = vor.u32 %v383_v2, %v380_v59  ;;  %v393_v45 = vrot.slane %v391_v50, 4  ;;  %v6523_v17 = vld [vmem:[%s6272_s11 + $0x4c] sm:$0xf]  ;;  %v6529_v2 = vld [vmem:[%s6272_s11 + $0x50] sm:$0x1] }
  0x48   : > { %v563_v4 = vrot.slane %v562_v22, 4  ;;  %v399_v49 = vrot.slane %v397_v18, 5  ;;  %v572_v20 = vrot.slane %v570_v27, 4  ;;  %v573_v54 = vshll.u32 %v6500_v52, 16 }
  0x49   : > { %5716 = vmatprep.mubr.msk.bf16.mxu0 %vm691_vm3, %v5018_v37  ;;  %v385_v55 = vrot.slane %v384_v42, 4  ;;  %v394_v62 = vor.u32 %v393_v45, %v389_v3  ;;  %v579_v32 = vshll.u32 %v6504_v13, 16  ;;  %v583_v44 = vshrl.u32 %v6504_v13, 16  ;;  %v6535_v42 = vld [vmem:[%s6272_s11 + $0xa8] sm:$0xf] }
  0x4a   : > { %v568_v28 = vsel %vm6316_vm4, %v563_v4, %v567_v57  ;;  %v575_v59 = vrot.slane %v573_v54, 5  ;;  %v589_v0 = vshll.u32 %v6510_v26, 16  ;;  %v402_v50 = vshrl.u32 %v6514_v34, 16  ;;  %8948 = vst [vmem:[#allocation13_spill] sm:$0xff] %v6535_v42 }
  0x4b   : > { %v5026_v22 = vcombine.low %v558_v39, %v568_v28  ;;  %v390_v18 = vsel %vm6316_vm4, %v385_v55, %v389_v3  ;;  %v395_v27 = vrot.slane %v394_v62, 4  ;;  %v581_v37 = vrot.slane %v579_v32, 5 }
  0x4c   : > { %v576_v45 = vor.u32 %v575_v59, %v572_v20  ;;  %v585_v61 = vrot.slane %v583_v44, 4  ;;  %v591_v57 = vrot.slane %v589_v0, 5  ;;  %v404_v4 = vrot.slane %v402_v50, 4  ;;  %v6545_v44 = vld [vmem:[%s6272_s11 + $0xac] sm:$0xf] }
  0x4d   : > { %5732 = vmatprep.mubr.msk.bf16.mxu1 %vm691_vm3, %v5026_v22  ;;  %v400_v54 = vsel %vm6316_vm4, %v395_v27, %v399_v49  ;;  %v405_v39 = vshll.u32 %v6514_v34, 16  ;;  %v411_v28 = vshll.u32 %v6523_v17, 16  ;;  %v415_v62 = vshrl.u32 %v6523_v17, 16  ;;  %8949 = vst [vmem:[#allocation14_spill] sm:$0xff] %v6545_v44  ;;  %v6548_v22 = vld [vmem:[%s6272_s11 + $0xb0] sm:$0x1] }
  0x4e   : > { %v5019_v3 = vcombine.low %v390_v18, %v400_v54  ;;  %v577_v32 = vrot.slane %v576_v45, 4  ;;  %v586_v55 = vor.u32 %v585_v61, %v581_v37  ;;  %v421_v20 = vshll.u32 %v6529_v2, 16  ;;  %8950 = vst [vmem:[#allocation15_spill] sm:$0xff] %v6548_v22 }
  0x4f   : > { %v407_v59 = vrot.slane %v405_v39, 5  ;;  %v413_v0 = vrot.slane %v411_v28, 5  ;;  %v417_v50 = vrot.slane %v415_v62, 4  ;;  %v594_v49 = vshrl.u32 %v6535_v42, 16  ;;  %v6557_v62 = vld [vmem:[%s6272_s11 + $0x54] sm:$0xf] }
  0x50   : > { %5717 = vmatmul.mubr.msk.bf16.gmra.mxu0 %vm691_vm3, %v5019_v3  ;;  %v582_v18 = vsel %vm6316_vm4, %v577_v32, %v581_v37  ;;  %v587_v27 = vrot.slane %v586_v55, 4  ;;  %v423_v61 = vrot.slane %v421_v20, 5  ;;  %v597_v45 = vshll.u32 %v6535_v42, 16  ;;  %v6564_v55 = vld [vmem:[%s6272_s11 + $0x58] sm:$0xf] }
  0x51   : > { %v408_v54 = vor.u32 %v407_v59, %v404_v4  ;;  %v418_v56 = vor.u32 %v417_v50, %v413_v0  ;;  %v596_v39 = vrot.slane %v594_v49, 4  ;;  %v603_v28 = vshll.u32 %v6545_v44, 16  ;;  %v6567_v49 = vld [vmem:[%s6272_s11 + $0x5c] sm:$0x1] }
  0x52   : > { %v592_v3 = vsel %vm6316_vm4, %v587_v27, %v591_v57  ;;  %v599_v26 = vrot.slane %v597_v45, 5  ;;  %v607_v37 = vshrl.u32 %v6545_v44, 16  ;;  %v613_v32 = vshll.u32 %v6548_v22, 16  ;;  %v1197_v22 = vld [vmem:[%s6272_s11] sm:$0xe] }
  0x53   : > { %v5027_v4 = vcombine.low %v582_v18, %v592_v3  ;;  %v409_v20 = vrot.slane %v408_v54, 4  ;;  %v419_v59 = vrot.slane %v418_v56, 4  ;;  %v605_v50 = vrot.slane %v603_v28, 5  ;;  %v6578_v54 = vld [vmem:[%s6272_s11 + $0xb4] sm:$0xf] }
  0x54   : > { %v600_v42 = vor.u32 %v599_v26, %v596_v39  ;;  %v609_v52 = vrot.slane %v607_v37, 4  ;;  %v615_v13 = vrot.slane %v613_v32, 5  ;;  %v426_v57 = vshrl.u32 %v6557_v62, 16  ;;  %8951 = vst [vmem:[#allocation16_spill] sm:$0xff] %v6578_v54  ;;  %v6581_v37 = vld [vmem:[%s6272_s11 + $0xb8] sm:$0xf] }
  0x55   : > { %5733 = vmatmul.mubr.msk.bf16.gmra.mxu1 %vm691_vm3, %v5027_v4  ;;  %v414_v27 = vsel %vm6316_vm4, %v409_v20, %v413_v0  ;;  %v424_v18 = vsel %vm6316_vm4, %v419_v59, %v423_v61  ;;  %v429_v56 = vshll.u32 %v6557_v62, 16  ;;  %v435_v45 = vshll.u32 %v6564_v55, 16  ;;  %v6586_v61 = vld [vmem:[%s6272_s11 + $0xbc] sm:$0x1] }
  0x56   : > { %v5020_v26 = vcombine.low %v414_v27, %v424_v18  ;;  %v601_v39 = vrot.slane %v600_v42, 4  ;;  %v610_v28 = vor.u32 %v609_v52, %v605_v50  ;;  %v428_v3 = vrot.slane %v426_v57, 4 }
  0x57   : > { %v431_v32 = vrot.slane %v429_v56, 5  ;;  %v437_v4 = vrot.slane %v435_v45, 5  ;;  %v439_v0 = vshrl.u32 %v6564_v55, 16  ;;  %v445_v20 = vshll.u32 %v6567_v49, 16 }
  0x58   : > { %5720 = vmatprep.mubr.msk.bf16.mxu0 %vm691_vm3, %v5020_v26  ;;  %v606_v59 = vsel %vm6316_vm4, %v601_v39, %v605_v50  ;;  %v611_v27 = vrot.slane %v610_v28, 4  ;;  %v618_v52 = vshrl.u32 %v6578_v54, 16  ;;  %v621_v42 = vshll.u32 %v6578_v54, 16 }
  0x59   : > { %v432_v57 = vor.u32 %v431_v32, %v428_v3  ;;  %v441_v18 = vrot.slane %v439_v0, 4  ;;  %v447_v56 = vrot.slane %v445_v20, 5  ;;  %v627_v45 = vshll.u32 %v6581_v37, 16 }
  0x5a   : > { %v616_v44 = vsel %vm6316_vm4, %v611_v27, %v615_v13  ;;  %v620_v16 = vrot.slane %v618_v52, 4  ;;  %v623_v26 = vrot.slane %v621_v42, 5  ;;  %v631_v38 = vshrl.u32 %v6581_v37, 16 }
  0x5b   : > { %v5028_v50 = vcombine.low %v606_v59, %v616_v44  ;;  %v433_v39 = vrot.slane %v432_v57, 4  ;;  %v442_v28 = vor.u32 %v441_v18, %v437_v4  ;;  %v629_v47 = vrot.slane %v627_v45, 5  ;;  %v1199_v57 = vld [vmem:[%s6272_s11 + $0x18] sm:$0xe] }
  0x5c   : > { %v624_v54 = vor.u32 %v623_v26, %v620_v16  ;;  %v633_v3 = vrot.slane %v631_v38, 4  ;;  %v637_v32 = vshll.u32 %v6586_v61, 16  ;;  %v5078_v13 = vrot.slane %v1197_v22, 9 }
  0x5d   : > { %5736 = vmatprep.mubr.msk.bf16.mxu1 %vm691_vm3, %v5028_v50  ;;  %v438_v44 = vsel %vm6316_vm4, %v433_v39, %v437_v4  ;;  %v443_v20 = vrot.slane %v442_v28, 4  ;;  %v1250_v59 = vrot.slane %v6281_v6, 5  ;;  %v5047_v38 = vcombine.low %v6309_v29, %v6312_v30 }
  0x5e   : > { %v625_v16 = vrot.slane %v624_v54, 4  ;;  %v634_v27 = vor.u32 %v633_v3, %v629_v47  ;;  %v639_v52 = vrot.slane %v637_v32, 5  ;;  %v5079_v42 = vrot.slane %v1198_v51, 9 }
  0x5f   : > { %v448_v18 = vsel %vm6316_vm4, %v443_v20, %v447_v56  ;;  %v1251_v22 = vsel %vm6602_vm7, %v5078_v13, %v1250_v59  ;;  %v1252_v45 = vrot.slane %v1250_v59, 4  ;;  %v8954_v4 = vrot.slane %v6312_v30, 5 }
  0x60   : > { %v5021_v50 = vcombine.low %v438_v44, %v448_v18  ;;  %v630_v54 = vsel %vm6316_vm4, %v625_v16, %v629_v47  ;;  %v635_v39 = vrot.slane %v634_v27, 4  ;;  %v5046_v51 = vcombine.low %v6278_v5, %v6281_v6  ;;  %v1200_v27 = vld [vmem:[%s6272_s11 + $0x24] sm:$0xe] }
  0x61   : > { %v1259_v26 = vrot.slane %v8954_v4, 4  ;;  %v8955_v28 = vrot.slane %v6284_v7, 5  ;;  %v8956_v3 = vmov %v8954_v4  ;;  %v5048_v13 = vcombine.low %v6351_v8, %v6358_v21  ;;  %v1202_v4 = vld [vmem:[%s6272_s11 + $0x3c] sm:$0xe] }
  0x62   : > { %v1258_v32 = vsel %vm6602_vm7, %v5079_v42, %v8956_v3  ;;  %v5080_v44 = vrot.slane %v1199_v57, 9  ;;  %5721 = vmatmul.mubr.msk.bf16.gmra.mxu0 %vm691_vm3, %v5021_v50  ;;  %v640_v47 = vsel %vm6316_vm4, %v635_v39, %v639_v52  ;;  %v8957_v6 = vrot.slane %v6322_v41, 5  ;;  %v1201_v42 = vld [vmem:[%s6272_s11 + $0x30] sm:$0xe]  ;;  %v1203_v39 = vld [vmem:[%s6272_s11 + $0x48] sm:$0xe] }
  0x63   : > { %v1254_v56 = vsel %vm6602_vm7, %v1252_v45, %v8955_v28  ;;  %v1264_v20 = vrot.slane %v6358_v21, 5  ;;  %v5029_v59 = vcombine.low %v630_v54, %v640_v47  ;;  %v1267_v16 = vrot.slane %v6364_v25, 5  ;;  %v1204_v47 = vld [vmem:[%s6272_s11 + $0x54] sm:$0xe]  ;;  %v6897_v21 = vld [vmem:[%s6272_s11 + $0x2c] sm:$0x1] }
  0x64   : > { %v5095_v5 = vcombine.low %v1251_v22, %v1254_v56  ;;  %v1261_v7 = vsel %vm6602_vm7, %v1259_v26, %v8957_v6  ;;  %v1818_v52 = vsel %vm740_vm0, %v6409_v19, 0  ;;  %v1271_v18 = vrot.slane %v6403_v10, 5 }
  0x65   : > { %v1265_v41 = vsel %vm6602_vm7, %v5080_v44, %v1264_v20  ;;  %v1266_v57 = vrot.slane %v1264_v20, 4  ;;  %5737 = vmatmul.mubr.msk.bf16.gmra.mxu1 %vm691_vm3, %v5029_v59  ;;  %v5096_v22 = vcombine.low %v1258_v32, %v1261_v7  ;;  %v2544_v25 = vsel %vm740_vm0, %v6377_v40, 0 }
  0x66   : > { %5776 = vmatprep.mubr.msk.bf16.mxu0 %vm691_vm3, %v5095_v5  ;;  %v1278_v45 = vrot.slane %v6449_v9, 5  ;;  %5742 = vmatprep.mubr.msk.bf16.mxu1 %vm691_vm3, %v5046_v51  ;;  %v5081_v26 = vrot.slane %v1200_v27, 9  ;;  %v1274_v50 = vrot.slane %v6414_v24, 5  ;;  %v5082_v54 = vrot.slane %v1201_v42, 9  ;;  %v6669_v24 = vld [vmem:[%s8899_s1 + $0xc] sm:$0x3] }
  0x67   : > { %v1268_v19 = vsel %vm6602_vm7, %v1266_v57, %v1267_v16  ;;  %v1273_v56 = vrot.slane %v1271_v18, 4  ;;  %v1281_v32 = vrot.slane %v6457_v33, 5  ;;  %v5083_v44 = vrot.slane %v1202_v4, 9 }
  0x68   : > { %v5097_v28 = vcombine.low %v1265_v41, %v1268_v19  ;;  %v1280_v3 = vrot.slane %v1278_v45, 4  ;;  %v1285_v40 = vrot.slane %v6486_v23, 5  ;;  %v1309_v5 = vrot.slane %v6298_v15, 5 }
  0x69   : > { %v1288_v51 = vrot.slane %v6495_v48, 5  ;;  %v5084_v6 = vrot.slane %v1203_v39, 9  ;;  %v1292_v7 = vrot.slane %v6523_v17, 5  ;;  %v5049_v33 = vcombine.low %v6395_v1, %v6403_v10  ;;  %v1205_v1 = vld [vmem:[%s6272_s11 + $0x60] sm:$0xe] }
  0x6a   : > { %5777 = vmatmul.mubr.msk.bf16.vlgmr.msra.gmra.mxu0 %vm691_vm3, %v5096_v22  ;;  %v1272_v20 = vsel %vm6602_vm7, %v5081_v26, %v1271_v18  ;;  %v1287_v59 = vrot.slane %v1285_v40, 4  ;;  %v1295_v16 = vrot.slane %v6529_v2, 5  ;;  %v1275_v48 = vsel %vm6602_vm7, %v1273_v56, %v1274_v50  ;;  %v6697_v22 = vld [vmem:[%s8899_s1 + $0xa] sm:$0x3]  ;;  %v6722_v50 = vld [vmem:[%s6272_s11 + $0x6c] sm:$0xe] }
  0x6b   : > { %5843 = vmatpush3.bf16.msra.mxu0 %v2544_v25  ;;  %5780 = vmatprep.mubr.msk.bf16.mxu0 %vm691_vm3, %v5097_v28  ;;  %v1279_v27 = vsel %vm6602_vm7, %v5082_v54, %v1278_v45  ;;  %v1282_v42 = vsel %vm6602_vm7, %v1280_v3, %v1281_v32  ;;  %v1294_v41 = vrot.slane %v1292_v7, 4  ;;  %v6687_v10 = vsel %vm6602_vm7, %v5083_v44, %v1285_v40  ;;  %v1208_v39 = vld [vmem:[%s6272_s11 + $0x84] sm:$0xe]  ;;  %v6751_v44 = vld [vmem:[%s6272_s11 + $0x78] sm:$0xe] }
  0x6c   : > { %v6691_v2 = vsel %vm6602_vm7, %v5084_v6, %v1292_v7  ;;  %v5085_v57 = vrot.slane %v1204_v47, 9  ;;  %v1299_v18 = vrot.slane %v6564_v55, 5  ;;  %6021 = vmatprep.subr.msk.bf16.mxu0 %vm740_vm0, %v6669_v24  ;;  %v6707_v25 = vsel %vm6602_vm7, %v1287_v59, %v1288_v51  ;;  %v1209_v40 = vld [vmem:[%s6272_s11 + $0x90] sm:$0xe] }
  0x6d   : > { %5743 = vmatmul.mubr.msk.bf16.vlgmr.msra.gmra.mxu1 %vm691_vm3, %v5047_v38  ;;  %v6711_v45 = vsel %vm6602_vm7, %v1294_v41, %v1295_v16  ;;  %v1302_v4 = vrot.slane %v6567_v49, 5  ;;  %v1306_v19 = vrot.slane %v6295_v14, 5  ;;  %v5098_v29 = vcombine.low %v1272_v20, %v1275_v48  ;;  %v8958_v48 = vld [vmem:[#allocation6_spill] sm:$0xff] }
  0x6e   : > { %5809 = vmatpush3.bf16.msra.mxu1 %v1818_v52  ;;  %5746 = vmatprep.mubr.msk.bf16.mxu1 %vm691_vm3, %v5048_v13  ;;  %v5050_v30 = vcombine.low %v6444_v60, %v6449_v9  ;;  %v1301_v38 = vrot.slane %v1299_v18, 4  ;;  %v5086_v26 = vrot.slane %v1205_v1, 9  ;;  %v5099_v49 = vcombine.low %v1279_v27, %v1282_v42  ;;  %v1210_v42 = vld [vmem:[%s6272_s11 + $0x9c] sm:$0xe] }
  0x6f   : > { %v5051_v52 = vcombine.low %v6481_v11, %v6486_v23  ;;  %v5052_v8 = vcombine.low %v6514_v34, %v6523_v17  ;;  %6020 = vmatprep.subr.msk.bf16.mxu1 %vm740_vm0, %v6697_v22  ;;  %v5100_v60 = vcombine.low %v6687_v10, %v6707_v25  ;;  %v5101_v9 = vcombine.low %v6691_v2, %v6711_v45  ;;  %v8959_v10 = vld [vmem:[#allocation8_spill] sm:$0xff]  ;;  %v8960_v2 = vld [vmem:[#allocation7_spill] sm:$0xff] }
  0x70   : > { %v1308_v54 = vrot.slane %v1306_v19, 4  ;;  %v6741_v28 = vsel %vm6602_vm7, %v5085_v57, %v1299_v18  ;;  %v6745_v56 = vsel %vm6602_vm7, %v1301_v38, %v1302_v4  ;;  %v5087_v32 = vrot.slane %v6722_v50, 9  ;;  %v1211_v18 = vld [vmem:[%s6272_s11 + $0xa8] sm:$0xe]  ;;  %v8962_v38 = vld [vmem:[#allocation11_spill] sm:$0xff] }
  0x71   : > { %v6757_v47 = vsel %vm6602_vm7, %v5086_v26, %v1306_v19  ;;  %v1313_v51 = vrot.slane %v6337_v58, 5  ;;  %v1316_v6 = vrot.slane %v6345_v63, 5  ;;  %v5089_v59 = vrot.slane %v1208_v39, 9  ;;  %v8961_v19 = vld [vmem:[#allocation9_spill] sm:$0xff]  ;;  %v8963_v26 = vld [vmem:[#allocation10_spill] sm:$0xff] }
  0x72   : > { %5781 = vmatmul.mubr.msk.bf16.gmra.mxu0 %vm691_vm3, %v5098_v29  ;;  %v1327_v16 = vrot.slane %v6428_v43, 5  ;;  %v1330_v27 = vrot.slane %v8958_v48, 5  ;;  %v5102_v41 = vcombine.low %v6741_v28, %v6745_v56  ;;  %v6775_v63 = vsel %vm6602_vm7, %v1308_v54, %v1309_v5  ;;  %v8965_v48 = vld [vmem:[#allocation14_spill] sm:$0xff] }
  0x73   : > { %5784 = vmatprep.mubr.msk.bf16.mxu0 %vm691_vm3, %v5099_v49  ;;  %v5088_v1 = vrot.slane %v6751_v44, 9  ;;  %v5090_v4 = vrot.slane %v1209_v40, 9  ;;  %v1334_v15 = vrot.slane %v8959_v10, 5  ;;  %v1315_v5 = vrot.slane %v1313_v51, 4  ;;  %v5192_v57 = vld [vmem:[%s6272_s11 + $0xc] sm:$0xf] }
  0x74   : > { %v6784_v25 = vsel %vm6602_vm7, %v5089_v59, %v1327_v16  ;;  %v1329_v45 = vrot.slane %v1327_v16, 4  ;;  %v1337_v29 = vrot.slane %v8961_v19, 5  ;;  %v5091_v49 = vrot.slane %v1210_v42, 9  ;;  %v8964_v59 = vld [vmem:[#allocation12_spill] sm:$0xff]  ;;  %v8966_v42 = vld [vmem:[#allocation13_spill] sm:$0xff] }
  0x75   : > { %5747 = vmatmul.mubr.msk.bf16.gmra.mxu1 %vm691_vm3, %v5049_v33  ;;  %v1320_v33 = vrot.slane %v6382_v46, 5  ;;  %v6798_v39 = vsel %vm6602_vm7, %v5090_v4, %v1334_v15  ;;  %v1336_v44 = vrot.slane %v1334_v15, 4  ;;  %v1341_v40 = vrot.slane %v8962_v38, 5  ;;  %v8967_v15 = vld [vmem:[#allocation15_spill] sm:$0xff] }
  0x76   : > { %5750 = vmatprep.mubr.msk.bf16.mxu1 %vm691_vm3, %v5050_v30  ;;  %v6794_v54 = vsel %vm6602_vm7, %v1329_v45, %v1330_v27  ;;  %v1344_v16 = vrot.slane %v8964_v59, 5  ;;  %v5092_v45 = vrot.slane %v1211_v18, 9  ;;  %v1348_v4 = vrot.slane %v8965_v48, 5 }
  0x77   : > { %v6808_v27 = vsel %vm6602_vm7, %v1336_v44, %v1337_v29  ;;  %v1351_v50 = vrot.slane %v8967_v15, 5  ;;  %v6818_v19 = vsel %vm6602_vm7, %v5091_v49, %v1341_v40  ;;  %v1343_v7 = vrot.slane %v1341_v40, 4  ;;  %v8968_v29 = vld [vmem:[#allocation16_spill] sm:$0xff]  ;;  %v8969_v15 = vld [vmem:[#allocation5_spill] sm:$0xff]  ;;  %v6833_v49 = vld [vmem:[%s6272_s11 + $0x10] sm:$0xf] }
  0x78   : > { %v6825_v18 = vsel %vm6602_vm7, %v5087_v32, %v1313_v51  ;;  %v6830_v59 = vsel %vm6602_vm7, %v5092_v45, %v1348_v4  ;;  %v1350_v30 = vrot.slane %v1348_v4, 4  ;;  %v5195_v40 = vld [vmem:[%s6272_s11 + $0x18] sm:$0xf]  ;;  %v1322_v20 = vrot.slane %v1320_v33, 4 }
  0x79   : > { %v2062_v44 = vshrl.u32 %v5192_v57, 16  ;;  %v2065_v32 = vshll.u32 %v5192_v57, 16  ;;  %v5103_v51 = vcombine.low %v6757_v47, %v6775_v63  ;;  %v6848_v45 = vsel %vm6602_vm7, %v1315_v5, %v1316_v6  ;;  %v1212_v57 = vld [vmem:[%s6272_s11 + $0xb4] sm:$0xe]  ;;  %v6869_v47 = vld [vmem:[%s6272_s11 + $0x14] sm:$0x1] }
  0x7a   : > { %5785 = vmatmul.mubr.msk.bf16.gmra.mxu0 %vm691_vm3, %v5100_v60  ;;  %v1323_v60 = vrot.slane %v8969_v15, 5  ;;  %v6863_v11 = vsel %vm6602_vm7, %v5088_v1, %v1320_v33  ;;  %v2071_v6 = vshll.u32 %v6833_v49, 16  ;;  %v5196_v63 = vld [vmem:[%s6272_s11 + $0x1c] sm:$0xf]  ;;  %v2075_v17 = vshrl.u32 %v6833_v49, 16 }
  0x7b   : > { %5788 = vmatprep.mubr.msk.bf16.mxu0 %vm691_vm3, %v5101_v9  ;;  %v6838_v9 = vsel %vm6602_vm7, %v1343_v7, %v1344_v16  ;;  %v6854_v7 = vsel %vm6602_vm7, %v1350_v30, %v1351_v50  ;;  %v2064_v5 = vrot.slane %v2062_v44, 4  ;;  %v2067_v34 = vrot.slane %v2065_v32, 5  ;;  %v5198_v15 = vld [vmem:[%s6272_s11 + $0x24] sm:$0xf]  ;;  %v6882_v44 = vld [vmem:[%s6272_s11 + $0x28] sm:$0xf] }
  0x7c   : > { %v2086_v50 = vshrl.u32 %v5195_v40, 16  ;;  %v1324_v1 = vsel %vm6602_vm7, %v1322_v20, %v1323_v60  ;;  %v5093_v33 = vrot.slane %v1212_v57, 9  ;;  %v6877_v30 = vrot.slane %v2071_v6, 5 }
  0x7d   : > { %5751 = vmatmul.mubr.msk.bf16.gmra.mxu1 %vm691_vm3, %v5051_v52  ;;  %v1355_v52 = vrot.slane %v6581_v37, 5  ;;  %v2089_v16 = vshll.u32 %v5195_v40, 16  ;;  %v1358_v23 = vrot.slane %v6586_v61, 5  ;;  %v2077_v4 = vrot.slane %v2075_v17, 4 }
  0x7e   : > { %5754 = vmatprep.mubr.msk.bf16.mxu1 %vm691_vm3, %v5052_v8  ;;  %v5197_v8 = vld [vmem:[%s6272_s11 + $0x20] sm:$0x1]  ;;  %v2088_v3 = vrot.slane %v2086_v50, 4  ;;  %v2095_v13 = vshll.u32 %v5196_v63, 16  ;;  %v2081_v20 = vshll.u32 %v6869_v47, 16  ;;  %v2099_v57 = vshrl.u32 %v5196_v63, 16 }
  0x7f   : > { %v1357_v32 = vrot.slane %v1355_v52, 4  ;;  %v2091_v60 = vrot.slane %v2089_v16, 5  ;;  %v5104_v61 = vcombine.low %v6825_v18, %v6848_v45  ;;  %v5105_v40 = vcombine.low %v6863_v11, %v1324_v1 }
  0x80   : > { %v2068_v6 = vor.u32 %v2067_v34, %v2064_v5  ;;  %v6893_v17 = vrot.slane %v2095_v13, 5  ;;  %v2078_v28 = vor.u32 %v2077_v4, %v6877_v30  ;;  %v2105_v50 = vshll.u32 %v5197_v8, 16  ;;  %v6920_v5 = vld [vmem:[%s6272_s11 + $0x34] sm:$0xf] }
  0x81   : > { %v2092_v56 = vor.u32 %v2091_v60, %v2088_v3  ;;  %v6905_v18 = vsel %vm6602_vm7, %v5093_v33, %v1355_v52  ;;  %v2110_v13 = vshrl.u32 %v5198_v15, 16  ;;  %v2113_v45 = vshll.u32 %v5198_v15, 16  ;;  %v5201_v52 = vld [vmem:[%s6272_s11 + $0x30] sm:$0xf] }
  0x82   : > { %5789 = vmatmul.mubr.msk.bf16.gmra.mxu0 %vm691_vm3, %v5102_v41  ;;  %v2101_v41 = vrot.slane %v2099_v57, 4  ;;  %v2119_v11 = vshll.u32 %v6882_v44, 16  ;;  %v8971_v3 = vcombine.low %v6291_v12, %v6295_v14  ;;  %v6914_v4 = vsel %vm6602_vm7, %v1357_v32, %v1358_v23 }
  0x83   : > { %5792 = vmatprep.mubr.msk.bf16.mxu0 %vm691_vm3, %v5103_v51  ;;  %v8970_v51 = vcombine.low %v6557_v62, %v6564_v55  ;;  %v2083_v62 = vrot.slane %v2081_v20, 5  ;;  %v2123_v63 = vshrl.u32 %v6882_v44, 16  ;;  %v2069_v34 = vrot.slane %v2068_v6, 4 }
  0x84   : > { %v2102_v55 = vor.u32 %v2101_v41, %v6893_v17  ;;  %v2112_v8 = vrot.slane %v2110_v13, 4  ;;  %v2115_v1 = vrot.slane %v2113_v45, 5  ;;  %v6922_v33 = vrot.slane %v2119_v11, 5  ;;  %v6928_v41 = vld [vmem:[%s6272_s11 + $0x38] sm:$0x1] }
  0x85   : > { %5755 = vmatmul.mubr.msk.bf16.gmra.mxu1 %vm691_vm3, %v8970_v51  ;;  %v2079_v12 = vrot.slane %v2078_v28, 4  ;;  %v2093_v14 = vrot.slane %v2092_v56, 4  ;;  %v2107_v16 = vrot.slane %v2105_v50, 5  ;;  %v2125_v23 = vrot.slane %v2123_v63, 4  ;;  %v5204_v13 = vld [vmem:[%s6272_s11 + $0x3c] sm:$0xf] }
  0x86   : > { %5758 = vmatprep.mubr.msk.bf16.mxu1 %vm691_vm3, %v8971_v3  ;;  %v2103_v15 = vrot.slane %v2102_v55, 4  ;;  %v2129_v32 = vshll.u32 %v6897_v21, 16  ;;  %v2134_v20 = vshrl.u32 %v5201_v52, 16  ;;  %v2137_v60 = vshll.u32 %v5201_v52, 16 }
  0x87   : > { %v2116_v57 = vor.u32 %v2115_v1, %v2112_v8  ;;  %v2126_v6 = vor.u32 %v2125_v23, %v6922_v33  ;;  %v2143_v28 = vshll.u32 %v6920_v5, 16  ;;  %v2147_v56 = vshrl.u32 %v6920_v5, 16  ;;  %v5207_v8 = vld [vmem:[%s6272_s11 + $0x48] sm:$0xf]  ;;  %v6955_v1 = vld [vmem:[%s6272_s11 + $0x4c] sm:$0xf] }
  0x88   : > { %v2136_v50 = vrot.slane %v2134_v20, 4  ;;  %v2139_v51 = vrot.slane %v2137_v60, 5  ;;  %v8972_v3 = vcombine.low %v6333_v53, %v6337_v58  ;;  %v5110_v55 = vcombine.low %v6905_v18, %v6914_v4 }
  0x89   : > { %v6934_v45 = vrot.slane %v2143_v28, 5  ;;  %v2149_v11 = vrot.slane %v2147_v56, 4  ;;  %v2084_v63 = vsel %vm6316_vm4, %v2079_v12, %v2083_v62  ;;  %v2098_v52 = vsel %vm6316_vm4, %v2093_v14, %v6893_v17 }
  0x8a   : > { %5793 = vmatmul.mubr.msk.bf16.gmra.mxu0 %vm691_vm3, %v5104_v61  ;;  %v6937_v61 = vld [vmem:[%s6272_s11 + $0x40] sm:$0xf]  ;;  %v8973_v53 = vcombine.low %v6371_v35, %v6382_v46  ;;  %v2108_v58 = vsel %vm6316_vm4, %v2103_v15, %v2107_v16  ;;  %v2117_v23 = vrot.slane %v2116_v57, 4  ;;  %v2140_v20 = vor.u32 %v2139_v51, %v2136_v50  ;;  %v6989_v50 = vld [vmem:[%s6272_s11 + $0x44] sm:$0x1] }
  0x8b   : > { %5796 = vmatprep.mubr.msk.bf16.mxu0 %vm691_vm3, %v5105_v40  ;;  %v2074_v40 = vsel %vm6316_vm4, %v2069_v34, %v6877_v30  ;;  %v2127_v30 = vrot.slane %v2126_v6, 4  ;;  %v2131_v34 = vrot.slane %v2129_v32, 5  ;;  %v2153_v62 = vshll.u32 %v6928_v41, 16  ;;  %v5210_v51 = vld [vmem:[%s6272_s11 + $0x54] sm:$0xf] }
  0x8c   : > { %v2158_v12 = vshrl.u32 %v5204_v13, 16  ;;  %v2161_v17 = vshll.u32 %v5204_v13, 16  ;;  %v6966_v14 = vsel %vm740_vm0, %v6697_v22, 0  ;;  %v2150_v35 = vor.u32 %v2149_v11, %v6934_v45 }
  0x8d   : > { %5759 = vmatmul.mubr.msk.bf16.gmra.mxu1 %vm691_vm3, %v8972_v3  ;;  %v2167_v46 = vshll.u32 %v6937_v61, 16  ;;  %v2171_v16 = vshrl.u32 %v6937_v61, 16  ;;  %v6971_v15 = vcombine.low %v2074_v40, %v2084_v63  ;;  %v6975_v32 = vsel %vm740_vm0, %v6669_v24, 0  ;;  %v6998_v40 = vld [vmem:[%s6272_s11 + $0x58] sm:$0xf] }
  0x8e   : > { %5762 = vmatprep.mubr.msk.bf16.mxu1 %vm691_vm3, %v8973_v53  ;;  %v2182_v60 = vshrl.u32 %v5207_v8, 16  ;;  %v2185_v57 = vshll.u32 %v5207_v8, 16  ;;  %v8974_v6 = vcombine.low %v6784_v25, %v6794_v54  ;;  %v6981_v22 = vcombine.low %v2098_v52, %v2108_v58  ;;  %v7003_v8 = vld [vmem:[%s6272_s11 + $0x50] sm:$0x1] }
  0x8f   : > { %v2122_v28 = vsel %vm6316_vm4, %v2117_v23, %v6922_v33  ;;  %v2132_v56 = vsel %vm6316_vm4, %v2127_v30, %v2131_v34  ;;  %v2191_v24 = vshll.u32 %v6955_v1, 16  ;;  %v8975_v25 = vcombine.low %v6798_v39, %v6808_v27  ;;  %v5213_v34 = vld [vmem:[%s6272_s11 + $0x60] sm:$0xf] }
  0x90   : > { %v2141_v54 = vrot.slane %v2140_v20, 4  ;;  %v2155_v13 = vrot.slane %v2153_v62, 5  ;;  %v2160_v11 = vrot.slane %v2158_v12, 4  ;;  %v2163_v3 = vrot.slane %v2161_v17, 5 }
  0x91   : > { %v2151_v33 = vrot.slane %v2150_v35, 4  ;;  %v7000_v63 = vrot.slane %v2167_v46, 5  ;;  %v2173_v52 = vrot.slane %v2171_v16, 4  ;;  %v2195_v53 = vshrl.u32 %v6955_v1, 16  ;;  %v7020_v35 = vld [vmem:[%s6272_s11 + $0x5c] sm:$0x1] }
  0x92   : > { %5797 = vmatmul.mubr.msk.bf16.gmra.mxu0 %vm691_vm3, %v8974_v6  ;;  %v8976_v39 = vcombine.low %v6421_v36, %v6428_v43  ;;  %v2184_v27 = vrot.slane %v2182_v60, 4  ;;  %v2187_v58 = vrot.slane %v2185_v57, 5  ;;  %v2206_v23 = vshrl.u32 %v5210_v51, 16 }
  0x93   : > { %5800 = vmatprep.mubr.msk.bf16.mxu0 %vm691_vm3, %v8975_v25  ;;  %v2209_v30 = vshll.u32 %v5210_v51, 16  ;;  %v8977_v20 = vcombine.low %v8960_v2, %v8959_v10  ;;  %v7015_v62 = vcombine.low %v2122_v28, %v2132_v56  ;;  %v7017_v12 = vrot.slane %v2191_v24, 5  ;;  %v7033_v28 = vld [vmem:[%s6272_s11 + $0x64] sm:$0xf] }
  0x94   : > { %v2197_v17 = vrot.slane %v2195_v53, 4  ;;  %v2215_v36 = vshll.u32 %v6998_v40, 16  ;;  %v2177_v43 = vshll.u32 %v6989_v50, 16  ;;  %v2208_v46 = vrot.slane %v2206_v23, 4 }
  0x95   : > { %5763 = vmatmul.mubr.msk.bf16.gmra.mxu1 %vm691_vm3, %v8976_v39  ;;  %v2211_v16 = vrot.slane %v2209_v30, 5  ;;  %v2219_v60 = vshrl.u32 %v6998_v40, 16  ;;  %v2146_v10 = vsel %vm6316_vm4, %v2141_v54, %v6934_v45  ;;  %v2156_v2 = vsel %vm6316_vm4, %v2151_v33, %v2155_v13  ;;  %v7055_v30 = vld [vmem:[%s6272_s11 + $0x68] sm:$0x1] }
  0x96   : > { %5766 = vmatprep.mubr.msk.bf16.mxu1 %vm691_vm3, %v8977_v20  ;;  %v2164_v57 = vor.u32 %v2163_v3, %v2160_v11  ;;  %v7030_v6 = vrot.slane %v2215_v36, 5  ;;  %v2174_v56 = vor.u32 %v2173_v52, %v7000_v63  ;;  %v2188_v24 = vor.u32 %v2187_v58, %v2184_v27  ;;  %v5216_v3 = vld [vmem:[%s6272_s11 + $0x6c] sm:$0xf]  ;;  %v7052_v27 = vld [vmem:[%s6272_s11 + $0x70] sm:$0xf] }
  0x97   : > { %v2201_v51 = vshll.u32 %v7003_v8, 16  ;;  %v2221_v25 = vrot.slane %v2219_v60, 4  ;;  %v8978_v53 = vcombine.low %v6818_v19, %v6838_v9  ;;  %v2198_v45 = vor.u32 %v2197_v17, %v7017_v12 }
  0x98   : > { %v2212_v54 = vor.u32 %v2211_v16, %v2208_v46  ;;  %v2230_v13 = vshrl.u32 %v5213_v34, 16  ;;  %v2233_v11 = vshll.u32 %v5213_v34, 16  ;;  %v8979_v33 = vcombine.low %v6830_v59, %v6854_v7  ;;  %v5219_v16 = vld [vmem:[%s6272_s11 + $0x78] sm:$0xf] }
  0x99   : > { %v2222_v52 = vor.u32 %v2221_v25, %v7030_v6  ;;  %v2225_v39 = vshll.u32 %v7020_v35, 16  ;;  %v2239_v19 = vshll.u32 %v7033_v28, 16  ;;  %v2243_v9 = vshrl.u32 %v7033_v28, 16 }
  0x9a   : > { %5801 = vmatmul.mubr.msk.bf16.gmra.mxu0 %vm691_vm3, %v8978_v53  ;;  %v2165_v58 = vrot.slane %v2164_v57, 4  ;;  %v2179_v23 = vrot.slane %v2177_v43, 5  ;;  %v2232_v34 = vrot.slane %v2230_v13, 4  ;;  %v2235_v20 = vrot.slane %v2233_v11, 5 }
  0x9b   : > { %5804 = vmatprep.mubr.msk.bf16.mxu0 %vm691_vm3, %v8979_v33  ;;  %v8980_v59 = vcombine.low %v8963_v26, %v8962_v38  ;;  %v7061_v7 = vcombine.low %v2146_v10, %v2156_v2  ;;  %v2175_v17 = vrot.slane %v2174_v56, 4  ;;  %v2189_v36 = vrot.slane %v2188_v24, 4  ;;  %v7071_v2 = vld [vmem:[%s6272_s11 + $0x7c] sm:$0xf] }
  0x9c   : > { %v7063_v46 = vrot.slane %v2239_v19, 5  ;;  %v8981_v43 = vcombine.low %v8966_v42, %v8965_v48  ;;  %v2199_v60 = vrot.slane %v2198_v45, 4  ;;  %v2203_v57 = vrot.slane %v2201_v51, 5  ;;  %8982 = vst [vmem:[#allocation6_spill] sm:$0xff] %v7071_v2  ;;  %v5222_v19 = vld [vmem:[%s6272_s11 + $0x84] sm:$0xf] }
  0x9d   : > { %5767 = vmatmul.mubr.msk.bf16.gmra.mxu1 %vm691_vm3, %v8980_v59  ;;  %v2213_v25 = vrot.slane %v2212_v54, 4  ;;  %v2245_v38 = vrot.slane %v2243_v9, 4  ;;  %v2223_v26 = vrot.slane %v2222_v52, 4  ;;  %v2227_v53 = vrot.slane %v2225_v39, 5 }
  0x9e   : > { %5770 = vmatprep.mubr.msk.bf16.mxu1 %vm691_vm3, %v8981_v43  ;;  %v2236_v13 = vor.u32 %v2235_v20, %v2232_v34  ;;  %v2254_v10 = vshrl.u32 %v5216_v3, 16  ;;  %v2170_v56 = vsel %vm6316_vm4, %v2165_v58, %v7000_v63  ;;  %v2257_v24 = vshll.u32 %v5216_v3, 16  ;;  %v6080_v63 = vld [vmem:[%s6272_s11 + $0xc] sm:$0xff]   ;;  %v7105_v34 = vld [vmem:[%s6272_s11 + $0x88] sm:$0xf] }
  0x9f   : > { %v2263_v48 = vshll.u32 %v7052_v27, 16  ;;  %v2267_v42 = vshrl.u32 %v7052_v27, 16  ;;  %v2180_v51 = vsel %vm6316_vm4, %v2175_v17, %v2179_v23  ;;  %v2194_v45 = vsel %vm6316_vm4, %v2189_v36, %v7017_v12  ;;  %8983 = vst [vmem:[#allocation8_spill] sm:$0xff] %v7105_v34  ;;  %v7114_v36 = vld [vmem:[%s6272_s11 + $0x74] sm:$0x1] }
  0xa0   : > { %v2246_v54 = vor.u32 %v2245_v38, %v7063_v46  ;;  %v2249_v11 = vshll.u32 %v7055_v30, 16  ;;  %v2204_v3 = vsel %vm6316_vm4, %v2199_v60, %v2203_v57  ;;  %v2218_v33 = vsel %vm6316_vm4, %v2213_v25, %v7030_v6  ;;  %8985 = vst [vmem:[#allocation7_spill] sm:$0xff] %v7114_v36  ;;  %v7124_v38 = vld [vmem:[%s6272_s11 + $0x80] sm:$0x1] }
  0xa1   : > { %v2278_v52 = vshrl.u32 %v5219_v16, 16  ;;  %v2281_v12 = vshll.u32 %v5219_v16, 16  ;;  %v2228_v18 = vsel %vm6316_vm4, %v2223_v26, %v2227_v53  ;;  %v2237_v4 = vrot.slane %v2236_v13, 4  ;;  %8986 = vst [vmem:[#allocation9_spill] sm:$0xff] %v7124_v38  ;;  %v7127_v26 = vld [vmem:[%s6272_s11 + $0x8c] sm:$0x1] }
  0xa2   : > { %5805 = vmatmul.mubr.msk.bf16.gmra.mxu0 %vm691_vm3, %v5110_v55  ;;  %v2256_v55 = vrot.slane %v2254_v10, 4  ;;  %v2287_v39 = vshll.u32 %v7071_v2, 16  ;;  %v2259_v9 = vrot.slane %v2257_v24, 5  ;;  %v7101_v58 = vrot.slane %v2263_v48, 5  ;;  %8987 = vst [vmem:[#allocation11_spill] sm:$0xff] %v7127_v26  ;;  %v6081_v10 = vld [vmem:[%s6272_s11 + $0x18] sm:$0xff]  }
  0xa3   : > { %5844 = vmatprep.mubr.msk.bf16.mxu0 %vm691_vm3, %v6971_v15  ;;  %v2269_v23 = vrot.slane %v2267_v42, 4  ;;  %v2291_v6 = vshrl.u32 %v7071_v2, 16  ;;  %v8984_v15 = vcombine.low %v8968_v29, %v6581_v37  ;;  %v7111_v20 = vcombine.low %v2170_v56, %v2180_v51  ;;  %v5225_v51 = vld [vmem:[%s6272_s11 + $0x90] sm:$0xf] }
  0xa4   : > { %v2247_v59 = vrot.slane %v2246_v54, 4  ;;  %v2251_v17 = vrot.slane %v2249_v11, 5  ;;  %v2280_v16 = vrot.slane %v2278_v52, 4  ;;  %v2283_v43 = vrot.slane %v2281_v12, 5 }
  0xa5   : > { %5771 = vmatmul.mubr.msk.bf16.gmra.mxu1 %vm691_vm3, %v8984_v15  ;;  %v7117_v60 = vrot.slane %v2287_v39, 5  ;;  %v2293_v57 = vrot.slane %v2291_v6, 4  ;;  %v2302_v25 = vshrl.u32 %v5222_v19, 16  ;;  %v7119_v37 = vcombine.low %v2194_v45, %v2204_v3  ;;  %v7138_v45 = vld [vmem:[%s6272_s11 + $0x94] sm:$0xf] }
  0xa6   : > { %5810 = vmatprep.mubr.msk.bf16.mxu1 %vm691_vm3, %v6080_v63  ;;  %v7121_v29 = vcombine.low %v2218_v33, %v2228_v18  ;;  %v2305_v53 = vshll.u32 %v5222_v19, 16  ;;  %v2311_v13 = vshll.u32 %v7105_v34, 16  ;;  %v2242_v56 = vsel %vm6316_vm4, %v2237_v4, %v7063_v46  ;;  %8988 = vst [vmem:[#allocation10_spill] sm:$0xff] %v7138_v45  ;;  %v7146_v33 = vld [vmem:[%s8899_s1 + $0x10] sm:$0x3]  ;;  %v6082_v46 = vld [vmem:[%s6272_s11 + $0x24] sm:$0xff]  }
  0xa7   : > { %v2260_v24 = vor.u32 %v2259_v9, %v2256_v55  ;;  %v2270_v48 = vor.u32 %v2269_v23, %v7101_v58  ;;  %v2273_v42 = vshll.u32 %v7114_v36, 16  ;;  %v2304_v54 = vrot.slane %v2302_v25, 4  ;;  %8989 = vst [vmem:[#allocation12_spill] sm:$0xff] %v7146_v33 }
  0xa8   : > { %v2307_v11 = vrot.slane %v2305_v53, 5  ;;  %v7140_v63 = vrot.slane %v2311_v13, 5  ;;  %v2315_v3 = vshrl.u32 %v7105_v34, 16  ;;  %v2252_v52 = vsel %vm6316_vm4, %v2247_v59, %v2251_v17 }
  0xa9   : > { %v2284_v12 = vor.u32 %v2283_v43, %v2280_v16  ;;  %v2294_v18 = vor.u32 %v2293_v57, %v7117_v60  ;;  %v2297_v4 = vshll.u32 %v7124_v38, 16  ;;  %v2326_v19 = vshrl.u32 %v5225_v51, 16  ;;  %v7180_v57 = vld [vmem:[%s6272_s11 + $0xa0] sm:$0xf] }
  0xaa   : > { %5845 = vmatmul.mubr.msk.bf16.vlgmr.msra.gmra.mxu0 %vm691_vm3, %v6981_v22  ;;  %v2308_v55 = vor.u32 %v2307_v11, %v2304_v54  ;;  %v2317_v39 = vrot.slane %v2315_v3, 4  ;;  %v2329_v9 = vshll.u32 %v5225_v51, 16  ;;  %v5228_v22 = vld [vmem:[%s6272_s11 + $0x9c] sm:$0xf]  ;;  %v7159_v23 = vrot.slane %v2260_v24, 4  ;;  %8991 = vst [vmem:[#allocation13_spill] sm:$0xff] %v7180_v57 }
  0xab   : > { %5911 = vmatpush3.bf16.msra.mxu0 %v6975_v32  ;;  %5848 = vmatprep.mubr.msk.bf16.mxu0 %vm691_vm3, %v7015_v62  ;;  %v7161_v6 = vrot.slane %v2273_v42, 5  ;;  %v2321_v15 = vshll.u32 %v7127_v26, 16  ;;  %v2335_v59 = vshll.u32 %v7138_v45, 16  ;;  %v7168_v32 = vld [vmem:[%s8899_s1 + $0xe] sm:$0x3]  ;;  %v7173_v62 = vcombine.low %v2242_v56, %v2252_v52 }
  0xac   : > { %8990 = vst [vmem:[#allocation14_spill] sm:$0xff] %v7168_v32  ;;  %6023 = vmatprep.subr.msk.bf16.mxu0 %vm740_vm0, %v7146_v33  ;;  %v7175_v17 = vrot.slane %v2270_v48, 4  ;;  %v2318_v16 = vor.u32 %v2317_v39, %v7140_v63  ;;  %v2339_v43 = vshrl.u32 %v7138_v45, 16  ;;  %v7184_v25 = vrot.slane %v2284_v12, 4  ;;  %v7193_v56 = vld [vmem:[%s6272_s11 + $0x98] sm:$0x1] }
  0xad   : > { %5811 = vmatmul.mubr.msk.bf16.vlgmr.msra.gmra.mxu1 %vm691_vm3, %v6081_v10  ;;  %v7186_v53 = vrot.slane %v2294_v18, 4  ;;  %v7188_v13 = vrot.slane %v2297_v4, 5  ;;  %v7190_v10 = vrot.slane %v2308_v55, 4  ;;  %8992 = vst [vmem:[#allocation15_spill] sm:$0xff] %v7193_v56  ;;  %v2328_v24 = vrot.slane %v2326_v19, 4  ;;  %v6084_v19 = vld [vmem:[%s6272_s11 + $0x3c] sm:$0xff]  }
  0xae   : > { %5877 = vmatpush3.bf16.msra.mxu1 %v6966_v14  ;;  %5814 = vmatprep.mubr.msk.bf16.mxu1 %vm691_vm3, %v6082_v46  ;;  %v2331_v48 = vrot.slane %v2329_v9, 5  ;;  %v2350_v42 = vshrl.u32 %v5228_v22, 16  ;;  %v2353_v51 = vshll.u32 %v5228_v22, 16  ;;  %v6083_v14 = vld [vmem:[%s6272_s11 + $0x30] sm:$0xff]   ;;  %v7202_v11 = vrot.slane %v2321_v15, 5 }
  0xaf   : > { %6022 = vmatprep.subr.msk.bf16.mxu1 %vm740_vm0, %v7168_v32  ;;  %v7204_v3 = vrot.slane %v2335_v59, 5  ;;  %v2359_v46 = vshll.u32 %v7180_v57, 16  ;;  %v5231_v52 = vld [vmem:[%s6272_s11 + $0xa8] sm:$0xf]  ;;  %v7208_v12 = vrot.slane %v2318_v16, 4  ;;  %v2341_v18 = vrot.slane %v2339_v43, 4 }
  0xb0   : > { %v2345_v4 = vshll.u32 %v7193_v56, 16  ;;  %v2363_v55 = vshrl.u32 %v7180_v57, 16  ;;  %v7213_v39 = vld [vmem:[%s6272_s11 + $0xac] sm:$0xf]  ;;  %v2332_v59 = vor.u32 %v2331_v48, %v2328_v24  ;;  %v7237_v16 = vld [vmem:[%s6272_s11 + $0xa4] sm:$0x1] }
  0xb1   : > { %8993 = vst [vmem:[#allocation16_spill] sm:$0xff] %v7213_v39  ;;  %8994 = vst [vmem:[#allocation5_spill] sm:$0xff] %v7237_v16  ;;  %v2352_v43 = vrot.slane %v2350_v42, 4  ;;  %v2355_v22 = vrot.slane %v2353_v51, 5  ;;  %v2374_v54 = vshrl.u32 %v5231_v52, 16  ;;  %v7239_v9 = vrot.slane %v2359_v46, 5 }
  0xb2   : > { %5849 = vmatmul.mubr.msk.bf16.gmra.mxu0 %vm691_vm3, %v7061_v7  ;;  %v2365_v32 = vrot.slane %v2363_v55, 4  ;;  %v2377_v15 = vshll.u32 %v5231_v52, 16  ;;  %v2383_v33 = vshll.u32 %v7213_v39, 16  ;;  %v5234_v57 = vld [vmem:[%s6272_s11 + $0xb4] sm:$0xf]  ;;  %v2342_v24 = vor.u32 %v2341_v18, %v7204_v3 }
  0xb3   : > { %5852 = vmatprep.mubr.msk.bf16.mxu0 %vm691_vm3, %v7111_v20  ;;  %v2324_v20 = vsel %vm6316_vm4, %v7208_v12, %v7202_v11  ;;  %v7249_v48 = vrot.slane %v2345_v4, 5  ;;  %v7252_v42 = vld [vmem:[%s6272_s11 + $0xb0] sm:$0x1]  ;;  %v2376_v51 = vrot.slane %v2374_v54, 4  ;;  %v7255_v46 = vld [vmem:[%s6272_s11 + $0xb8] sm:$0xf]  ;;  %v2356_v18 = vor.u32 %v2355_v22, %v2352_v43 }
  0xb4   : > { %8995 = vst [vmem:[#allocation17_spill] sm:$0xff] %v7252_v42  ;;  %8996 = vst [vmem:[#allocation18_spill] sm:$0xff] %v7255_v46  ;;  %v2379_v52 = vrot.slane %v2377_v15, 5  ;;  %v7259_v55 = vrot.slane %v2383_v33, 5  ;;  %v2387_v11 = vshrl.u32 %v7213_v39, 16  ;;  %v7262_v12 = vrot.slane %v2332_v59, 4 }
  0xb5   : > { %5815 = vmatmul.mubr.msk.bf16.gmra.mxu1 %vm691_vm3, %v6083_v14  ;;  %v2369_v14 = vshll.u32 %v7237_v16, 16  ;;  %v7265_v4 = vld [vmem:[%s6272_s11 + $0xbc] sm:$0x1]  ;;  %v2398_v54 = vshrl.u32 %v5234_v57, 16  ;;  %v2401_v7 = vshll.u32 %v5234_v57, 16  ;;  %v2366_v56 = vor.u32 %v2365_v32, %v7239_v9  ;;  %v6085_v16 = vld [vmem:[%s6272_s11 + $0x48] sm:$0xff]  }
  0xb6   : > { %5818 = vmatprep.mubr.msk.bf16.mxu1 %vm691_vm3, %v6084_v19  ;;  %v2389_v45 = vrot.slane %v2387_v11, 4  ;;  %v2393_v19 = vshll.u32 %v7252_v42, 16  ;;  %v2407_v15 = vshll.u32 %v7255_v46, 16  ;;  %v5237_v33 = vld [vmem:[%s6272_s11 + $0xc0] sm:$0xf]  ;;  %v2380_v26 = vor.u32 %v2379_v52, %v2376_v51  ;;  %v6086_v57 = vld [vmem:[%s6272_s11 + $0x54] sm:$0xff]  }
  0xb7   : > { %v2400_v39 = vrot.slane %v2398_v54, 4  ;;  %v2403_v34 = vrot.slane %v2401_v7, 5  ;;  %v2411_v59 = vshrl.u32 %v7255_v46, 16  ;;  %v7274_v22 = vld [vmem:[%s6272_s11 + $0xc4] sm:$0xf]  ;;  %v2343_v43 = vrot.slane %v2342_v24, 4 }
  0xb8   : > { %v2371_v32 = vrot.slane %v2369_v14, 5  ;;  %v2390_v11 = vor.u32 %v2389_v45, %v7259_v55  ;;  %v2409_v42 = vrot.slane %v2407_v15, 5  ;;  %v2417_v7 = vshll.u32 %v7265_v4, 16  ;;  %v7286_v45 = vld [vmem:[%s6272_s11 + $0xc8] sm:$0x1] }
  0xb9   : > { %v2404_v51 = vor.u32 %v2403_v34, %v2400_v39  ;;  %v2413_v52 = vrot.slane %v2411_v59, 4  ;;  %v2422_v54 = vshrl.u32 %v5237_v33, 16  ;;  %v2357_v46 = vrot.slane %v2356_v18, 4 }
  0xba   : > { %5853 = vmatmul.mubr.msk.bf16.gmra.mxu0 %vm691_vm3, %v7119_v37  ;;  %v2367_v38 = vrot.slane %v2366_v56, 4  ;;  %v2425_v2 = vshll.u32 %v5237_v33, 16  ;;  %v2431_v37 = vshll.u32 %v7274_v22, 16  ;;  %v2381_v24 = vrot.slane %v2380_v26, 4 }
  0xbb   : > { %5856 = vmatprep.mubr.msk.bf16.mxu0 %vm691_vm3, %v7121_v29  ;;  %v2395_v14 = vrot.slane %v2393_v19, 5  ;;  %v2414_v36 = vor.u32 %v2413_v52, %v2409_v42  ;;  %v2424_v15 = vrot.slane %v2422_v54, 4  ;;  %v2391_v34 = vrot.slane %v2390_v11, 4 }
  0xbc   : > { %v2427_v29 = vrot.slane %v2425_v2, 5  ;;  %v7289_v39 = vrot.slane %v2431_v37, 5  ;;  %v2435_v56 = vshrl.u32 %v7274_v22, 16  ;;  %v8997_v26 = vsel %vm6316_vm4, %v7175_v17, %v7161_v6 }
  0xbd   : > { %5819 = vmatmul.mubr.msk.bf16.gmra.mxu1 %vm691_vm3, %v6085_v16  ;;  %v8998_v16 = vsel %vm6316_vm4, %v7159_v23, %v7101_v58  ;;  %v2405_v19 = vrot.slane %v2404_v51, 4  ;;  %v2415_v33 = vrot.slane %v2414_v36, 4  ;;  %v2419_v2 = vrot.slane %v2417_v7, 5  ;;  %v6087_v23 = vld [vmem:[%s6272_s11 + $0x60] sm:$0xff]  }
  0xbe   : > { %5822 = vmatprep.mubr.msk.bf16.mxu1 %vm691_vm3, %v6086_v57  ;;  %v5249_v18 = vcombine.low %v8998_v16, %v8997_v26  ;;  %v8999_v59 = vsel %vm6316_vm4, %v7186_v53, %v7188_v13  ;;  %v9000_v6 = vsel %vm6316_vm4, %v7184_v25, %v7117_v60  ;;  %v2428_v57 = vor.u32 %v2427_v29, %v2424_v15  ;;  %v5275_v13 = vld [vmem:[%s6272_s11 + $0x24] sm:$0xe]  ;;  %v5278_v26 = vld [vmem:[%s6272_s11 + $0x48] sm:$0xe] }
  0xbf   : > { %v5250_v17 = vcombine.low %v9000_v6, %v8999_v59  ;;  %v2437_v11 = vrot.slane %v2435_v56, 4  ;;  %v2441_v58 = vshll.u32 %v7286_v45, 16  ;;  %v9001_v36 = vsel %vm6316_vm4, %v7190_v10, %v7140_v63  ;;  %v6088_v63 = vld [vmem:[%s6272_s11 + $0x6c] sm:$0xff]   ;;  %v5279_v6 = vld [vmem:[%s6272_s11 + $0x54] sm:$0xe] }
  0xc0   : > { %v5251_v51 = vcombine.low %v9001_v36, %v2324_v20  ;;  %v2338_v53 = vsel %vm6316_vm4, %v7262_v12, %v7204_v3  ;;  %v2348_v60 = vsel %vm6316_vm4, %v2343_v43, %v7249_v48  ;;  %v2362_v25 = vsel %vm6316_vm4, %v2357_v46, %v7239_v9  ;;  %v7342_v12 = vld [vmem:[%s6272_s11 + $0xc] sm:$0xe] }
  0xc1   : > { %v2372_v10 = vsel %vm6316_vm4, %v2367_v38, %v2371_v32  ;;  %v2386_v3 = vsel %vm6316_vm4, %v2381_v24, %v7259_v55  ;;  %v2396_v20 = vsel %vm6316_vm4, %v2391_v34, %v2395_v14  ;;  %v2438_v48 = vor.u32 %v2437_v11, %v7289_v39  ;;  %v5276_v55 = vld [vmem:[%s6272_s11 + $0x30] sm:$0xe]  ;;  %v5277_v14 = vld [vmem:[%s6272_s11 + $0x3c] sm:$0xe] }
  0xc2   : > { %5857 = vmatmul.mubr.msk.bf16.gmra.mxu0 %vm691_vm3, %v7173_v62  ;;  %v2410_v62 = vsel %vm6316_vm4, %v2405_v19, %v2409_v42  ;;  %v2420_v38 = vsel %vm6316_vm4, %v2415_v33, %v2419_v2  ;;  %v7349_v9 = vrot.slane %v2428_v57, 4  ;;  %v2805_v46 = vrot.slane %v6833_v49, 5  ;;  %v6089_v57 = vld [vmem:[%s6272_s11 + $0x78] sm:$0xff]  }
  0xc3   : > { %5860 = vmatprep.mubr.msk.bf16.mxu0 %vm691_vm3, %v5249_v18  ;;  %v7353_v43 = vcombine.low %v2338_v53, %v2348_v60  ;;  %v7355_v32 = vrot.slane %v2438_v48, 4  ;;  %v7357_v52 = vrot.slane %v2441_v58, 5  ;;  %v5291_v7 = vrot.slane %v5275_v13, 9  ;;  %v6090_v53 = vld [vmem:[%s6272_s11 + $0x84] sm:$0xff]   ;;  %v5280_v13 = vld [vmem:[%s6272_s11 + $0x60] sm:$0xe] }
  0xc4   : > { %v7360_v54 = vcombine.low %v2362_v25, %v2372_v10  ;;  %v7362_v42 = vcombine.low %v2386_v3, %v2396_v20  ;;  %v5289_v37 = vrot.slane %v7342_v12, 9  ;;  %v2819_v24 = vrot.slane %v6882_v44, 5  ;;  %v6096_v49 = vld [vmem:[%s6272_s11 + $0x18] sm:$0xff]  }
  0xc5   : > { %5823 = vmatmul.mubr.msk.bf16.gmra.mxu1 %vm691_vm3, %v6087_v23  ;;  %v7368_v15 = vcombine.low %v2410_v62, %v2420_v38  ;;  %v2808_v34 = vrot.slane %v6869_v47, 5  ;;  %v2822_v29 = vrot.slane %v6897_v21, 5  ;;  %v5292_v56 = vrot.slane %v5276_v55, 9  ;;  %v5282_v55 = vld [vmem:[%s6272_s11 + $0x78] sm:$0xe] }
  0xc6   : > { %5826 = vmatprep.mubr.msk.bf16.mxu1 %vm691_vm3, %v6088_v63  ;;  %v2434_v16 = vsel %vm6316_vm4, %v7349_v9, %v7289_v39  ;;  %v7379_v44 = vrot.slane %v2805_v46, 4  ;;  %v7383_v18 = vsel %vm6602_vm7, %v5291_v7, %v2819_v24  ;;  %v2821_v19 = vrot.slane %v2819_v24, 4 }
  0xc7   : > { %v2444_v21 = vsel %vm6316_vm4, %v7355_v32, %v7357_v52  ;;  %v2826_v33 = vrot.slane %v6920_v5, 5  ;;  %v2829_v2 = vrot.slane %v6928_v41, 5  ;;  %v5293_v59 = vrot.slane %v5277_v14, 9  ;;  %v6095_v52 = vld [vmem:[%s6272_s11 + $0xc0] sm:$0xff]  }
  0xc8   : > { %v7395_v11 = vsel %vm6602_vm7, %v2821_v19, %v2822_v29  ;;  %v2833_v58 = vrot.slane %v6937_v61, 5  ;;  %v2836_v23 = vrot.slane %v6989_v50, 5  ;;  %v5294_v36 = vrot.slane %v5278_v26, 9  ;;  %v5283_v19 = vld [vmem:[%s6272_s11 + $0x84] sm:$0xe] }
  0xc9   : > { %v5308_v5 = vcombine.low %v7383_v18, %v7395_v11  ;;  %v7405_v41 = vsel %vm6602_vm7, %v5292_v56, %v2826_v33  ;;  %v2828_v60 = vrot.slane %v2826_v33, 4  ;;  %v2840_v25 = vrot.slane %v6955_v1, 5 }
  0xca   : > { %5861 = vmatmul.mubr.msk.bf16.gmra.mxu0 %vm691_vm3, %v5250_v17  ;;  %v7412_v61 = vsel %vm6602_vm7, %v5293_v59, %v2833_v58  ;;  %v2835_v50 = vrot.slane %v2833_v58, 4  ;;  %v2843_v17 = vrot.slane %v7003_v8, 5  ;;  %v5295_v63 = vrot.slane %v5279_v6, 9  ;;  %v9002_v59 = vld [vmem:[#allocation7_spill] sm:$0xff] }
  0xcb   : > { %5864 = vmatprep.mubr.msk.bf16.mxu0 %vm691_vm3, %v5251_v51  ;;  %v7417_v10 = vsel %vm6602_vm7, %v2828_v60, %v2829_v2  ;;  %v7421_v3 = vsel %vm6602_vm7, %v5294_v36, %v2840_v25  ;;  %v2842_v1 = vrot.slane %v2840_v25, 4  ;;  %v2847_v20 = vrot.slane %v6998_v40, 5  ;;  %v5281_v51 = vld [vmem:[%s6272_s11 + $0x6c] sm:$0xe]  ;;  %v6091_v58 = vld [vmem:[%s6272_s11 + $0x90] sm:$0xff]  }
  0xcc   : > { %v5309_v48 = vcombine.low %v7405_v41, %v7417_v10  ;;  %v7430_v8 = vsel %vm6602_vm7, %v2835_v50, %v2836_v23  ;;  %v2850_v62 = vrot.slane %v7020_v35, 5  ;;  %v5296_v38 = vrot.slane %v5280_v13, 9  ;;  %v9003_v36 = vld [vmem:[#allocation6_spill] sm:$0xff]  ;;  %v9004_v50 = vld [vmem:[#allocation9_spill] sm:$0xff] }
  0xcd   : > { %5827 = vmatmul.mubr.msk.bf16.gmra.mxu1 %vm691_vm3, %v6089_v57  ;;  %v5310_v40 = vcombine.low %v7412_v61, %v7430_v8  ;;  %v7439_v7 = vsel %vm6602_vm7, %v2842_v1, %v2843_v17  ;;  %v7443_v24 = vsel %vm6602_vm7, %v5295_v63, %v2847_v20  ;;  %v2849_v14 = vrot.slane %v2847_v20, 4  ;;  %v5284_v60 = vld [vmem:[%s6272_s11 + $0x90] sm:$0xe] }
  0xce   : > { %5830 = vmatprep.mubr.msk.bf16.mxu1 %vm691_vm3, %v6090_v53  ;;  %v5311_v35 = vcombine.low %v7421_v3, %v7439_v7  ;;  %v2854_v29 = vrot.slane %v7033_v28, 5  ;;  %v2857_v56 = vrot.slane %v7055_v30, 5  ;;  %v5297_v26 = vrot.slane %v5281_v51, 9  ;;  %v9005_v51 = vld [vmem:[#allocation8_spill] sm:$0xff]  ;;  %v5415_v3 = vld [vmem:[%s6272_s11 + $0x48] sm:$0xf] }
  0xcf   : > { %v7452_v33 = vsel %vm6602_vm7, %v2849_v14, %v2850_v62  ;;  %v2861_v2 = vrot.slane %v7052_v27, 5  ;;  %v2864_v6 = vrot.slane %v9002_v59, 5  ;;  %v5298_v57 = vrot.slane %v5282_v55, 9  ;;  %v6092_v27 = vld [vmem:[%s6272_s11 + $0x9c] sm:$0xff]   ;;  %v9013_v55 = vld [vmem:[#allocation18_spill] sm:$0xff] }
  0xd0   : > { %v5312_v23 = vcombine.low %v7443_v24, %v7452_v33  ;;  %v7461_v28 = vsel %vm6602_vm7, %v5296_v38, %v2854_v29  ;;  %v2856_v30 = vrot.slane %v2854_v29, 4  ;;  %v2868_v53 = vrot.slane %v9003_v36, 5  ;;  %v5285_v38 = vld [vmem:[%s6272_s11 + $0x9c] sm:$0xe]  ;;  %v9008_v36 = vld [vmem:[#allocation15_spill] sm:$0xff] }
  0xd1   : > { %v7470_v25 = vsel %vm6602_vm7, %v5297_v26, %v2861_v2  ;;  %v2863_v13 = vrot.slane %v2861_v2, 4  ;;  %v2871_v17 = vrot.slane %v9004_v50, 5  ;;  %v5299_v63 = vrot.slane %v5283_v19, 9  ;;  %v5286_v26 = vld [vmem:[%s6272_s11 + $0xa8] sm:$0xe] }
  0xd2   : > { %5865 = vmatmul.mubr.msk.bf16.gmra.mxu0 %vm691_vm3, %v7353_v43  ;;  %v7477_v1 = vsel %vm6602_vm7, %v2856_v30, %v2857_v56  ;;  %v7481_v43 = vsel %vm6602_vm7, %v5298_v57, %v2868_v53  ;;  %v2870_v20 = vrot.slane %v2868_v53, 4  ;;  %v2875_v62 = vrot.slane %v9005_v51, 5  ;;  %v5288_v57 = vld [vmem:[%s6272_s11 + $0xc0] sm:$0xe]  ;;  %v6093_v19 = vld [vmem:[%s6272_s11 + $0xa8] sm:$0xff]  }
  0xd3   : > { %5868 = vmatprep.mubr.msk.bf16.mxu0 %vm691_vm3, %v7360_v54  ;;  %v7489_v14 = vsel %vm6602_vm7, %v2863_v13, %v2864_v6  ;;  %v9006_v54 = vld [vmem:[#allocation11_spill] sm:$0xff]  ;;  %v5300_v56 = vrot.slane %v5284_v60, 9  ;;  %v2885_v53 = vrot.slane %v9008_v36, 5  ;;  %v5301_v60 = vrot.slane %v5285_v38, 9  ;;  %v9011_v38 = vld [vmem:[#allocation16_spill] sm:$0xff] }
  0xd4   : > { %v2878_v29 = vrot.slane %v9006_v54, 5  ;;  %v7498_v2 = vsel %vm6602_vm7, %v2870_v20, %v2871_v17  ;;  %v7502_v59 = vsel %vm6602_vm7, %v5299_v63, %v2875_v62  ;;  %v2877_v6 = vrot.slane %v2875_v62, 4  ;;  %v5287_v13 = vld [vmem:[%s6272_s11 + $0xb4] sm:$0xe]  ;;  %v9009_v17 = vld [vmem:[#allocation13_spill] sm:$0xff] }
  0xd5   : > { %5831 = vmatmul.mubr.msk.bf16.gmra.mxu1 %vm691_vm3, %v6091_v58  ;;  %v9007_v58 = vld [vmem:[#allocation10_spill] sm:$0xff]  ;;  %v2889_v63 = vrot.slane %v9009_v17, 5  ;;  %v9010_v20 = vld [vmem:[#allocation5_spill] sm:$0xff]  ;;  %v5302_v62 = vrot.slane %v5286_v26, 9  ;;  %v2896_v36 = vrot.slane %v9011_v38, 5  ;;  %v5303_v26 = vrot.slane %v5287_v13, 9 }
  0xd6   : > { %5834 = vmatprep.mubr.msk.bf16.mxu1 %vm691_vm3, %v6092_v27  ;;  %v2882_v30 = vrot.slane %v9007_v58, 5  ;;  %v7512_v50 = vsel %vm6602_vm7, %v2877_v6, %v2878_v29  ;;  %v2892_v51 = vrot.slane %v9010_v20, 5  ;;  %v9012_v17 = vld [vmem:[#allocation17_spill] sm:$0xff]  ;;  %v6094_v27 = vld [vmem:[%s6272_s11 + $0xb4] sm:$0xff]   ;;  %v2809_v39 = vsel %vm6602_vm7, %v7379_v44, %v2808_v34  ;;  %v6113_v44 = vld [vmem:[%s6272_s11 + $0x20] sm:$0x1] }
  0xd7   : > { %v7527_v29 = vsel %vm6602_vm7, %v5301_v60, %v2889_v63  ;;  %v2891_v6 = vrot.slane %v2889_v63, 4  ;;  %v2899_v20 = vrot.slane %v9012_v17, 5  ;;  %v2898_v38 = vrot.slane %v2896_v36, 4  ;;  %v7729_v7 = vld [vmem:[%s6272_s11 + $0x4c] sm:$0xf] }
  0xd8   : > { %v7520_v54 = vsel %vm6602_vm7, %v5300_v56, %v2882_v30  ;;  %v2884_v58 = vrot.slane %v2882_v30, 4  ;;  %v7539_v30 = vsel %vm6602_vm7, %v5302_v62, %v2896_v36  ;;  %v2903_v60 = vrot.slane %v9013_v55, 5 }
  0xd9   : > { %v5304_v63 = vrot.slane %v5288_v57, 9  ;;  %v7555_v55 = vsel %vm6602_vm7, %v2898_v38, %v2899_v20  ;;  %v2910_v57 = vrot.slane %v7274_v22, 5  ;;  %v2806_v22 = vsel %vm6602_vm7, %v5289_v37, %v2805_v46  ;;  %v6098_v38 = vld [vmem:[%s6272_s11 + $0x30] sm:$0xff]  }
  0xda   : > { %5869 = vmatmul.mubr.msk.bf16.gmra.mxu0 %vm691_vm3, %v7362_v42  ;;  %v7535_v56 = vsel %vm6602_vm7, %v2884_v58, %v2885_v53  ;;  %v7548_v42 = vsel %vm6602_vm7, %v2891_v6, %v2892_v51  ;;  %v2906_v53 = vrot.slane %v7265_v4, 5  ;;  %v2905_v58 = vrot.slane %v2903_v60, 4 }
  0xdb   : > { %5872 = vmatprep.mubr.msk.bf16.mxu0 %vm691_vm3, %v7368_v15  ;;  %v7559_v15 = vsel %vm6602_vm7, %v5303_v26, %v2903_v60  ;;  %v2913_v51 = vrot.slane %v7286_v45, 5  ;;  %v5274_v45 = vld [vmem:[%s6272_s11 + $0x18] sm:$0xe]  ;;  %v7599_v9 = vsel %vm6602_vm7, %v5304_v63, %v2910_v57  ;;  %v2912_v46 = vrot.slane %v2910_v57, 4  ;;  %v6097_v26 = vld [vmem:[%s6272_s11 + $0x24] sm:$0xff]  }
  0xdc   : > { %v7587_v32 = vsel %vm6602_vm7, %v2905_v58, %v2906_v53  ;;  %v5290_v37 = vrot.slane %v5274_v45, 9  ;;  %v5306_v34 = vcombine.low %v2806_v22, %v2809_v39  ;;  %v9014_v60 = vld [vmem:[#allocation12_spill] sm:$0xff] }
  0xdd   : > { %5835 = vmatmul.mubr.msk.bf16.gmra.mxu1 %vm691_vm3, %v6093_v19  ;;  %v5256_v19 = vcombine.low %v2434_v16, %v2444_v21  ;;  %v7604_v47 = vsel %vm6602_vm7, %v2912_v46, %v2913_v51  ;;  %v2815_v21 = vrot.slane %v6113_v44, 5  ;;  %v4569_v53 = vsel %vm740_vm0, %v9014_v60, 0  ;;  %v5403_v63 = vld [vmem:[%s6272_s11 + $0x18] sm:$0xf]  ;;  %v5404_v57 = vld [vmem:[%s6272_s11 + $0x1c] sm:$0xf] }
  0xde   : > { %5838 = vmatprep.mubr.msk.bf16.mxu1 %vm691_vm3, %v6094_v27  ;;  %v6112_v27 = vld [vmem:[%s6272_s11 + $0x1c] sm:$0xf]  ;;  %v5406_v51 = vld [vmem:[%s6272_s11 + $0x24] sm:$0xf]  ;;  %v3617_v45 = vshrl.u32 %v5403_v63, 16  ;;  %v3626_v39 = vshll.u32 %v5404_v57, 16 }
  0xdf   : > { %v2812_v36 = vrot.slane %v6112_v27, 5  ;;  %v3620_v27 = vshll.u32 %v5403_v63, 16  ;;  %v3641_v46 = vshrl.u32 %v5406_v51, 16  ;;  %v6100_v44 = vld [vmem:[%s6272_s11 + $0x48] sm:$0xff]   ;;  %v5484_v60 = vld [vmem:[%s6272_s11 + $0x18] sm:$0xe] }
  0xe0   : > { %v7645_v63 = vld [vmem:[%s6272_s11 + $0x2c] sm:$0x1] }
  0xe1   : > { %v2814_v16 = vrot.slane %v2812_v36, 4  ;;  %v2813_v17 = vsel %vm6602_vm7, %v5290_v37, %v2812_v36  ;;  %v7629_v36 = vld [vmem:[%s6272_s11 + $0x28] sm:$0xf]  ;;  %v6099_v37 = vld [vmem:[%s6272_s11 + $0x3c] sm:$0xff]   ;;  %v3643_v18 = vrot.slane %v3641_v46, 4 }
  0xe2   : > { %5873 = vmatmul.mubr.msk.bf16.gmra.mxu0 %vm691_vm3, %v5256_v19  ;;  %v9015_v19 = vld [vmem:[#allocation14_spill] sm:$0xff] }
  0xe3   : > { %5912 = vmatprep.mubr.msk.bf16.mxu0 %vm691_vm3, %v6096_v49  ;;  %v2816_v20 = vsel %vm6602_vm7, %v2814_v16, %v2815_v21  ;;  %v4099_v22 = vsel %vm740_vm0, %v9015_v19, 0  ;;  %v3630_v49 = vshrl.u32 %v5404_v57, 16  ;;  %v3654_v16 = vshrl.u32 %v7629_v36, 16  ;;  %v5405_v21 = vld [vmem:[%s6272_s11 + $0x20] sm:$0x1] }
  0xe4   : > { %v5307_v58 = vcombine.low %v2813_v17, %v2816_v20  ;;  %v3619_v17 = vrot.slane %v3617_v45, 4  ;;  %v3622_v20 = vrot.slane %v3620_v27, 5  ;;  %v5409_v19 = vld [vmem:[%s6272_s11 + $0x30] sm:$0xf]  ;;  %v3636_v45 = vshll.u32 %v5405_v21, 16 }
  0xe5   : > { %5839 = vmatmul.mubr.msk.bf16.gmra.mxu1 %vm691_vm3, %v6095_v52  ;;  %v3644_v52 = vshll.u32 %v5406_v51, 16  ;;  %v3656_v51 = vrot.slane %v3654_v16, 4  ;;  %v5500_v27 = vrot.slane %v5484_v60, 9  ;;  %v4363_v46 = vrot.slane %v5405_v21, 5  ;;  %v5485_v16 = vld [vmem:[%s6272_s11 + $0x24] sm:$0xe] }
  0xe6   : > { %5878 = vmatprep.mubr.msk.bf16.mxu1 %vm691_vm3, %v5306_v34  ;;  %v3650_v34 = vshll.u32 %v7629_v36, 16  ;;  %v6101_v21 = vld [vmem:[%s6272_s11 + $0x54] sm:$0xff]   ;;  %v3668_v10 = vshll.u32 %v5409_v19, 16  ;;  %v6102_v60 = vld [vmem:[%s6272_s11 + $0x60] sm:$0xff]  }
  0xe7   : > { %v3646_v11 = vrot.slane %v3644_v52, 5  ;;  %v3660_v52 = vshll.u32 %v7645_v63, 16 }
  0xea   : > { %5913 = vmatmul.mubr.msk.bf16.vlgmr.msra.gmra.mxu0 %vm691_vm3, %v6097_v26  ;;  %v7641_v26 = vrot.slane %v3626_v39, 5 }
  0xeb   : > { %5979 = vmatpush3.bf16.msra.mxu0 %v4569_v53  ;;  %5916 = vmatprep.mubr.msk.bf16.mxu0 %vm691_vm3, %v6098_v38  ;;  %v3632_v38 = vrot.slane %v3630_v49, 4  ;;  %v4360_v53 = vrot.slane %v5404_v57, 5  ;;  %v7655_v57 = vld [vmem:[%s6272_s11 + $0x34] sm:$0xf] }
  0xed   : > { %5879 = vmatmul.mubr.msk.bf16.vlgmr.msra.gmra.mxu1 %vm691_vm3, %v5307_v58  ;;  %v7650_v58 = vrot.slane %v3650_v34, 5  ;;  %v3633_v39 = vor.u32 %v3632_v38, %v7641_v26  ;;  %v4362_v49 = vrot.slane %v4360_v53, 4  ;;  %v3647_v34 = vor.u32 %v3646_v11, %v3643_v18 }
  0xee   : > { %5945 = vmatpush3.bf16.msra.mxu1 %v4099_v22  ;;  %5882 = vmatprep.mubr.msk.bf16.mxu1 %vm691_vm3, %v5308_v5  ;;  %v7648_v5 = vpop.f32.mrf.mxu0  ;;  %v3623_v22 = vor.u32 %v3622_v20, %v3619_v17  ;;  %v3665_v17 = vshrl.u32 %v5409_v19, 16  ;;  %v3678_v38 = vshrl.u32 %v7655_v57, 16  ;;  %v7680_v61 = vsel %vm6602_vm7, %v5500_v27, %v4360_v53  ;;  %v5412_v19 = vld [vmem:[%s6272_s11 + $0x3c] sm:$0xf] }
  0xef   : > { %v3657_v41 = vor.u32 %v3656_v51, %v7650_v58  ;;  %v3634_v8 = vrot.slane %v3633_v39, 4  ;;  %v3662_v11 = vrot.slane %v3660_v52, 5  ;;  %v5501_v51 = vrot.slane %v5485_v16, 9  ;;  %v7694_v39 = vld [vmem:[%s6272_s11 + $0x38] sm:$0x1] }
  0xf0   : > { %v7672_v20 = vpop.f32.mrf.mxu0  ;;  %v3624_v18 = vrot.slane %v3623_v22, 4  ;;  %v3648_v12 = vrot.slane %v3647_v34, 4  ;;  %v4370_v22 = vrot.slane %v7645_v63, 5  ;;  %v3680_v52 = vrot.slane %v3678_v38, 4 }
  0xf1   : > { %v3658_v27 = vrot.slane %v3657_v41, 4  ;;  %v3689_v34 = vshrl.u32 %v5412_v19, 16  ;;  %v3692_v16 = vshll.u32 %v5412_v19, 16  ;;  %v7707_v41 = vld [vmem:[%s6272_s11 + $0x40] sm:$0xf] }
  0xf2   : > { %5917 = vmatmul.mubr.msk.bf16.gmra.mxu0 %vm691_vm3, %v6099_v37  ;;  %v7691_v53 = vpop.f32.mrf.mxu0  ;;  %v3629_v63 = vsel %vm6316_vm4, %v3624_v18, %v7641_v26  ;;  %v3653_v26 = vsel %vm6316_vm4, %v3648_v12, %v7650_v58  ;;  %v5486_v18 = vld [vmem:[%s6272_s11 + $0x30] sm:$0xe]  ;;  %v3698_v24 = vshll.u32 %v7707_v41, 16  ;;  %v3702_v33 = vshrl.u32 %v7707_v41, 16 }
  0xf3   : > { %5920 = vmatprep.mubr.msk.bf16.mxu0 %vm691_vm3, %v6100_v44  ;;  %v7663_v37 = vpop.f32.mrf.mxu1  ;;  %v4367_v44 = vrot.slane %v7629_v36, 5  ;;  %v3638_v36 = vrot.slane %v3636_v45, 5  ;;  %v3667_v45 = vrot.slane %v3665_v17, 4  ;;  %v3663_v58 = vsel %vm6316_vm4, %v3658_v27, %v3662_v11 }
  0xf4   : > { %9016 = vst [vmem:[#allocation7_spill] sm:$0xff] %v7663_v37  ;;  %v7736_v12 = vpop.f32.mrf.mxu0  ;;  %v3694_v19 = vrot.slane %v3692_v16, 5  ;;  %v3726_v11 = vshrl.u32 %v7729_v7, 16 }
  0xf5   : > { %5883 = vmatmul.mubr.msk.bf16.gmra.mxu1 %vm691_vm3, %v5309_v48  ;;  %v3674_v48 = vshll.u32 %v7655_v57, 16  ;;  %v7687_v6 = vpop.f32.mrf.mxu1  ;;  %v4369_v4 = vrot.slane %v4367_v44, 4  ;;  %v3639_v17 = vsel %vm6316_vm4, %v3634_v8, %v3638_v36  ;;  %v4374_v36 = vrot.slane %v7655_v57, 5  ;;  %v6104_v8 = vld [vmem:[%s6272_s11 + $0x78] sm:$0xff]  }
  0xf6   : > { %5886 = vmatprep.mubr.msk.bf16.mxu1 %vm691_vm3, %v5310_v40  ;;  %v7684_v40 = vsel %vm6602_vm7, %v4362_v49, %v4363_v46  ;;  %9017 = vst [vmem:[#allocation6_spill] sm:$0xff] %v7687_v6  ;;  %v3670_v49 = vrot.slane %v3668_v10, 5  ;;  %v7750_v27 = vcombine.low %v3629_v63, %v3639_v17  ;;  %v7752_v57 = vcombine.low %v3653_v26, %v3663_v58  ;;  %v7766_v17 = vld [vmem:[%s6272_s11 + $0x58] sm:$0xf]  ;;  %v7772_v58 = vld [vmem:[%s6272_s11 + $0x44] sm:$0x1] }
  0xf7   : > { %v7696_v46 = vrot.slane %v3674_v48, 5  ;;  %v7713_v10 = vpop.f32.mrf.mxu1  ;;  %v7720_v48 = vsel %vm6602_vm7, %v5501_v51, %v4367_v44  ;;  %v7724_v38 = vsel %vm6602_vm7, %v4369_v4, %v4370_v22  ;;  %v3691_v51 = vrot.slane %v3689_v34, 4  ;;  %v5418_v34 = vld [vmem:[%s6272_s11 + $0x54] sm:$0xf] }
  0xf8   : > { %9018 = vst [vmem:[#allocation9_spill] sm:$0xff] %v7713_v10  ;;  %v3671_v44 = vor.u32 %v3670_v49, %v3667_v45  ;;  %v3716_v22 = vshll.u32 %v5415_v3, 16  ;;  %v4376_v13 = vrot.slane %v4374_v36, 4  ;;  %v4377_v63 = vrot.slane %v7694_v39, 5  ;;  %v5487_v49 = vld [vmem:[%s6272_s11 + $0x3c] sm:$0xe] }
  0xf9   : > { %v3681_v4 = vor.u32 %v3680_v52, %v7696_v46  ;;  %v7748_v45 = vpop.f32.mrf.mxu1  ;;  %v5502_v52 = vrot.slane %v5486_v18, 9  ;;  %v3695_v18 = vor.u32 %v3694_v19, %v3691_v51  ;;  %v9021_v6 = vcombine.low %v7461_v28, %v7477_v1 }
  0xfa   : > { %5921 = vmatmul.mubr.msk.bf16.gmra.mxu0 %vm691_vm3, %v6101_v21  ;;  %v3722_v21 = vshll.u32 %v7729_v7, 16  ;;  %9019 = vst [vmem:[#allocation8_spill] sm:$0xff] %v7748_v45  ;;  %v3718_v45 = vrot.slane %v3716_v22, 5  ;;  %v3737_v51 = vshrl.u32 %v5418_v34, 16  ;;  %v3740_v19 = vshll.u32 %v5418_v34, 16 }
  0xfb   : > { %5924 = vmatprep.mubr.msk.bf16.mxu0 %vm691_vm3, %v6102_v60  ;;  %v3684_v60 = vshll.u32 %v7694_v39, 16  ;;  %v7769_v26 = vrot.slane %v3681_v4, 4  ;;  %v3728_v39 = vrot.slane %v3726_v11, 4  ;;  %v7807_v22 = vsel %vm6602_vm7, %v4376_v13, %v4377_v63 }
  0xfc   : > { %v7777_v10 = vrot.slane %v3722_v21, 5  ;;  %v9023_v21 = vcombine.low %v7470_v25, %v7489_v14  ;;  %v4381_v25 = vrot.slane %v7707_v41, 5  ;;  %v6106_v14 = vld [vmem:[%s6272_s11 + $0x90] sm:$0xff]   ;;  %v5503_v1 = vrot.slane %v5487_v49, 9  ;;  %v5421_v41 = vld [vmem:[%s6272_s11 + $0x60] sm:$0xf] }
  0xfd   : > { %5887 = vmatmul.mubr.msk.bf16.gmra.mxu1 %vm691_vm3, %v5311_v35  ;;  %v6103_v35 = vld [vmem:[%s6272_s11 + $0x6c] sm:$0xff]   ;;  %v7762_v62 = vrot.slane %v3684_v60, 5  ;;  %v3739_v37 = vrot.slane %v3737_v51, 4 }
  0xfe   : > { %5890 = vmatprep.mubr.msk.bf16.mxu1 %vm691_vm3, %v5312_v23  ;;  %v3713_v23 = vshrl.u32 %v5415_v3, 16  ;;  %v7760_v3 = vrot.slane %v3671_v44, 4  ;;  %v3704_v44 = vrot.slane %v3702_v33, 4  ;;  %v3750_v33 = vshrl.u32 %v7766_v17, 16 }
  0xff   : > { %v7758_v16 = vpop.f32.mrf.mxu0  ;;  %v3729_v13 = vor.u32 %v3728_v39, %v7777_v10  ;;  %v4388_v39 = vrot.slane %v7729_v7, 5  ;;  %v9027_v7 = vcombine.low %v7481_v43, %v7498_v2  ;;  %v9029_v43 = vcombine.low %v7502_v59, %v7512_v50  ;;  %v6107_v2 = vld [vmem:[%s6272_s11 + $0x9c] sm:$0xff]  }
 0x100   : > { %9020 = vst [vmem:[#allocation11_spill] sm:$0xff] %v7758_v16  ;;  %v3715_v60 = vrot.slane %v3713_v23, 4  ;;  %v6105_v23 = vld [vmem:[%s6272_s11 + $0x84] sm:$0xff]   ;;  %v7834_v16 = vld [vmem:[%s6272_s11 + $0x5c] sm:$0x1]  ;;  %v4395_v59 = vrot.slane %v7766_v17, 5 }
 0x101   : > { %v7795_v28 = vpop.f32.mrf.mxu0 }
 0x102   : > { %5925 = vmatmul.mubr.msk.bf16.gmra.mxu0 %vm691_vm3, %v6103_v35  ;;  %v7774_v35 = vrot.slane %v3698_v24, 5  ;;  %v3746_v24 = vshll.u32 %v7766_v17, 16  ;;  %9024 = vst [vmem:[#allocation15_spill] sm:$0xff] %v7795_v28  ;;  %v3742_v28 = vrot.slane %v3740_v19, 5 }
 0x103   : > { %5928 = vmatprep.mubr.msk.bf16.mxu0 %vm691_vm3, %v6104_v8  ;;  %v7783_v4 = vpop.f32.mrf.mxu1  ;;  %v7786_v8 = vld [vmem:[%s6272_s11 + $0x50] sm:$0x1]  ;;  %v7827_v49 = vpop.f32.mrf.mxu0 }
 0x104   : > { %9022 = vst [vmem:[#allocation10_spill] sm:$0xff] %v7783_v4  ;;  %v3705_v34 = vor.u32 %v3704_v44, %v7774_v35  ;;  %v7817_v4 = vrot.slane %v3695_v18, 4  ;;  %v7824_v11 = vrot.slane %v3746_v24, 5  ;;  %v3752_v44 = vrot.slane %v3750_v33, 4  ;;  %9026 = vst [vmem:[#allocation5_spill] sm:$0xff] %v7827_v49 }
 0x105   : > { %5891 = vmatmul.mubr.msk.bf16.gmra.mxu1 %vm691_vm3, %v9021_v6  ;;  %v7803_v6 = vsel %vm6602_vm7, %v5502_v52, %v4374_v36  ;;  %v3719_v36 = vor.u32 %v3718_v45, %v3715_v60  ;;  %v3732_v52 = vshll.u32 %v7786_v8, 16  ;;  %v7822_v63 = vpop.f32.mrf.mxu1  ;;  %v4383_v18 = vrot.slane %v4381_v25, 4  ;;  %v5488_v24 = vld [vmem:[%s6272_s11 + $0x48] sm:$0xe] }
 0x106   : > { %5894 = vmatprep.mubr.msk.bf16.mxu1 %vm691_vm3, %v9023_v21  ;;  %v3708_v21 = vshll.u32 %v7772_v58, 16  ;;  %9025 = vst [vmem:[#allocation13_spill] sm:$0xff] %v7822_v63  ;;  %v4384_v60 = vrot.slane %v7772_v58, 5  ;;  %v3706_v51 = vrot.slane %v3705_v34, 4  ;;  %v3761_v33 = vshrl.u32 %v5421_v41, 16 }
 0x107   : > { %v7840_v63 = vsel %vm6602_vm7, %v5503_v1, %v4381_v25  ;;  %v3720_v45 = vrot.slane %v3719_v36, 4  ;;  %v3730_v49 = vrot.slane %v3729_v13, 4  ;;  %v3734_v58 = vrot.slane %v3732_v52, 5  ;;  %v7855_v36 = vld [vmem:[%s6272_s11 + $0x64] sm:$0xf]  ;;  %v7862_v13 = vpop.f32.mrf.mxu0 }
 0x108   : > { %v3710_v19 = vrot.slane %v3708_v21, 5  ;;  %v3701_v34 = vsel %vm6316_vm4, %v7817_v4, %v7774_v35  ;;  %v3743_v21 = vor.u32 %v3742_v28, %v3739_v37  ;;  %v3753_v1 = vor.u32 %v3752_v44, %v7824_v11  ;;  %9030 = vst [vmem:[#allocation17_spill] sm:$0xff] %v7862_v13  ;;  %v5489_v28 = vld [vmem:[%s6272_s11 + $0x54] sm:$0xe]  ;;  %v6111_v13 = vld [vmem:[%s6272_s11 + $0xcc] sm:$0xff]  }
 0x109   : > { %v3756_v25 = vshll.u32 %v7834_v16, 16  ;;  %v7866_v52 = vsel %vm6602_vm7, %v4383_v18, %v4384_v60  ;;  %v5504_v35 = vrot.slane %v5488_v24, 9  ;;  %v4390_v37 = vrot.slane %v4388_v39, 4 }
 0x10a   : > { %5929 = vmatmul.mubr.msk.bf16.gmra.mxu0 %vm691_vm3, %v6105_v23  ;;  %v3764_v23 = vshll.u32 %v5421_v41, 16  ;;  %v4391_v4 = vrot.slane %v7786_v8, 5  ;;  %v6108_v41 = vld [vmem:[%s6272_s11 + $0xa8] sm:$0xff]   ;;  %v3711_v44 = vsel %vm6316_vm4, %v3706_v51, %v3710_v19  ;;  %v3763_v50 = vrot.slane %v3761_v33, 4 }
 0x10b   : > { %5932 = vmatprep.mubr.msk.bf16.mxu0 %vm691_vm3, %v6106_v14  ;;  %v7846_v14 = vpop.f32.mrf.mxu1  ;;  %v3735_v18 = vsel %vm6316_vm4, %v3730_v49, %v3734_v58  ;;  %v3770_v60 = vshll.u32 %v7855_v36, 16  ;;  %v3774_v8 = vshrl.u32 %v7855_v36, 16  ;;  %v3754_v51 = vrot.slane %v3753_v1, 4  ;;  %v7884_v33 = vld [vmem:[%s6272_s11 + $0x68] sm:$0x1] }
 0x10c   : > { %9028 = vst [vmem:[#allocation16_spill] sm:$0xff] %v7846_v14  ;;  %v3744_v14 = vrot.slane %v3743_v21, 4  ;;  %v3758_v17 = vrot.slane %v3756_v25, 5  ;;  %v5505_v19 = vrot.slane %v5489_v28, 9  ;;  %v9033_v49 = vsel %vm6316_vm4, %v7769_v26, %v7762_v62  ;;  %v5424_v25 = vld [vmem:[%s6272_s11 + $0x6c] sm:$0xf] }
 0x10d   : > { %5895 = vmatmul.mubr.msk.bf16.gmra.mxu1 %vm691_vm3, %v9027_v7  ;;  %v3766_v7 = vrot.slane %v3764_v23, 5  ;;  %v7881_v24 = vpop.f32.mrf.mxu1  ;;  %v7905_v21 = vsel %vm6602_vm7, %v5504_v35, %v4388_v39  ;;  %v7909_v1 = vsel %vm6602_vm7, %v4390_v37, %v4391_v4  ;;  %v7912_v62 = vcombine.low %v3701_v34, %v3711_v44  ;;  %v5490_v4 = vld [vmem:[%s6272_s11 + $0x60] sm:$0xe]  ;;  %v5430_v44 = vld [vmem:[%s6272_s11 + $0x84] sm:$0xf] }
 0x10e   : > { %5898 = vmatprep.mubr.msk.bf16.mxu1 %vm691_vm3, %v9029_v43  ;;  %v3725_v43 = vsel %vm6316_vm4, %v3720_v45, %v7777_v10  ;;  %9031 = vst [vmem:[#allocation18_spill] sm:$0xff] %v7881_v24  ;;  %v9034_v45 = vsel %vm6316_vm4, %v7760_v3, %v7696_v46  ;;  %v4397_v46 = vrot.slane %v4395_v59, 4  ;;  %v4398_v3 = vrot.slane %v7834_v16, 5 }
 0x10f   : > { %v7899_v23 = vcombine.low %v9034_v45, %v9033_v49  ;;  %9035 = vst [vmem:[#allocation14_spill] sm:$0xff] %v7912_v62  ;;  %v3767_v26 = vor.u32 %v3766_v7, %v3763_v50  ;;  %v7919_v28 = vcombine.low %v3725_v43, %v3735_v18  ;;  %v7921_v39 = vrot.slane %v3770_v60, 5 }
 0x110   : > { %v7887_v10 = vpop.f32.mrf.mxu0  ;;  %v7923_v35 = vrot.slane %v3774_v8, 4  ;;  %v3780_v37 = vshll.u32 %v7884_v33, 16  ;;  %v9037_v34 = vcombine.low %v7520_v54, %v7535_v56  ;;  %v3749_v50 = vsel %vm6316_vm4, %v3744_v14, %v7824_v11  ;;  %v5427_v54 = vld [vmem:[%s6272_s11 + $0x78] sm:$0xf] }
 0x111   : > { %9032 = vst [vmem:[#allocation12_spill] sm:$0xff] %v7887_v10  ;;  %9036 = vst [vmem:[#allocation19_spill] sm:$0xff] %v7919_v28  ;;  %v3759_v7 = vsel %vm6316_vm4, %v3754_v51, %v3758_v17  ;;  %v7943_v43 = vsel %vm6602_vm7, %v5505_v19, %v4395_v59  ;;  %v9039_v56 = vcombine.low %v7527_v29, %v7548_v42  ;;  %v3785_v60 = vshrl.u32 %v5424_v25, 16  ;;  %v7955_v51 = vld [vmem:[%s6272_s11 + $0x7c] sm:$0xf]  ;;  %v6110_v59 = vld [vmem:[%s6272_s11 + $0xc0] sm:$0xff]  }
 0x112   : > { %5933 = vmatmul.mubr.msk.bf16.gmra.mxu0 %vm691_vm3, %v6107_v2  ;;  %v7917_v2 = vld [vmem:[%s6272_s11 + $0x70] sm:$0xf]  ;;  %v7950_v18 = vpop.f32.mrf.mxu0  ;;  %v3788_v8 = vshll.u32 %v5424_v25, 16  ;;  %v7960_v17 = vsel %vm6602_vm7, %v4397_v46, %v4398_v3  ;;  %v7962_v29 = vrot.slane %v3767_v26, 4  ;;  %v5506_v42 = vrot.slane %v5490_v4, 9 }
 0x113   : > { %5936 = vmatprep.mubr.msk.bf16.mxu0 %vm691_vm3, %v6108_v41  ;;  %v6109_v41 = vld [vmem:[%s6272_s11 + $0xb4] sm:$0xff]   ;;  %9040 = vst [vmem:[#allocation21_spill] sm:$0xff] %v7950_v18  ;;  %v3794_v11 = vshll.u32 %v7917_v2, 16  ;;  %v3798_v14 = vshrl.u32 %v7917_v2, 16  ;;  %v4402_v19 = vrot.slane %v7855_v36, 5  ;;  %v7965_v49 = vcombine.low %v3749_v50, %v3759_v7 }
 0x114   : > { %v3777_v45 = vor.u32 %v7923_v35, %v7921_v39  ;;  %v7969_v25 = vrot.slane %v3780_v37, 5  ;;  %v3809_v46 = vshrl.u32 %v5427_v54, 16  ;;  %v3812_v3 = vshll.u32 %v5427_v54, 16  ;;  %v7981_v4 = vld [vmem:[%s6272_s11 + $0x88] sm:$0xf]  ;;  %v7984_v35 = vpop.f32.mrf.mxu0 }
 0x115   : > { %5899 = vmatmul.mubr.msk.bf16.gmra.mxu1 %vm691_vm3, %v9037_v34  ;;  %v7931_v16 = vpop.f32.mrf.mxu1  ;;  %9041 = vst [vmem:[#allocation22_spill] sm:$0xff] %v7965_v49  ;;  %v4405_v34 = vrot.slane %v7884_v33, 5  ;;  %v3818_v36 = vshll.u32 %v7955_v51, 16  ;;  %v3822_v26 = vshrl.u32 %v7955_v51, 16  ;;  %9043 = vst [vmem:[#allocation24_spill] sm:$0xff] %v7984_v35  ;;  %v3787_v33 = vrot.slane %v3785_v60, 4 }
 0x116   : > { %9038 = vst [vmem:[#allocation20_spill] sm:$0xff] %v7931_v16  ;;  %5902 = vmatprep.mubr.msk.bf16.mxu1 %vm691_vm3, %v9039_v56  ;;  %v7973_v56 = vld [vmem:[%s6272_s11 + $0x74] sm:$0x1]  ;;  %v3790_v37 = vrot.slane %v3788_v8, 5  ;;  %v7986_v50 = vrot.slane %v3794_v11, 5  ;;  %v3800_v7 = vrot.slane %v3798_v14, 4  ;;  %v9044_v54 = vcombine.low %v7539_v30, %v7555_v55  ;;  %v8014_v49 = vpop.f32.mrf.mxu0 }
 0x117   : > { %v7976_v58 = vpop.f32.mrf.mxu1  ;;  %v4404_v16 = vrot.slane %v4402_v19, 4  ;;  %v7999_v60 = vld [vmem:[%s6272_s11 + $0x80] sm:$0x1]  ;;  %v8002_v8 = vld [vmem:[%s6272_s11 + $0x6c] sm:$0xe]  ;;  %v3833_v11 = vshrl.u32 %v5430_v44, 16 }
 0x118   : > { %9042 = vst [vmem:[#allocation23_spill] sm:$0xff] %v7976_v58  ;;  %v7995_v58 = vsel %vm6602_vm7, %v5506_v42, %v4402_v19  ;;  %v3836_v14 = vshll.u32 %v5430_v44, 16  ;;  %v3846_v24 = vshrl.u32 %v7981_v4, 16  ;;  %v3811_v19 = vrot.slane %v3809_v46, 4  ;;  %9046 = vst [vmem:[#allocation26_spill] sm:$0xff] %v8014_v49 }
 0x119   : > { %v8010_v42 = vpop.f32.mrf.mxu1  ;;  %v3814_v35 = vrot.slane %v3812_v3, 5  ;;  %v8012_v18 = vrot.slane %v3818_v36, 5  ;;  %v3824_v10 = vrot.slane %v3822_v26, 4  ;;  %v9047_v44 = vcombine.low %v7559_v15, %v7587_v32  ;;  %v8033_v32 = vld [vmem:[%s6272_s11 + $0x8c] sm:$0x1] }
 0x11a   : > { %5937 = vmatmul.mubr.msk.bf16.gmra.mxu0 %vm691_vm3, %v6109_v41  ;;  %v3804_v41 = vshll.u32 %v7973_v56, 16  ;;  %9045 = vst [vmem:[#allocation25_spill] sm:$0xff] %v8010_v42  ;;  %v3791_v30 = vor.u32 %v3790_v37, %v3787_v33  ;;  %v3801_v55 = vor.u32 %v3800_v7, %v7986_v50  ;;  %v3828_v46 = vshll.u32 %v7999_v60, 16  ;;  %v5492_v33 = vld [vmem:[%s6272_s11 + $0x78] sm:$0xe] }
 0x11b   : > { %5940 = vmatprep.mubr.msk.bf16.mxu0 %vm691_vm3, %v6110_v59  ;;  %v3842_v59 = vshll.u32 %v7981_v4, 16  ;;  %v8024_v3 = vrot.slane %v3777_v45, 4  ;;  %v8028_v36 = vsel %vm6602_vm7, %v4404_v16, %v4405_v34  ;;  %v5507_v26 = vrot.slane %v8002_v8, 9  ;;  %v8038_v42 = vpop.f32.mrf.mxu1  ;;  %v5433_v8 = vld [vmem:[%s6272_s11 + $0x90] sm:$0xf] }
 0x11c   : > { %v4416_v15 = vrot.slane %v7955_v51, 5  ;;  %v3835_v37 = vrot.slane %v3833_v11, 4  ;;  %v3838_v7 = vrot.slane %v3836_v14, 5  ;;  %9048 = vst [vmem:[#allocation27_spill] sm:$0xff] %v8038_v42  ;;  %v3806_v45 = vrot.slane %v3804_v41, 5 }
 0x11d   : > { %5903 = vmatmul.mubr.msk.bf16.gmra.mxu1 %vm691_vm3, %v9044_v54  ;;  %v4409_v54 = vrot.slane %v7917_v2, 5  ;;  %v8036_v2 = vrot.slane %v3842_v59, 5  ;;  %v4412_v49 = vrot.slane %v7973_v56, 5  ;;  %v3815_v16 = vor.u32 %v3814_v35, %v3811_v19  ;;  %v8047_v59 = vld [vmem:[%s6272_s11 + $0x94] sm:$0xf] }
 0x11e   : > { %5906 = vmatprep.mubr.msk.bf16.mxu1 %vm691_vm3, %v9047_v44  ;;  %v3848_v44 = vrot.slane %v3846_v24, 4  ;;  %v3825_v34 = vor.u32 %v3824_v10, %v8012_v18  ;;  %v3792_v51 = vrot.slane %v3791_v30, 4  ;;  %v3802_v11 = vrot.slane %v3801_v55, 4 }
 0x11f   : > { %v4411_v62 = vrot.slane %v4409_v54, 4  ;;  %v3830_v14 = vrot.slane %v3828_v46, 5  ;;  %v9049_v24 = vcombine.low %v7680_v61, %v7684_v40  ;;  %v5508_v56 = vrot.slane %v5492_v33, 9 }
 0x120   : > { %v4418_v35 = vrot.slane %v4416_v15, 4  ;;  %v4419_v10 = vrot.slane %v7999_v60, 5  ;;  %v3852_v41 = vshll.u32 %v8033_v32, 16  ;;  %v3849_v30 = vor.u32 %v3848_v44, %v8036_v2 }
 0x121   : > { %v3857_v55 = vshrl.u32 %v5433_v8, 16  ;;  %v3860_v46 = vshll.u32 %v5433_v8, 16  ;;  %v9051_v61 = vcombine.low %v7599_v9, %v7604_v47  ;;  %v3816_v40 = vrot.slane %v3815_v16, 4 }
 0x122   : > { %v8043_v28 = vpop.f32.mrf.mxu0  ;;  %5941 = vmatmul.mubr.msk.bf16.gmra.mxu0 %vm691_vm3, %v6111_v13  ;;  %v3839_v13 = vor.u32 %v3838_v7, %v3835_v37  ;;  %v3826_v33 = vrot.slane %v3825_v34, 4  ;;  %v3866_v60 = vshll.u32 %v8047_v59, 16  ;;  %v3783_v37 = vsel %vm6316_vm4, %v8024_v3, %v7969_v25 }
 0x123   : > { %5980 = vmatprep.mubr.msk.bf16.mxu0 %vm691_vm3, %v9049_v24  ;;  %v3870_v24 = vshrl.u32 %v8047_v59, 16  ;;  %v3797_v9 = vsel %vm6316_vm4, %v3792_v51, %v7986_v50  ;;  %v8079_v47 = vsel %vm6602_vm7, %v5507_v26, %v4409_v54  ;;  %v8083_v7 = vsel %vm6602_vm7, %v4411_v62, %v4412_v49  ;;  %v5493_v54 = vld [vmem:[%s6272_s11 + $0x84] sm:$0xe]  ;;  %v9090_v31 = vld [vmem:[#allocation27_spill] sm:$0xff] }
 0x124   : > { %v8055_v19 = vpop.f32.mrf.mxu0  ;;  %v8091_v25 = vsel %vm6602_vm7, %v5508_v56, %v4416_v15  ;;  %v8095_v50 = vsel %vm6602_vm7, %v4418_v35, %v4419_v10  ;;  %v3854_v3 = vrot.slane %v3852_v41, 5  ;;  %v3840_v62 = vrot.slane %v3839_v13, 4  ;;  %v8119_v13 = vld [vmem:[%s6272_s11 + $0x98] sm:$0x1] }
 0x125   : > { %9050 = vst [vmem:[#allocation28_spill] sm:$0xff] %v8055_v19  ;;  %v8058_v42 = vpop.f32.mrf.mxu1  ;;  %5907 = vmatmul.mubr.msk.bf16.gmra.mxu1 %vm691_vm3, %v9051_v61  ;;  %v3850_v49 = vrot.slane %v3849_v30, 4  ;;  %v3859_v16 = vrot.slane %v3857_v55, 4  ;;  %v3862_v34 = vrot.slane %v3860_v46, 5  ;;  %v3821_v15 = vsel %vm6316_vm4, %v3816_v40, %v8012_v18  ;;  %v5436_v30 = vld [vmem:[%s6272_s11 + $0x9c] sm:$0xf] }
 0x126   : > { %v8066_v19 = vpop.f32.mrf.mxu0  ;;  %5946 = vmatprep.mubr.msk.bf16.mxu1 %vm691_vm3, %v7750_v27  ;;  %v3807_v27 = vsel %vm6316_vm4, %v3802_v11, %v3806_v45  ;;  %v3831_v45 = vsel %vm6316_vm4, %v3826_v33, %v3830_v14  ;;  %v8107_v51 = vrot.slane %v3866_v60, 5  ;;  %v3872_v11 = vrot.slane %v3870_v24, 4  ;;  %v8150_v24 = vld [vmem:[%s6272_s11 + $0xa0] sm:$0xf] }
 0x127   : > { %v8085_v44 = vpop.f32.mrf.mxu1  ;;  %v9052_v35 = vcombine.low %v7720_v48, %v7724_v38  ;;  %v5522_v10 = vcombine.low %v7943_v43, %v7960_v17  ;;  %v5523_v41 = vcombine.low %v7995_v58, %v8028_v36  ;;  %v5509_v18 = vrot.slane %v5493_v54, 9 }
 0x128   : > { %v8098_v26 = vpop.f32.mrf.mxu0  ;;  %v4423_v14 = vrot.slane %v7981_v4, 5  ;;  %v9053_v48 = vcombine.low %v7803_v6, %v7807_v22  ;;  %v9054_v38 = vsel %vm6316_vm4, %v7962_v29, %v7921_v39  ;;  %v8135_v61 = vcombine.low %v3797_v9, %v3807_v27  ;;  %v5494_v29 = vld [vmem:[%s6272_s11 + $0x90] sm:$0xe]  ;;  %v9061_v4 = vld [vmem:[#allocation5_spill] sm:$0xff] }
 0x129   : > { %v8100_v8 = vpop.f32.mrf.mxu1  ;;  %v8133_v46 = vcombine.low %v9054_v38, %v3783_v37  ;;  %v8141_v60 = vcombine.low %v3821_v15, %v3831_v45  ;;  %v3845_v6 = vsel %vm6316_vm4, %v3840_v62, %v8036_v2  ;;  %v3855_v22 = vsel %vm6316_vm4, %v3850_v49, %v3854_v3 }
 0x12a   : > { %v5778_v56 = vpop.f32.mrf.mxu0  ;;  %5981 = vmatmul.mubr.msk.bf16.vlgmr.msra.gmra.mxu0 %vm691_vm3, %v9052_v35  ;;  %v3863_v39 = vor.u32 %v3862_v34, %v3859_v16  ;;  %v3873_v9 = vor.u32 %v3872_v11, %v8107_v51  ;;  %v3876_v27 = vshll.u32 %v8119_v13, 16  ;;  %v3881_v54 = vshrl.u32 %v5436_v30, 16 }
 0x12b   : > { %v8122_v55 = vpop.f32.mrf.mxu1  ;;  %5984 = vmatprep.mubr.msk.bf16.mxu0 %vm691_vm3, %v9053_v48  ;;  %v3884_v15 = vshll.u32 %v5436_v30, 16  ;;  %v8161_v3 = vsel %vm6602_vm7, %v5509_v18, %v4423_v14  ;;  %v4425_v62 = vrot.slane %v4423_v14, 4  ;;  %v4426_v49 = vrot.slane %v8033_v32, 5 }
 0x12c   : > { %v1495_v33 = vpop.f32.mrf.mxu0  ;;  %v5510_v16 = vrot.slane %v5494_v29, 9  ;;  %v4430_v34 = vrot.slane %v8047_v59, 5  ;;  %v3890_v11 = vshll.u32 %v8150_v24, 16  ;;  %v3894_v35 = vshrl.u32 %v8150_v24, 16 }
 0x12d   : > { %v5744_v37 = vpop.f32.mrf.mxu1  ;;  %5947 = vmatmul.mubr.msk.bf16.vlgmr.msra.gmra.mxu1 %vm691_vm3, %v7752_v57  ;;  %v8170_v48 = vcombine.low %v3845_v6, %v3855_v22  ;;  %v8172_v18 = vrot.slane %v3863_v39, 4  ;;  %v3874_v32 = vrot.slane %v3873_v9, 4  ;;  %v3878_v38 = vrot.slane %v3876_v27, 5  ;;  %v5439_v22 = vld [vmem:[%s6272_s11 + $0xa8] sm:$0xf] }
 0x12e   : > { %v1079_v45 = vadd.f32 %v5744_v37, %v7648_v5  ;;  %v5779_v2 = vpop.f32.mrf.mxu0  ;;  %5950 = vmatprep.mubr.msk.bf16.mxu1 %vm691_vm3, %v7899_v23  ;;  %v3883_v29 = vrot.slane %v3881_v54, 4  ;;  %v3886_v59 = vrot.slane %v3884_v15, 5  ;;  %v4433_v6 = vrot.slane %v8119_v13, 5  ;;  %v8198_v27 = vld [vmem:[%s6272_s11 + $0xac] sm:$0xf] }
 0x12f   : > { %v1070_v57 = vpop.f32.mrf.mxu1  ;;  %v3896_v9 = vrot.slane %v3894_v35, 4  ;;  %v9058_v35 = vld [vmem:[#allocation11_spill] sm:$0xff] }
 0x130   : > { %v8167_v5 = vadd.f32 %v5778_v56, %v1079_v45  ;;  %v1071_v23 = vadd.f32 %v1070_v57, %v7672_v20  ;;  %v1498_v30 = vpop.f32.mrf.mxu0  ;;  %v9055_v45 = vcombine.low %v7840_v63, %v7866_v52  ;;  %v8183_v20 = vsel %vm6602_vm7, %v4425_v62, %v4426_v49  ;;  %v5495_v62 = vld [vmem:[%s6272_s11 + $0x9c] sm:$0xe] }
 0x131   : > { %v5745_v14 = vpop.f32.mrf.mxu1  ;;  %v4432_v63 = vrot.slane %v4430_v34, 4  ;;  %v8195_v52 = vrot.slane %v3890_v11, 5  ;;  %v4437_v49 = vrot.slane %v8150_v24, 5  ;;  %v3914_v24 = vshll.u32 %v8198_v27, 16 }
 0x132   : > { %v8174_v37 = vadd.f32 %v1495_v33, %v1071_v23  ;;  %v1082_v40 = vadd.f32 %v5745_v14, %v7691_v53  ;;  %v5782_v56 = vpop.f32.mrf.mxu0  ;;  %5985 = vmatmul.mubr.msk.bf16.gmra.mxu0 %vm691_vm3, %v9055_v45  ;;  %v9056_v33 = vcombine.low %v7905_v21, %v7909_v1  ;;  %v8193_v53 = vsel %vm6602_vm7, %v5510_v16, %v4430_v34  ;;  %v5438_v1 = vld [vmem:[%s6272_s11 + $0xa4] sm:$0x1]  ;;  %v9057_v16 = vld [vmem:[#allocation14_spill] sm:$0xff] }
 0x133   : > { %v1073_v39 = vpop.f32.mrf.mxu1  ;;  %v3869_v21 = vsel %vm6316_vm4, %v8172_v18, %v8107_v51  ;;  %v3905_v34 = vshrl.u32 %v5439_v22, 16  ;;  %v9059_v51 = vld [vmem:[#allocation19_spill] sm:$0xff]  ;;  %v3918_v18 = vshrl.u32 %v8198_v27, 16 }
 0x134   : > { %5988 = vmatprep.mubr.msk.bf16.mxu0 %vm691_vm3, %v9056_v33  ;;  %v8200_v54 = vadd.f32 %v5779_v2, %v1082_v40  ;;  %v1074_v13 = vadd.f32 %v1073_v39, %v7736_v12  ;;  %v1511_v15 = vpop.f32.mrf.mxu0  ;;  %v3879_v40 = vsel %vm6316_vm4, %v3874_v32, %v3878_v38  ;;  %v3887_v2 = vor.u32 %v3886_v59, %v3883_v29  ;;  %v9060_v59 = vld [vmem:[#allocation15_spill] sm:$0xff] }
 0x135   : > { %v5748_v57 = vpop.f32.mrf.mxu1  ;;  %5951 = vmatmul.mubr.msk.bf16.gmra.mxu1 %vm691_vm3, %v9057_v16  ;;  %v3908_v12 = vshll.u32 %v5439_v22, 16  ;;  %v8223_v39 = vsel %vm6602_vm7, %v4432_v63, %v4433_v6  ;;  %v3897_v32 = vor.u32 %v3896_v9, %v8195_v52  ;;  %v3900_v38 = vshll.u32 %v5438_v1, 16 }
 0x136   : > { %v8214_v11 = vadd.f32 %v1498_v30, %v1074_v13  ;;  %v1095_v23 = vadd.f32 %v5748_v57, %v9058_v35  ;;  %v5783_v14 = vpop.f32.mrf.mxu0  ;;  %5954 = vmatprep.mubr.msk.bf16.mxu1 %vm691_vm3, %v9059_v51  ;;  %v5511_v30 = vrot.slane %v5495_v62, 9  ;;  %v4439_v13 = vrot.slane %v4437_v49, 4 }
 0x137   : > { %v1086_v45 = vpop.f32.mrf.mxu1  ;;  %v4440_v57 = vrot.slane %v5438_v1, 5  ;;  %v8231_v51 = vrot.slane %v3887_v2, 4  ;;  %v3907_v6 = vrot.slane %v3905_v34, 4  ;;  %v3910_v63 = vrot.slane %v3908_v12, 5  ;;  %v8241_v1 = vld [vmem:[%s6272_s11 + $0xb0] sm:$0x1] }
 0x138   : > { %v8226_v29 = vadd.f32 %v5782_v56, %v1095_v23  ;;  %v1087_v22 = vadd.f32 %v1086_v45, %v9060_v59  ;;  %v1514_v33 = vpop.f32.mrf.mxu0  ;;  %v8243_v23 = vrot.slane %v3914_v24, 5  ;;  %v3920_v2 = vrot.slane %v3918_v18, 4  ;;  %v9062_v12 = vld [vmem:[#allocation17_spill] sm:$0xff] }
 0x139   : > { %v5749_v16 = vpop.f32.mrf.mxu1  ;;  %v8253_v43 = vrot.slane %v3897_v32, 4  ;;  %v8255_v17 = vrot.slane %v3900_v38, 5  ;;  %v8263_v58 = vsel %vm6602_vm7, %v5511_v30, %v4437_v49  ;;  %v8267_v36 = vsel %vm6602_vm7, %v4439_v13, %v4440_v57  ;;  %v8279_v30 = vld [vmem:[%s6272_s11 + $0xb8] sm:$0xf] }
 0x13a   : > { %v8233_v9 = vadd.f32 %v1511_v15, %v1087_v22  ;;  %v1098_v62 = vadd.f32 %v5749_v16, %v9061_v4  ;;  %v5786_v56 = vpop.f32.mrf.mxu0  ;;  %5989 = vmatmul.mubr.msk.bf16.gmra.mxu0 %vm691_vm3, %v5522_v10  ;;  %v8249_v15 = vcombine.low %v3869_v21, %v3879_v40  ;;  %v5496_v10 = vld [vmem:[%s6272_s11 + $0xa8] sm:$0xe]  ;;  %v3911_v32 = vor.u32 %v3910_v63, %v3907_v6  ;;  %v9064_v22 = vld [vmem:[#allocation12_spill] sm:$0xff] }
 0x13b   : > { %v1089_v45 = vpop.f32.mrf.mxu1  ;;  %5992 = vmatprep.mubr.msk.bf16.mxu0 %vm691_vm3, %v5523_v41  ;;  %v5442_v41 = vld [vmem:[%s6272_s11 + $0xb4] sm:$0xf]  ;;  %v9063_v40 = vld [vmem:[#allocation22_spill] sm:$0xff]  ;;  %v3924_v38 = vshll.u32 %v8241_v1, 16  ;;  %v4444_v49 = vrot.slane %v8198_v27, 5  ;;  %v3921_v16 = vor.u32 %v3920_v2, %v8243_v23  ;;  %v3903_v27 = vsel %vm6316_vm4, %v8253_v43, %v8255_v17 }
 0x13c   : > { %v8258_v34 = vadd.f32 %v5783_v14, %v1098_v62  ;;  %v1090_v24 = vadd.f32 %v1089_v45, %v9062_v12  ;;  %v1527_v18 = vpop.f32.mrf.mxu0  ;;  %v5512_v62 = vrot.slane %v5496_v10, 9  ;;  %v3929_v6 = vshrl.u32 %v5442_v41, 16 }
 0x13d   : > { %v5752_v21 = vpop.f32.mrf.mxu1  ;;  %5955 = vmatmul.mubr.msk.bf16.gmra.mxu1 %vm691_vm3, %v9063_v40  ;;  %v3932_v63 = vshll.u32 %v5442_v41, 16  ;;  %v3938_v2 = vshll.u32 %v8279_v30, 16  ;;  %v3942_v10 = vshrl.u32 %v8279_v30, 16  ;;  %v5445_v40 = vld [vmem:[%s6272_s11 + $0xc0] sm:$0xf]  ;;  %v3912_v4 = vrot.slane %v3911_v32, 4 }
 0x13e   : > { %v8281_v59 = vadd.f32 %v1514_v33, %v1090_v24  ;;  %v1111_v13 = vadd.f32 %v5752_v21, %v9064_v22  ;;  %v5787_v57 = vpop.f32.mrf.mxu0  ;;  %5958 = vmatprep.mubr.msk.bf16.mxu1 %vm691_vm3, %v8133_v46  ;;  %v9066_v24 = vld [vmem:[#allocation21_spill] sm:$0xff]  ;;  %v3926_v43 = vrot.slane %v3924_v38, 5  ;;  %v4446_v17 = vrot.slane %v4444_v49, 4 }
 0x13f   : > { %v1102_v45 = vpop.f32.mrf.mxu1  ;;  %v4447_v33 = vrot.slane %v8241_v1, 5  ;;  %v8309_v14 = vsel %vm6602_vm7, %v5512_v62, %v4444_v49  ;;  %v8312_v32 = vld [vmem:[%s6272_s11 + $0xc4] sm:$0xf]  ;;  %v9070_v1 = vcombine.low %v8091_v25, %v8095_v50  ;;  %v8324_v62 = vrot.slane %v3938_v2, 5 }
 0x140   : > { %v8293_v12 = vadd.f32 %v5786_v56, %v1111_v13  ;;  %v1103_v21 = vadd.f32 %v1102_v45, %v9066_v24  ;;  %v1530_v46 = vpop.f32.mrf.mxu0  ;;  %v9068_v56 = vld [vmem:[#allocation24_spill] sm:$0xff]  ;;  %v9069_v45 = vcombine.low %v8079_v47, %v8083_v7  ;;  %v3922_v24 = vrot.slane %v3921_v16, 4  ;;  %v9071_v16 = vld [vmem:[#allocation26_spill] sm:$0xff] }
 0x141   : > { %v5753_v22 = vpop.f32.mrf.mxu1  ;;  %v3953_v47 = vshrl.u32 %v5445_v40, 16  ;;  %v3956_v7 = vshll.u32 %v5445_v40, 16  ;;  %v3917_v25 = vsel %vm6316_vm4, %v3912_v4, %v8243_v23  ;;  %v8333_v50 = vsel %vm6602_vm7, %v4446_v17, %v4447_v33  ;;  %v5497_v40 = vld [vmem:[%s6272_s11 + $0xb4] sm:$0xe] }
 0x142   : > { %9065 = vst [vmem:[#allocation14_spill] sm:$0xff] %v8293_v12  ;;  %v8300_v35 = vadd.f32 %v1527_v18, %v1103_v21  ;;  %v1114_v41 = vadd.f32 %v5753_v22, %v9068_v56  ;;  %v5790_v13 = vpop.f32.mrf.mxu0  ;;  %5993 = vmatmul.mubr.msk.bf16.gmra.mxu0 %vm691_vm3, %v9069_v45  ;;  %v8319_v18 = vld [vmem:[%s6272_s11 + $0xbc] sm:$0x1]  ;;  %v3931_v21 = vrot.slane %v3929_v6, 4  ;;  %v3934_v22 = vrot.slane %v3932_v63, 5 }
 0x143   : > { %v1105_v38 = vpop.f32.mrf.mxu1  ;;  %5996 = vmatprep.mubr.msk.bf16.mxu0 %vm691_vm3, %v9070_v1  ;;  %v3966_v6 = vshrl.u32 %v8312_v32, 16  ;;  %v3948_v23 = vshll.u32 %v8319_v18, 16  ;;  %v4451_v17 = vrot.slane %v8279_v30, 5  ;;  %v9072_v1 = vld [vmem:[#allocation28_spill] sm:$0xff] }
 0x144   : > { %9067 = vst [vmem:[#allocation11_spill] sm:$0xff] %v8300_v35  ;;  %v8321_v56 = vadd.f32 %v5787_v57, %v1114_v41  ;;  %v1106_v45 = vadd.f32 %v1105_v38, %v9071_v16  ;;  %v1543_v49 = vpop.f32.mrf.mxu0  ;;  %v3944_v35 = vrot.slane %v3942_v10, 4  ;;  %v3962_v57 = vshll.u32 %v8312_v32, 16 }
 0x145   : > { %v5756_v12 = vpop.f32.mrf.mxu1  ;;  %5959 = vmatmul.mubr.msk.bf16.gmra.mxu1 %vm691_vm3, %v8135_v61  ;;  %v3927_v61 = vsel %vm6316_vm4, %v3922_v24, %v3926_v43  ;;  %v3935_v33 = vor.u32 %v3934_v22, %v3931_v21  ;;  %v3955_v41 = vrot.slane %v3953_v47, 4  ;;  %v3958_v38 = vrot.slane %v3956_v7, 5 }
 0x146   : > { %v8337_v63 = vadd.f32 %v1530_v46, %v1106_v45  ;;  %v1127_v2 = vadd.f32 %v5756_v12, %v8043_v28  ;;  %v5791_v10 = vpop.f32.mrf.mxu0  ;;  %5962 = vmatprep.mubr.msk.bf16.mxu1 %vm691_vm3, %v8141_v60  ;;  %v9073_v60 = vsel %vm6316_vm4, %v8231_v51, %v8195_v52  ;;  %v3945_v24 = vor.u32 %v3944_v35, %v8324_v62 }
 0x147   : > { %v1118_v4 = vpop.f32.mrf.mxu1  ;;  %v8355_v43 = vcombine.low %v9073_v60, %v3903_v27  ;;  %v8358_v30 = vcombine.low %v3917_v25, %v3927_v61  ;;  %v8362_v22 = vrot.slane %v3962_v57, 5  ;;  %v3968_v47 = vrot.slane %v3966_v6, 4  ;;  %v5447_v27 = vld [vmem:[%s6272_s11 + $0xc8] sm:$0x1] }
 0x148   : > { %v8347_v46 = vadd.f32 %v5790_v13, %v1127_v2  ;;  %v1119_v28 = vadd.f32 %v1118_v4, %v9072_v1  ;;  %v1546_v12 = vpop.f32.mrf.mxu0  ;;  %v5529_v13 = vcombine.low %v8309_v14, %v8333_v50  ;;  %v9074_v52 = vcombine.low %v8161_v3, %v8183_v20  ;;  %v5448_v14 = vld [vmem:[%s6272_s11 + $0xcc] sm:$0xf]  ;;  %v8383_v20 = vld [vmem:[%s6272_s11 + $0xd0] sm:$0xf]  ;;  %v5498_v4 = vld [vmem:[%s6272_s11 + $0xc0] sm:$0xe] }
 0x149   : > { %v5757_v21 = vpop.f32.mrf.mxu1  ;;  %v8371_v35 = vrot.slane %v3948_v23, 5  ;;  %v5513_v51 = vrot.slane %v5497_v40, 9  ;;  %v9075_v50 = vcombine.low %v8193_v53, %v8223_v39  ;;  %v4454_v57 = vrot.slane %v8319_v18, 5 }
 0x14a   : > { %v8364_v7 = vadd.f32 %v1543_v49, %v1119_v28  ;;  %v1130_v16 = vadd.f32 %v5757_v21, %v8066_v19  ;;  %v5794_v45 = vpop.f32.mrf.mxu0  ;;  %5997 = vmatmul.mubr.msk.bf16.gmra.mxu0 %vm691_vm3, %v9074_v52  ;;  %v8379_v49 = vrot.slane %v3935_v33, 4  ;;  %v4453_v19 = vrot.slane %v4451_v17, 4 }
 0x14b   : > { %v1121_v25 = vpop.f32.mrf.mxu1  ;;  %6000 = vmatprep.mubr.msk.bf16.mxu0 %vm691_vm3, %v9075_v50  ;;  %v3959_v3 = vor.u32 %v3958_v38, %v3955_v41  ;;  %v8388_v23 = vrot.slane %v3945_v24, 4  ;;  %v4458_v53 = vrot.slane %v8312_v32, 5  ;;  %v3969_v33 = vor.u32 %v3968_v47, %v8362_v22 }
 0x14c   : > { %v8385_v6 = vadd.f32 %v5791_v10, %v1130_v16  ;;  %v1122_v2 = vadd.f32 %v1121_v25, %v8098_v26  ;;  %v1559_v61 = vpop.f32.mrf.mxu0  ;;  %v3972_v18 = vshll.u32 %v5447_v27, 16  ;;  %v3977_v40 = vshrl.u32 %v5448_v14, 16  ;;  %v9078_v10 = vld [vmem:[#allocation7_spill] sm:$0xff]  ;;  %v9079_v16 = vld [vmem:[#allocation6_spill] sm:$0xff] }
 0x14d   : > { %v5760_v39 = vpop.f32.mrf.mxu1  ;;  %5963 = vmatmul.mubr.msk.bf16.gmra.mxu1 %vm691_vm3, %v8170_v48  ;;  %v3980_v41 = vshll.u32 %v5448_v14, 16  ;;  %v3986_v28 = vshll.u32 %v8383_v20, 16  ;;  %v3990_v32 = vshrl.u32 %v8383_v20, 16  ;;  %v4452_v48 = vsel %vm6602_vm7, %v5513_v51, %v4451_v17  ;;  %v9080_v17 = vld [vmem:[#allocation9_spill] sm:$0xff] }
 0x14e   : > { %9076 = vst [vmem:[#allocation19_spill] sm:$0xff] %v8385_v6  ;;  %v8395_v38 = vadd.f32 %v1546_v12, %v1122_v2  ;;  %v1143_v1 = vadd.f32 %v5760_v39, %v9078_v10  ;;  %v5795_v26 = vpop.f32.mrf.mxu0  ;;  %5966 = vmatprep.mubr.msk.bf16.mxu1 %vm691_vm3, %v8249_v15  ;;  %v4455_v24 = vsel %vm6602_vm7, %v4453_v19, %v4454_v57  ;;  %v3960_v21 = vrot.slane %v3959_v3, 4 }
 0x14f   : > { %v1134_v60 = vpop.f32.mrf.mxu1  ;;  %v5514_v12 = vrot.slane %v5498_v4, 9  ;;  %v4460_v25 = vrot.slane %v4458_v53, 4  ;;  %v4461_v15 = vrot.slane %v5447_v27, 5  ;;  %v3970_v2 = vrot.slane %v3969_v33, 4  ;;  %v5450_v33 = vld [vmem:[%s6272_s11 + $0xd4] sm:$0x1] }
 0x150   : > { %9077 = vst [vmem:[#allocation15_spill] sm:$0xff] %v8395_v38  ;;  %v8406_v47 = vadd.f32 %v5794_v45, %v1143_v1  ;;  %v1135_v52 = vadd.f32 %v1134_v60, %v9079_v16  ;;  %v1562_v14 = vpop.f32.mrf.mxu0  ;;  %v3974_v39 = vrot.slane %v3972_v18, 5  ;;  %v3979_v10 = vrot.slane %v3977_v40, 4  ;;  %v9082_v18 = vld [vmem:[#allocation8_spill] sm:$0xff] }
 0x151   : > { %v5761_v50 = vpop.f32.mrf.mxu1  ;;  %v3982_v38 = vrot.slane %v3980_v41, 5  ;;  %v9081_v45 = vcombine.low %v8263_v58, %v8267_v36  ;;  %v8416_v57 = vrot.slane %v3986_v28, 5  ;;  %v3992_v27 = vrot.slane %v3990_v32, 4 }
 0x152   : > { %v8409_v6 = vadd.f32 %v1559_v61, %v1135_v52  ;;  %v1146_v51 = vadd.f32 %v5761_v50, %v9080_v17  ;;  %v5798_v19 = vpop.f32.mrf.mxu0  ;;  %v3941_v61 = vsel %vm6316_vm4, %v8379_v49, %v8324_v62  ;;  %v3951_v4 = vsel %vm6316_vm4, %v8388_v23, %v8371_v35  ;;  %v5499_v62 = vld [vmem:[%s6272_s11 + $0xcc] sm:$0xe]  ;;  %s5550_s11 = sshll.u32 %s6223_s19, 4  ;;  %s4916_s19 = scalar_lea.sflag [#allocation3], %s189_s10 }
 0x153   : > { %6001 = vmatmul.mubr.msk.bf16.gmra.mxu0 %vm691_vm3, %v9081_v45  ;;  %v1137_v3 = vpop.f32.mrf.mxu1  ;;  %v4465_v58 = vrot.slane %v8383_v20, 5  ;;  %v4462_v1 = vsel %vm6602_vm7, %v4460_v25, %v4461_v15  ;;  %v5530_v35 = vcombine.low %v4452_v48, %v4455_v24  ;;  %v3965_v20 = vsel %vm6316_vm4, %v3960_v21, %v8362_v22  ;;  %v9084_v25 = vld [vmem:[#allocation13_spill] sm:$0xff]  ;;  %s8849_s28 = scalar_lea.hbm %s8901_s3, %s5550_s11 }
 0x154   : > { %6004 = vmatprep.mubr.msk.bf16.mxu0 %vm691_vm3, %v5529_v13  ;;  %v8429_v36 = vadd.f32 %v5795_v26, %v1146_v51  ;;  %v1138_v40 = vadd.f32 %v1137_v3, %v9082_v18  ;;  %v1575_v41 = vpop.f32.mrf.mxu0  ;;  %v4459_v13 = vsel %vm6602_vm7, %v5514_v12, %v4458_v53  ;;  %v3975_v23 = vsel %vm6316_vm4, %v3970_v2, %v3974_v39  ;;  %v9083_v53 = vld [vmem:[#allocation10_spill] sm:$0xff] }
 0x155   : > { %v5764_v49 = vpop.f32.mrf.mxu1  ;;  %5967 = vmatmul.mubr.msk.bf16.gmra.mxu1 %vm691_vm3, %v8355_v43  ;;  %v3983_v26 = vor.u32 %v3982_v38, %v3979_v10  ;;  %v3993_v12 = vor.u32 %v3992_v27, %v8416_v57  ;;  %v3996_v43 = vshll.u32 %v5450_v33, 16  ;;  %v5531_v24 = vcombine.low %v4459_v13, %v4462_v1 }
 0x156   : > { %v8444_v28 = vadd.f32 %v1562_v14, %v1138_v40  ;;  %v1159_v32 = vadd.f32 %v5764_v49, %v9083_v53  ;;  %v5799_v60 = vpop.f32.mrf.mxu0  ;;  %5970 = vmatprep.mubr.msk.bf16.mxu1 %vm691_vm3, %v8358_v30  ;;  %v5515_v16 = vrot.slane %v5499_v62, 9  ;;  %v4467_v52 = vrot.slane %v4465_v58, 4  ;;  %v9085_v30 = vld [vmem:[#allocation16_spill] sm:$0xff] }
 0x157   : > { %v1150_v48 = vpop.f32.mrf.mxu1  ;;  %v4468_v22 = vrot.slane %v5450_v33, 5  ;;  %v5465_v50 = vcombine.low %v3941_v61, %v3951_v4  ;;  %v5466_v2 = vcombine.low %v3965_v20, %v3975_v23  ;;  %v3984_v39 = vrot.slane %v3983_v26, 4  ;;  %v9086_v33 = vld [vmem:[#allocation18_spill] sm:$0xff]  ;;  %v9087_v62 = vld [vmem:[#allocation20_spill] sm:$0xff]  ;;  %v9088_v26 = vld [vmem:[#allocation23_spill] sm:$0xff] }
 0x158   : > { %v8450_v21 = vadd.f32 %v5798_v19, %v1159_v32  ;;  %v1151_v38 = vadd.f32 %v1150_v48, %v9084_v25  ;;  %v1578_v14 = vpop.f32.mrf.mxu0  ;;  %v3994_v45 = vrot.slane %v3993_v12, 4  ;;  %v3998_v27 = vrot.slane %v3996_v43, 5  ;;  %v9089_v43 = vld [vmem:[#allocation25_spill] sm:$0xff] }
 0x159   : > { %v5765_v15 = vpop.f32.mrf.mxu1  ;;  %v4466_v19 = vsel %vm6602_vm7, %v5515_v16, %v4465_v58  ;;  %v4469_v61 = vsel %vm6602_vm7, %v4467_v52, %v4468_v22  ;;  %v3989_v13 = vsel %vm6316_vm4, %v3984_v39, %v8416_v57 }
 0x15a   : > { %v8453_v10 = vadd.f32 %v1575_v41, %v1151_v38  ;;  %v1162_v17 = vadd.f32 %v5765_v15, %v9085_v30  ;;  %v5802_v51 = vpop.f32.mrf.mxu0  ;;  %v3999_v0 = vsel %vm6316_vm4, %v3994_v45, %v3998_v27 }
 0x15b   : > { %6005 = vmatmul.mubr.msk.bf16.gmra.mxu0 %vm691_vm3, %v5530_v35  ;;  %v1153_v3 = vpop.f32.mrf.mxu1  ;;  %v5532_v35 = vcombine.low %v4466_v19, %v4469_v61  ;;  %v5467_v12 = vcombine.low %v3989_v13, %v3999_v0 }
 0x15c   : > { %6008 = vmatprep.mubr.msk.bf16.mxu0 %vm691_vm3, %v5531_v24  ;;  %v8462_v4 = vadd.f32 %v5799_v60, %v1162_v17  ;;  %v1154_v18 = vadd.f32 %v1153_v3, %v9086_v33  ;;  %v1591_v40 = vpop.f32.mrf.mxu0 }
 0x15d   : > { %v5768_v41 = vpop.f32.mrf.mxu1  ;;  %5971 = vmatmul.mubr.msk.bf16.gmra.mxu1 %vm691_vm3, %v5465_v50 }
 0x15e   : > { %v8469_v1 = vadd.f32 %v1578_v14, %v1154_v18  ;;  %v1175_v49 = vadd.f32 %v5768_v41, %v9087_v62  ;;  %v5803_v58 = vpop.f32.mrf.mxu0  ;;  %5974 = vmatprep.mubr.msk.bf16.mxu1 %vm691_vm3, %v5466_v2 }
 0x15f   : > { %v1166_v20 = vpop.f32.mrf.mxu1 }
 0x160   : > { %v8475_v23 = vadd.f32 %v5802_v51, %v1175_v49  ;;  %v1167_v53 = vadd.f32 %v1166_v20, %v9088_v26  ;;  %v1594_v32 = vpop.f32.mrf.mxu0 }
 0x161   : > { %v5769_v60 = vpop.f32.mrf.mxu1 }
 0x162   : > { %v8478_v57 = vadd.f32 %v1591_v40, %v1167_v53  ;;  %v1178_v48 = vadd.f32 %v5769_v60, %v9089_v43  ;;  %v5806_v24 = vpop.f32.mrf.mxu0 }
 0x163   : > { %6009 = vmatmul.mubr.msk.bf16.gmra.mxu0 %vm691_vm3, %v5532_v35  ;;  %v1169_v16 = vpop.f32.mrf.mxu1 }
 0x164   : > { %v8482_v52 = vadd.f32 %v5803_v58, %v1178_v48  ;;  %v1170_v22 = vadd.f32 %v1169_v16, %v9090_v31  ;;  %v1607_v25 = vpop.f32.mrf.mxu0 }
 0x165   : > { %v5772_v38 = vpop.f32.mrf.mxu1  ;;  %5975 = vmatmul.mubr.msk.bf16.gmra.mxu1 %vm691_vm3, %v5467_v12 }
 0x166   : > { %v8486_v14 = vadd.f32 %v1594_v32, %v1170_v22  ;;  %v1191_v15 = vadd.f32 %v5772_v38, %v8058_v42  ;;  %v5807_v50 = vpop.f32.mrf.mxu0 }
 0x167   : > { %v1182_v2 = vpop.f32.mrf.mxu1 }
 0x168   : > { %v8489_v39 = vadd.f32 %v5806_v24, %v1191_v15  ;;  %v1183_v30 = vadd.f32 %v1182_v2, %v8085_v44  ;;  %v1610_v17 = vpop.f32.mrf.mxu0 }
 0x169   : > { %v5773_v51 = vpop.f32.mrf.mxu1 }
 0x16a   : > { %v8492_v45 = vadd.f32 %v1607_v25, %v1183_v30  ;;  %v1194_v27 = vadd.f32 %v5773_v51, %v8100_v8  ;;  %v5846_v3 = vpop.f32.mrf.mxu0  ;;  %v9091_v30 = vld [vmem:[#allocation14_spill] sm:$0xff] }
 0x16b   : > { %v1185_v19 = vpop.f32.mrf.mxu1 }
 0x16c   : > { %v8495_v61 = vadd.f32 %v5807_v50, %v1194_v27  ;;  %v1186_v33 = vadd.f32 %v1185_v19, %v8122_v55  ;;  %v2580_v18 = vpop.f32.mrf.mxu0 }
 0x16d   : > { %v5812_v42 = vpop.f32.mrf.mxu1 }
 0x16e   : > { %v8498_v40 = vadd.f32 %v1610_v17, %v1186_v33  ;;  %v1983_v41 = vadd.f32 %v5812_v42, %v8167_v5  ;;  %v5847_v13 = vpop.f32.mrf.mxu0 }
 0x16f   : > { %v1854_v44 = vpop.f32.mrf.mxu1 }
 0x170   : > { %v8501_v62 = vadd.f32 %v5846_v3, %v1983_v41  ;;  %v1981_v49 = vadd.f32 %v1854_v44, %v8174_v37  ;;  %v2583_v58 = vpop.f32.mrf.mxu0  ;;  %v9092_v3 = vld [vmem:[#allocation11_spill] sm:$0xff] }
 0x171   : > { %v5813_v8 = vpop.f32.mrf.mxu1 }
 0x172   : > { %v8504_v0 = vadd.f32 %v2580_v18, %v1981_v49  ;;  %v1984_v35 = vadd.f32 %v5813_v8, %v8200_v54  ;;  %v5850_v20 = vpop.f32.mrf.mxu0 }
 0x173   : > { %v1857_v55 = vpop.f32.mrf.mxu1 }
 0x174   : > { %v8507_v26 = vadd.f32 %v5847_v13, %v1984_v35  ;;  %v1982_v53 = vadd.f32 %v1857_v55, %v8214_v11  ;;  %v2596_v32 = vpop.f32.mrf.mxu0 }
 0x175   : > { %v5816_v5 = vpop.f32.mrf.mxu1 }
 0x176   : > { %v8510_v60 = vadd.f32 %v2583_v58, %v1982_v53  ;;  %v1987_v12 = vadd.f32 %v5816_v5, %v8226_v29  ;;  %v5851_v43 = vpop.f32.mrf.mxu0 }
 0x177   : > { %v1870_v37 = vpop.f32.mrf.mxu1 }
 0x178   : > { %v8513_v48 = vadd.f32 %v5850_v20, %v1987_v12  ;;  %v1985_v24 = vadd.f32 %v1870_v37, %v8233_v9  ;;  %v2599_v16 = vpop.f32.mrf.mxu0 }
 0x179   : > { %v5817_v54 = vpop.f32.mrf.mxu1 }
 0x17a   : > { %v8516_v31 = vadd.f32 %v2596_v32, %v1985_v24  ;;  %v1988_v22 = vadd.f32 %v5817_v54, %v8258_v34  ;;  %v5854_v25 = vpop.f32.mrf.mxu0  ;;  %v9094_v54 = vld [vmem:[#allocation15_spill] sm:$0xff] }
 0x17b   : > { %v1873_v11 = vpop.f32.mrf.mxu1 }
 0x17c   : > { %v8519_v38 = vadd.f32 %v5851_v43, %v1988_v22  ;;  %v1986_v15 = vadd.f32 %v1873_v11, %v8281_v59  ;;  %v2612_v50 = vpop.f32.mrf.mxu0  ;;  %v9093_v43 = vld [vmem:[#allocation19_spill] sm:$0xff] }
 0x17d   : > { %v5820_v29 = vpop.f32.mrf.mxu1 }
 0x17e   : > { %v8522_v2 = vadd.f32 %v2599_v16, %v1986_v15  ;;  %v1991_v17 = vadd.f32 %v5820_v29, %v9091_v30  ;;  %v5855_v51 = vpop.f32.mrf.mxu0 }
 0x17f   : > { %v1886_v9 = vpop.f32.mrf.mxu1 }
 0x180   : > { %v8525_v27 = vadd.f32 %v5854_v25, %v1991_v17  ;;  %v1989_v19 = vadd.f32 %v1886_v9, %v9092_v3  ;;  %v2615_v33 = vpop.f32.mrf.mxu0 }
 0x181   : > { %v5821_v34 = vpop.f32.mrf.mxu1 }
 0x182   : > { %v8528_v18 = vadd.f32 %v2612_v50, %v1989_v19  ;;  %v1992_v42 = vadd.f32 %v5821_v34, %v8321_v56  ;;  %v5858_v41 = vpop.f32.mrf.mxu0 }
 0x183   : > { %v1889_v59 = vpop.f32.mrf.mxu1 }
 0x184   : > { %v8531_v13 = vadd.f32 %v5855_v51, %v1992_v42  ;;  %v1990_v44 = vadd.f32 %v1889_v59, %v8337_v63  ;;  %v2628_v49 = vpop.f32.mrf.mxu0 }
 0x185   : > { %v5824_v58 = vpop.f32.mrf.mxu1 }
 0x186   : > { %v8534_v8 = vadd.f32 %v2615_v33, %v1990_v44  ;;  %v1995_v35 = vadd.f32 %v5824_v58, %v8347_v46  ;;  %v5859_v20 = vpop.f32.mrf.mxu0 }
 0x187   : > { %v1902_v55 = vpop.f32.mrf.mxu1 }
 0x188   : > { %v8537_v53 = vadd.f32 %v5858_v41, %v1995_v35  ;;  %v1993_v32 = vadd.f32 %v1902_v55, %v8364_v7  ;;  %v2631_v5 = vpop.f32.mrf.mxu0 }
 0x189   : > { %v5825_v56 = vpop.f32.mrf.mxu1 }
 0x18a   : > { %v8540_v12 = vadd.f32 %v2628_v49, %v1993_v32  ;;  %v1996_v37 = vadd.f32 %v5825_v56, %v9093_v43  ;;  %v5862_v24 = vpop.f32.mrf.mxu0 }
 0x18b   : > { %v1905_v63 = vpop.f32.mrf.mxu1 }
 0x18c   : > { %v8543_v16 = vadd.f32 %v5859_v20, %v1996_v37  ;;  %v1994_v22 = vadd.f32 %v1905_v63, %v9094_v54  ;;  %v2644_v25 = vpop.f32.mrf.mxu0 }
 0x18d   : > { %v5828_v46 = vpop.f32.mrf.mxu1 }
 0x18e   : > { %v8546_v11 = vadd.f32 %v2631_v5, %v1994_v22  ;;  %v1999_v15 = vadd.f32 %v5828_v46, %v8406_v47  ;;  %v5863_v50 = vpop.f32.mrf.mxu0 }
 0x18f   : > { %v1918_v7 = vpop.f32.mrf.mxu1 }
 0x190   : > { %v8549_v29 = vadd.f32 %v5862_v24, %v1999_v15  ;;  %v1997_v30 = vadd.f32 %v1918_v7, %v8409_v6  ;;  %v2647_v17 = vpop.f32.mrf.mxu0 }
 0x191   : > { %v5829_v51 = vpop.f32.mrf.mxu1 }
 0x192   : > { %v8552_v9 = vadd.f32 %v2644_v25, %v1997_v30  ;;  %v2000_v3 = vadd.f32 %v5829_v51, %v8429_v36  ;;  %v5866_v19 = vpop.f32.mrf.mxu0 }
 0x193   : > { %v1921_v33 = vpop.f32.mrf.mxu1 }
 0x194   : > { %v8555_v34 = vadd.f32 %v5863_v50, %v2000_v3  ;;  %v1998_v42 = vadd.f32 %v1921_v33, %v8444_v28  ;;  %v2660_v41 = vpop.f32.mrf.mxu0 }
 0x195   : > { %v5832_v47 = vpop.f32.mrf.mxu1 }
 0x196   : > { %v8558_v59 = vadd.f32 %v2647_v17, %v1998_v42  ;;  %v2003_v44 = vadd.f32 %v5832_v47, %v8450_v21  ;;  %v5867_v49 = vpop.f32.mrf.mxu0 }
 0x197   : > { %v1934_v6 = vpop.f32.mrf.mxu1 }
 0x198   : > { %v8561_v58 = vadd.f32 %v5866_v19, %v2003_v44  ;;  %v2001_v35 = vadd.f32 %v1934_v6, %v8453_v10  ;;  %v2663_v20 = vpop.f32.mrf.mxu0 }
 0x199   : > { %v5833_v36 = vpop.f32.mrf.mxu1 }
 0x19a   : > { %v8564_v55 = vadd.f32 %v2660_v41, %v2001_v35  ;;  %v2004_v32 = vadd.f32 %v5833_v36, %v8462_v4  ;;  %v5870_v5 = vpop.f32.mrf.mxu0 }
 0x19b   : > { %v1937_v28 = vpop.f32.mrf.mxu1 }
 0x19c   : > { %v8567_v56 = vadd.f32 %v5867_v49, %v2004_v32  ;;  %v2002_v43 = vadd.f32 %v1937_v28, %v8469_v1  ;;  %v2676_v37 = vpop.f32.mrf.mxu0 }
 0x19d   : > { %v5836_v21 = vpop.f32.mrf.mxu1 }
 0x19e   : > { %v8570_v24 = vadd.f32 %v2663_v20, %v2002_v43  ;;  %v2007_v63 = vadd.f32 %v5836_v21, %v8475_v23  ;;  %v5871_v54 = vpop.f32.mrf.mxu0 }
 0x19f   : > { %v1950_v10 = vpop.f32.mrf.mxu1 }
 0x1a0   : > { %v8573_v22 = vadd.f32 %v5870_v5, %v2007_v63  ;;  %v2005_v25 = vadd.f32 %v1950_v10, %v8478_v57  ;;  %v2679_v46 = vpop.f32.mrf.mxu0 }
 0x1a1   : > { %v5837_v4 = vpop.f32.mrf.mxu1 }
 0x1a2   : > { %v8576_v15 = vadd.f32 %v2676_v37, %v2005_v25  ;;  %v2008_v50 = vadd.f32 %v5837_v4, %v8482_v52  ;;  %v5874_v7 = vpop.f32.mrf.mxu0 }
 0x1a3   : > { %v1953_v1 = vpop.f32.mrf.mxu1 }
 0x1a4   : > { %9095 = vst [vmem:[#allocation5_spill] sm:$0xff] %v8576_v15  ;;  %v8579_v30 = vadd.f32 %v5871_v54, %v2008_v50  ;;  %v2006_v17 = vadd.f32 %v1953_v1, %v8486_v14  ;;  %v2692_v51 = vpop.f32.mrf.mxu0 }
 0x1a5   : > { %v5840_v23 = vpop.f32.mrf.mxu1 }
 0x1a6   : > { %v8582_v3 = vadd.f32 %v2679_v46, %v2006_v17  ;;  %v2011_v19 = vadd.f32 %v5840_v23, %v8489_v39  ;;  %v5875_v33 = vpop.f32.mrf.mxu0 }
 0x1a7   : > { %v1966_v57 = vpop.f32.mrf.mxu1 }
 0x1a8   : > { %9096 = vst [vmem:[#allocation17_spill] sm:$0xff] %v8582_v3  ;;  %v8585_v42 = vadd.f32 %v5874_v7, %v2011_v19  ;;  %v2009_v41 = vadd.f32 %v1966_v57, %v8492_v45  ;;  %v2695_v47 = vpop.f32.mrf.mxu0 }
 0x1a9   : > { %v5841_v52 = vpop.f32.mrf.mxu1 }
 0x1aa   : > { %v8588_v44 = vadd.f32 %v2692_v51, %v2009_v41  ;;  %v2012_v49 = vadd.f32 %v5841_v52, %v8495_v61  ;;  %v5914_v6 = vpop.f32.mrf.mxu0 }
 0x1ab   : > { %v1969_v14 = vpop.f32.mrf.mxu1 }
 0x1ac   : > { %9097 = vst [vmem:[#allocation22_spill] sm:$0xff] %v8588_v44  ;;  %v8591_v35 = vadd.f32 %v5875_v33, %v2012_v49  ;;  %v2010_v20 = vadd.f32 %v1969_v14, %v8498_v40  ;;  %v3409_v36 = vpop.f32.mrf.mxu0 }
 0x1ad   : > { %v5880_v39 = vpop.f32.mrf.mxu1 }
 0x1ae   : > { %v8594_v32 = vadd.f32 %v2695_v47, %v2010_v20  ;;  %v3179_v5 = vadd.f32 %v5880_v39, %v8501_v62  ;;  %v5915_v28 = vpop.f32.mrf.mxu0 }
 0x1af   : > { %v3050_v45 = vpop.f32.mrf.mxu1 }
 0x1b0   : > { %9098 = vst [vmem:[#allocation12_spill] sm:$0xff] %v8594_v32  ;;  %v8597_v43 = vadd.f32 %v5914_v6, %v3179_v5  ;;  %v3177_v37 = vadd.f32 %v3050_v45, %v8504_v0  ;;  %v8600_v21 = vpop.f32.mrf.mxu0 }
 0x1b1   : > { %v5881_v61 = vpop.f32.mrf.mxu1 }
 0x1b2   : > { %v8602_v63 = vadd.f32 %v3409_v36, %v3177_v37  ;;  %v3180_v54 = vadd.f32 %v5881_v61, %v8507_v26  ;;  %v5918_v40 = vpop.f32.mrf.mxu0 }
 0x1b3   : > { %v8605_v10 = vpop.f32.mrf.mxu1 }
 0x1b4   : > { %v8607_v25 = vadd.f32 %v5915_v28, %v3180_v54  ;;  %v8609_v46 = vpop.f32.mrf.mxu0 }
 0x1b5   : > { %v5884_v62 = vpop.f32.mrf.mxu1 }
 0x1b6   : > { %v3183_v4 = vadd.f32 %v5884_v62, %v8513_v48  ;;  %v5919_v50 = vpop.f32.mrf.mxu0 }
 0x1b7   : > { %v8612_v7 = vpop.f32.mrf.mxu1 }
 0x1b8   : > { %v8614_v0 = vadd.f32 %v5918_v40, %v3183_v4  ;;  %v8616_v1 = vpop.f32.mrf.mxu0 }
 0x1b9   : > { %v5885_v17 = vpop.f32.mrf.mxu1 }
 0x1ba   : > { %v3184_v26 = vadd.f32 %v5885_v17, %v8519_v38  ;;  %v5922_v51 = vpop.f32.mrf.mxu0 }
 0x1bb   : > { %v8619_v23 = vpop.f32.mrf.mxu1 }
 0x1bc   : > { %v8621_v19 = vadd.f32 %v5919_v50, %v3184_v26  ;;  %v8623_v33 = vpop.f32.mrf.mxu0 }
 0x1bd   : > { %v5888_v57 = vpop.f32.mrf.mxu1 }
 0x1be   : > { %v3187_v48 = vadd.f32 %v5888_v57, %v8525_v27  ;;  %v5923_v41 = vpop.f32.mrf.mxu0 }
 0x1bf   : > { %v8626_v47 = vpop.f32.mrf.mxu1 }
 0x1c0   : > { %v8628_v52 = vadd.f32 %v5922_v51, %v3187_v48  ;;  %v8630_v49 = vpop.f32.mrf.mxu0 }
 0x1c1   : > { %v5889_v6 = vpop.f32.mrf.mxu1 }
 0x1c2   : > { %v3188_v38 = vadd.f32 %v5889_v6, %v8531_v13  ;;  %v5926_v14 = vpop.f32.mrf.mxu0 }
 0x1c3   : > { %v8633_v20 = vpop.f32.mrf.mxu1 }
 0x1c4   : > { %v8635_v36 = vadd.f32 %v5923_v41, %v3188_v38  ;;  %v8637_v39 = vpop.f32.mrf.mxu0 }
 0x1c5   : > { %v5892_v5 = vpop.f32.mrf.mxu1 }
 0x1c6   : > { %v3191_v27 = vadd.f32 %v5892_v5, %v8537_v53  ;;  %v5927_v28 = vpop.f32.mrf.mxu0 }
 0x1c7   : > { %v8640_v45 = vpop.f32.mrf.mxu1 }
 0x1c8   : > { %v8642_v37 = vadd.f32 %v5926_v14, %v3191_v27  ;;  %v8644_v61 = vpop.f32.mrf.mxu0 }
 0x1c9   : > { %v5893_v54 = vpop.f32.mrf.mxu1 }
 0x1ca   : > { %v3192_v13 = vadd.f32 %v5893_v54, %v8543_v16  ;;  %v5930_v40 = vpop.f32.mrf.mxu0 }
 0x1cb   : > { %v8647_v62 = vpop.f32.mrf.mxu1 }
 0x1cc   : > { %v8649_v4 = vadd.f32 %v5927_v28, %v3192_v13  ;;  %v8651_v50 = vpop.f32.mrf.mxu0 }
 0x1cd   : > { %v5896_v17 = vpop.f32.mrf.mxu1 }
 0x1ce   : > { %v3195_v53 = vadd.f32 %v5896_v17, %v8549_v29  ;;  %v5931_v26 = vpop.f32.mrf.mxu0 }
 0x1cf   : > { %v8654_v51 = vpop.f32.mrf.mxu1 }
 0x1d0   : > { %v8656_v57 = vadd.f32 %v5930_v40, %v3195_v53  ;;  %v8658_v48 = vpop.f32.mrf.mxu0 }
 0x1d1   : > { %v5897_v41 = vpop.f32.mrf.mxu1 }
 0x1d2   : > { %v3196_v16 = vadd.f32 %v5897_v41, %v8555_v34  ;;  %v5934_v6 = vpop.f32.mrf.mxu0 }
 0x1d3   : > { %v8661_v38 = vpop.f32.mrf.mxu1 }
 0x1d4   : > { %v8663_v14 = vadd.f32 %v5931_v26, %v3196_v16  ;;  %v8665_v5 = vpop.f32.mrf.mxu0 }
 0x1d5   : > { %v5900_v27 = vpop.f32.mrf.mxu1 }
 0x1d6   : > { %v3199_v29 = vadd.f32 %v5900_v27, %v8561_v58  ;;  %v5935_v28 = vpop.f32.mrf.mxu0 }
 0x1d7   : > { %v8668_v54 = vpop.f32.mrf.mxu1 }
 0x1d8   : > { %v8670_v13 = vadd.f32 %v5934_v6, %v3199_v29  ;;  %v8672_v40 = vpop.f32.mrf.mxu0 }
 0x1d9   : > { %v5901_v17 = vpop.f32.mrf.mxu1 }
 0x1da   : > { %v3200_v34 = vadd.f32 %v5901_v17, %v8567_v56  ;;  %v5938_v53 = vpop.f32.mrf.mxu0 }
 0x1db   : > { %v8675_v41 = vpop.f32.mrf.mxu1 }
 0x1dc   : > { %v8677_v26 = vadd.f32 %v5935_v28, %v3200_v34  ;;  %v8679_v16 = vpop.f32.mrf.mxu0 }
 0x1dd   : > { %9100 = vst [vmem:[#allocation24_spill] sm:$0xff] %v8679_v16  ;;  %v5904_v32 = vpop.f32.mrf.mxu1 }
 0x1de   : > { %9099 = vst [vmem:[#allocation21_spill] sm:$0xff] %v8677_v26  ;;  %v3203_v58 = vadd.f32 %v5904_v32, %v8573_v22  ;;  %v5939_v27 = vpop.f32.mrf.mxu0 }
 0x1df   : > { %v8682_v44 = vpop.f32.mrf.mxu1 }
 0x1e0   : > { %v8684_v6 = vadd.f32 %v5938_v53, %v3203_v58  ;;  %v8686_v29 = vpop.f32.mrf.mxu0 }
 0x1e1   : > { %9102 = vst [vmem:[#allocation28_spill] sm:$0xff] %v8686_v29  ;;  %v5905_v3 = vpop.f32.mrf.mxu1 }
 0x1e2   : > { %9101 = vst [vmem:[#allocation26_spill] sm:$0xff] %v8684_v6  ;;  %v3204_v56 = vadd.f32 %v5905_v3, %v8579_v30  ;;  %v5942_v17 = vpop.f32.mrf.mxu0 }
 0x1e3   : > { %v8689_v15 = vpop.f32.mrf.mxu1 }
 0x1e4   : > { %v8691_v28 = vadd.f32 %v5939_v27, %v3204_v56  ;;  %v8693_v34 = vpop.f32.mrf.mxu0 }
 0x1e5   : > { %9104 = vst [vmem:[#allocation6_spill] sm:$0xff] %v8693_v34  ;;  %v5908_v16 = vpop.f32.mrf.mxu1  ;;  %v3178_v34 = vadd.f32 %v8605_v10, %v8510_v60  ;;  %v8718_v60 = vld [vmem:[%s8900_s2] ss:$0 sm:$0xff] }
 0x1e6   : > { %9103 = vst [vmem:[#allocation7_spill] sm:$0xff] %v8691_v28  ;;  %v3207_v22 = vadd.f32 %v5908_v16, %v8585_v42  ;;  %v5943_v32 = vpop.f32.mrf.mxu0 }
 0x1e7   : > { %v8696_v26 = vpop.f32.mrf.mxu1 }
 0x1e8   : > { %v8698_v53 = vadd.f32 %v5942_v17, %v3207_v22  ;;  %v8700_v58 = vpop.f32.mrf.mxu0 }
 0x1e9   : > { %9106 = vst [vmem:[#allocation8_spill] sm:$0xff] %v8700_v58  ;;  %v5909_v29 = vpop.f32.mrf.mxu1 }
 0x1ea   : > { %9105 = vst [vmem:[#allocation9_spill] sm:$0xff] %v8698_v53  ;;  %v3208_v30 = vadd.f32 %v5909_v29, %v8591_v35  ;;  %v5982_v3 = vpop.f32.mrf.mxu0  ;;  %v3537_v53 = vadd.f32 %v8600_v21, %v3178_v34  ;;  %v3181_v29 = vadd.f32 %v8612_v7, %v8516_v31  ;;  %v3182_v34 = vadd.f32 %v8619_v23, %v8522_v2 }
 0x1eb   : > { %v8703_v6 = vpop.f32.mrf.mxu1 }
 0x1ec   : > { %9107 = vst [vmem:[#allocation10_spill] sm:$0xff] %v8703_v6  ;;  %v8705_v27 = vadd.f32 %v5943_v32, %v3208_v30  ;;  %v4605_v56 = vpop.f32.mrf.mxu0  ;;  %v3540_v7 = vadd.f32 %v8609_v46, %v3181_v29 }
 0x1ed   : > { %v5948_v42 = vpop.f32.mrf.mxu1 }
 0x1ee   : > { %9108 = vst [vmem:[#allocation13_spill] sm:$0xff] %v8705_v27  ;;  %v4264_v16 = vadd.f32 %v5948_v42, %v8597_v43  ;;  %v5983_v28 = vpop.f32.mrf.mxu0 }
 0x1ef   : > { %v4135_v17 = vpop.f32.mrf.mxu1 }
 0x1f0   : > { %v4262_v22 = vadd.f32 %v4135_v17, %v8602_v63  ;;  %v4608_v58 = vpop.f32.mrf.mxu0  ;;  %v4734_v32 = vadd.f32 %v5982_v3, %v4264_v16 }
 0x1f1   : > { %v5949_v35 = vpop.f32.mrf.mxu1 }
 0x1f2   : > { %v4732_v30 = vadd.f32 %v4605_v56, %v4262_v22  ;;  %v4265_v27 = vadd.f32 %v5949_v35, %v8607_v25  ;;  %v5986_v6 = vpop.f32.mrf.mxu0  ;;  %v4773_v25 = vadd.f32 %v8718_v60, %v4734_v32 }
 0x1f3   : > { %v4138_v43 = vpop.f32.mrf.mxu1 }
 0x1f4   : > { %v4771_v63 = vadd.f32 %v8718_v60, %v4732_v30  ;;  %v4735_v10 = vadd.f32 %v5983_v28, %v4265_v27  ;;  %v4263_v42 = vadd.f32 %v4138_v43, %v3537_v53  ;;  %v4621_v21 = vpop.f32.mrf.mxu0  ;;  %v3541_v30 = vadd.f32 %v8616_v1, %v3182_v34 }
 0x1f5   : > { %v5952_v31 = vpop.f32.mrf.mxu1  ;;  %v4805_v46 = vmax.f32 %v4773_v25, 0.0 }
 0x1f6   : > { %v4733_v3 = vadd.f32 %v4608_v58, %v4263_v42  ;;  %v5987_v56 = vpop.f32.mrf.mxu0  ;;  %v4803_v16 = vmax.f32 %v4771_v63, 0.0  ;;  %v4774_v17 = vadd.f32 %v8718_v60, %v4735_v10  ;;  %v4268_v22 = vadd.f32 %v5952_v31, %v8614_v0 }
 0x1f7   : > { %v4151_v35 = vpop.f32.mrf.mxu1  ;;  %v3185_v63 = vadd.f32 %v8626_v47, %v8528_v18  ;;  %v3186_v0 = vadd.f32 %v8633_v20, %v8534_v8  ;;  %v4839_v18 = vsel %vm4835_vm8, %v4805_v46, 0.0 }
 0x1f8   : > { %v4772_v28 = vadd.f32 %v8718_v60, %v4733_v3  ;;  %v4266_v53 = vadd.f32 %v4151_v35, %v3540_v7  ;;  %v4624_v27 = vpop.f32.mrf.mxu0  ;;  %v4738_v2 = vadd.f32 %v5986_v6, %v4268_v22  ;;  %v4836_v10 = vsel %vm4835_vm8, %v4803_v16, 0.0 }
 0x1f9   : > { %v5953_v23 = vpop.f32.mrf.mxu1  ;;  %v4806_v42 = vmax.f32 %v4774_v17, 0.0  ;;  %v3544_v16 = vadd.f32 %v8623_v33, %v3185_v63 }
 0x1fa   : > { %v4804_v29 = vmax.f32 %v4772_v28, 0.0  ;;  %v4736_v32 = vadd.f32 %v4621_v21, %v4266_v53  ;;  %v4269_v58 = vadd.f32 %v5953_v23, %v8621_v19  ;;  %v5990_v43 = vpop.f32.mrf.mxu0  ;;  %v4777_v19 = vadd.f32 %v8718_v60, %v4738_v2 }
 0x1fb   : > { %v4154_v31 = vpop.f32.mrf.mxu1  ;;  %v3545_v28 = vadd.f32 %v8630_v49, %v3186_v0  ;;  %v3189_v23 = vadd.f32 %v8640_v45, %v8540_v12 }
 0x1fc   : > { %v4837_v1 = vsel %vm4835_vm8, %v4804_v29, 0.0  ;;  %v4775_v6 = vadd.f32 %v8718_v60, %v4736_v32  ;;  %v4739_v34 = vadd.f32 %v5987_v56, %v4269_v58  ;;  %v4267_v7 = vadd.f32 %v4154_v31, %v3541_v30  ;;  %v4637_v21 = vpop.f32.mrf.mxu0 }
 0x1fd   : > { %v4838_v25 = vadd.f32 %v4837_v1, %v4836_v10  ;;  %v5956_v3 = vpop.f32.mrf.mxu1  ;;  %v4841_v56 = vsel %vm4835_vm8, %v4806_v42, 0.0  ;;  %v3548_v45 = vadd.f32 %v8637_v39, %v3189_v23 }
 0x1fe   : > { %v4807_v47 = vmax.f32 %v4775_v6, 0.0  ;;  %v4737_v22 = vadd.f32 %v4624_v27, %v4267_v7  ;;  %v4272_v8 = vadd.f32 %v5956_v3, %v8628_v52  ;;  %v5991_v20 = vpop.f32.mrf.mxu0  ;;  %v4778_v53 = vadd.f32 %v8718_v60, %v4739_v34 }
 0x1ff   : > { %v4840_v17 = vadd.f32 %v4839_v18, %v4838_v25  ;;  %v4167_v35 = vpop.f32.mrf.mxu1  ;;  %v4809_v27 = vmax.f32 %v4777_v19, 0.0  ;;  %v3190_v7 = vadd.f32 %v8647_v62, %v8546_v11 }
 0x200   : > { %v4776_v30 = vadd.f32 %v8718_v60, %v4737_v22  ;;  %v4640_v2 = vpop.f32.mrf.mxu0  ;;  %v4270_v52 = vadd.f32 %v4167_v35, %v3544_v16  ;;  %v4843_v33 = vsel %vm4835_vm8, %v4807_v47, 0.0  ;;  %v4742_v58 = vadd.f32 %v5990_v43, %v4272_v8 }
 0x201   : > { %v4842_v46 = vadd.f32 %v4841_v56, %v4840_v17  ;;  %v5957_v29 = vpop.f32.mrf.mxu1  ;;  %v4810_v31 = vmax.f32 %v4778_v53, 0.0  ;;  %v3549_v35 = vadd.f32 %v8644_v61, %v3190_v7 }
 0x202   : > { %v4808_v32 = vmax.f32 %v4776_v30, 0.0  ;;  %v4273_v49 = vadd.f32 %v5957_v29, %v8635_v36  ;;  %v5994_v63 = vpop.f32.mrf.mxu0  ;;  %v4740_v10 = vadd.f32 %v4637_v21, %v4270_v52  ;;  %v4847_v36 = vsel %vm4835_vm8, %v4809_v27, 0.0 }
 0x203   : > { %v4844_v0 = vadd.f32 %v4843_v33, %v4842_v46  ;;  %v4170_v42 = vpop.f32.mrf.mxu1  ;;  %v4781_v21 = vadd.f32 %v8718_v60, %v4742_v58  ;;  %v4849_v39 = vsel %vm4835_vm8, %v4810_v31, 0.0 }
 0x204   : > { %v4845_v1 = vsel %vm4835_vm8, %v4808_v32, 0.0  ;;  %v4743_v6 = vadd.f32 %v5991_v20, %v4273_v49  ;;  %v4271_v34 = vadd.f32 %v4170_v42, %v3545_v28  ;;  %v4653_v12 = vpop.f32.mrf.mxu0  ;;  %v4779_v43 = vadd.f32 %v8718_v60, %v4740_v10 }
 0x205   : > { %v4846_v25 = vadd.f32 %v4845_v1, %v4844_v0  ;;  %v5960_v19 = vpop.f32.mrf.mxu1  ;;  %v3193_v28 = vadd.f32 %v8654_v51, %v8552_v9  ;;  %v4813_v30 = vmax.f32 %v4781_v21, 0.0  ;;  %v3197_v21 = vadd.f32 %v8668_v54, %v8564_v55 }
 0x206   : > { %v4741_v3 = vadd.f32 %v4640_v2, %v4271_v34  ;;  %v4276_v18 = vadd.f32 %v5960_v19, %v8642_v37  ;;  %v5995_v47 = vpop.f32.mrf.mxu0  ;;  %v4811_v8 = vmax.f32 %v4779_v43, 0.0  ;;  %v4782_v16 = vadd.f32 %v8718_v60, %v4743_v6 }
 0x207   : > { %v4848_v22 = vadd.f32 %v4847_v36, %v4846_v25  ;;  %v4183_v20 = vpop.f32.mrf.mxu1  ;;  %v3552_v51 = vadd.f32 %v8651_v50, %v3193_v28  ;;  %v4855_v31 = vsel %vm4835_vm8, %v4813_v30, 0.0 }
 0x208   : > { %v4780_v11 = vadd.f32 %v8718_v60, %v4741_v3  ;;  %v4274_v62 = vadd.f32 %v4183_v20, %v3548_v45  ;;  %v4656_v17 = vpop.f32.mrf.mxu0  ;;  %v4746_v53 = vadd.f32 %v5994_v63, %v4276_v18  ;;  %v4851_v2 = vsel %vm4835_vm8, %v4811_v8, 0.0 }
 0x209   : > { %v4850_v56 = vadd.f32 %v4849_v39, %v4848_v22  ;;  %v5961_v37 = vpop.f32.mrf.mxu1  ;;  %v4814_v32 = vmax.f32 %v4782_v16, 0.0 }
 0x20a   : > { %v4812_v23 = vmax.f32 %v4780_v11, 0.0  ;;  %v4744_v27 = vadd.f32 %v4653_v12, %v4274_v62  ;;  %v5998_v46 = vpop.f32.mrf.mxu0  ;;  %v4277_v29 = vadd.f32 %v5961_v37, %v8649_v4  ;;  %v4785_v0 = vadd.f32 %v8718_v60, %v4746_v53 }
 0x20b   : > { %v4852_v52 = vadd.f32 %v4851_v2, %v4850_v56  ;;  %v4186_v33 = vpop.f32.mrf.mxu1  ;;  %v3194_v12 = vadd.f32 %v8661_v38, %v8558_v59  ;;  %v4857_v25 = vsel %vm4835_vm8, %v4814_v32, 0.0  ;;  %v3198_v62 = vadd.f32 %v8675_v41, %v8570_v24 }
 0x20c   : > { %v4853_v58 = vsel %vm4835_vm8, %v4812_v23, 0.0  ;;  %v4783_v61 = vadd.f32 %v8718_v60, %v4744_v27  ;;  %v4275_v49 = vadd.f32 %v4186_v33, %v3549_v35  ;;  %v4669_v9 = vpop.f32.mrf.mxu0  ;;  %v4747_v10 = vadd.f32 %v5995_v47, %v4277_v29 }
 0x20d   : > { %v4854_v63 = vadd.f32 %v4853_v58, %v4852_v52  ;;  %v5964_v42 = vpop.f32.mrf.mxu1  ;;  %v4817_v3 = vmax.f32 %v4785_v0, 0.0  ;;  %v3553_v39 = vadd.f32 %v8658_v48, %v3194_v12  ;;  %v3557_v52 = vadd.f32 %v8672_v40, %v3198_v62  ;;  %v9109_v58 = vld [vmem:[#allocation5_spill] sm:$0xff] }
 0x20e   : > { %v4815_v1 = vmax.f32 %v4783_v61, 0.0  ;;  %v4745_v6 = vadd.f32 %v4656_v17, %v4275_v49  ;;  %v4280_v4 = vadd.f32 %v5964_v42, %v8656_v57  ;;  %v5999_v34 = vpop.f32.mrf.mxu0  ;;  %v4786_v50 = vadd.f32 %v8718_v60, %v4747_v10  ;;  %v9110_v10 = vld [vmem:[#allocation21_spill] sm:$0xff] }
 0x20f   : > { %v4856_v45 = vadd.f32 %v4855_v31, %v4854_v63  ;;  %v4199_v7 = vpop.f32.mrf.mxu1  ;;  %v4863_v30 = vsel %vm4835_vm8, %v4817_v3, 0.0 }
 0x210   : > { %v4784_v43 = vadd.f32 %v8718_v60, %v4745_v6  ;;  %v4278_v19 = vadd.f32 %v4199_v7, %v3552_v51  ;;  %v4672_v36 = vpop.f32.mrf.mxu0  ;;  %v4859_v57 = vsel %vm4835_vm8, %v4815_v1, 0.0  ;;  %v4750_v59 = vadd.f32 %v5998_v46, %v4280_v4 }
 0x211   : > { %v4858_v18 = vadd.f32 %v4857_v25, %v4856_v45  ;;  %v5965_v47 = vpop.f32.mrf.mxu1  ;;  %v4818_v17 = vmax.f32 %v4786_v50, 0.0  ;;  %v9111_v45 = vld [vmem:[#allocation17_spill] sm:$0xff] }
 0x212   : > { %v4816_v22 = vmax.f32 %v4784_v43, 0.0  ;;  %v4748_v38 = vadd.f32 %v4669_v9, %v4278_v19  ;;  %v4281_v8 = vadd.f32 %v5965_v47, %v8663_v14  ;;  %v3556_v14 = vadd.f32 %v8665_v5, %v3197_v21 }
 0x213   : > { %v6002_v20 = vpop.f32.mrf.mxu0  ;;  %v4860_v16 = vadd.f32 %v4859_v57, %v4858_v18  ;;  %v4202_v11 = vpop.f32.mrf.mxu1  ;;  %v4789_v48 = vadd.f32 %v8718_v60, %v4750_v59  ;;  %v4865_v29 = vsel %vm4835_vm8, %v4818_v17, 0.0  ;;  %v3201_v5 = vadd.f32 %v8682_v44, %v9109_v58 }
 0x214   : > { %v4861_v55 = vsel %vm4835_vm8, %v4816_v22, 0.0  ;;  %v4787_v54 = vadd.f32 %v8718_v60, %v4748_v38  ;;  %v4751_v56 = vadd.f32 %v5999_v34, %v4281_v8  ;;  %v4279_v53 = vadd.f32 %v4202_v11, %v3553_v39  ;;  %v9113_v38 = vld [vmem:[#allocation26_spill] sm:$0xff]  ;;  %v9114_v11 = vld [vmem:[#allocation28_spill] sm:$0xff] }
 0x215   : > { %v4685_v35 = vpop.f32.mrf.mxu0  ;;  %v4862_v28 = vadd.f32 %v4861_v55, %v4860_v16  ;;  %v5968_v37 = vpop.f32.mrf.mxu1  ;;  %v4821_v63 = vmax.f32 %v4789_v48, 0.0  ;;  %v3202_v7 = vadd.f32 %v8689_v15, %v9111_v45 }
 0x216   : > { %v4819_v2 = vmax.f32 %v4787_v54, 0.0  ;;  %v4749_v24 = vadd.f32 %v4672_v36, %v4279_v53  ;;  %v4284_v41 = vadd.f32 %v5968_v37, %v8670_v13  ;;  %v4790_v49 = vadd.f32 %v8718_v60, %v4751_v56  ;;  %v9112_v36 = vld [vmem:[#allocation24_spill] sm:$0xff] }
 0x217   : > { %v6003_v23 = vpop.f32.mrf.mxu0  ;;  %v4864_v27 = vadd.f32 %v4863_v30, %v4862_v28  ;;  %v4215_v46 = vpop.f32.mrf.mxu1  ;;  %v3560_v21 = vadd.f32 %v9112_v36, %v3201_v5  ;;  %v4871_v3 = vsel %vm4835_vm8, %v4821_v63, 0.0  ;;  %v3561_v62 = vadd.f32 %v9114_v11, %v3202_v7  ;;  %v9115_v28 = vld [vmem:[#allocation22_spill] sm:$0xff] }
 0x218   : > { %v4282_v33 = vadd.f32 %v4215_v46, %v3556_v14  ;;  %v4788_v9 = vadd.f32 %v8718_v60, %v4749_v24  ;;  %v4867_v0 = vsel %vm4835_vm8, %v4819_v2, 0.0  ;;  %v4754_v6 = vadd.f32 %v6002_v20, %v4284_v41  ;;  %v9116_v14 = vld [vmem:[#allocation7_spill] sm:$0xff] }
 0x219   : > { %v4688_v32 = vpop.f32.mrf.mxu0  ;;  %v4866_v61 = vadd.f32 %v4865_v29, %v4864_v27  ;;  %v5969_v51 = vpop.f32.mrf.mxu1  ;;  %v4822_v25 = vmax.f32 %v4790_v49, 0.0  ;;  %v3205_v56 = vadd.f32 %v8696_v26, %v9115_v28 }
 0x21a   : > { %v4752_v13 = vadd.f32 %v4685_v35, %v4282_v33  ;;  %v4285_v42 = vadd.f32 %v5969_v51, %v9110_v10  ;;  %v4820_v1 = vmax.f32 %v4788_v9, 0.0  ;;  %v4793_v47 = vadd.f32 %v8718_v60, %v4754_v6  ;;  %v9118_v9 = vld [vmem:[#allocation12_spill] sm:$0xff]  ;;  %v9119_v51 = vld [vmem:[#allocation10_spill] sm:$0xff] }
 0x21b   : > { %v6006_v40 = vpop.f32.mrf.mxu0  ;;  %v4868_v31 = vadd.f32 %v4867_v0, %v4866_v61  ;;  %v4218_v4 = vpop.f32.mrf.mxu1  ;;  %v4873_v17 = vsel %vm4835_vm8, %v4822_v25, 0.0  ;;  %v9117_v61 = vld [vmem:[#allocation6_spill] sm:$0xff]  ;;  %v3206_v63 = vadd.f32 %v9119_v51, %v9118_v9  ;;  %v4912_v51 = vld [vmem:[%s8844_s22] sm:$0x1] }
 0x21c   : > { %v4791_v34 = vadd.f32 %v8718_v60, %v4752_v13  ;;  %v4283_v44 = vadd.f32 %v4218_v4, %v3557_v52  ;;  %v4869_v50 = vsel %vm4835_vm8, %v4820_v1, 0.0  ;;  %v4755_v43 = vadd.f32 %v6003_v23, %v4285_v42 }
 0x21d   : > { %v4701_v12 = vpop.f32.mrf.mxu0  ;;  %v5972_v19 = vpop.f32.mrf.mxu1  ;;  %v4870_v18 = vadd.f32 %v4869_v50, %v4868_v31  ;;  %v4825_v2 = vmax.f32 %v4793_v47, 0.0  ;;  %v3564_v49 = vadd.f32 %v9117_v61, %v3205_v56  ;;  %v9120_v31 = vld [vmem:[#allocation9_spill] sm:$0xff]  ;;  %v9121_v50 = vld [vmem:[#allocation8_spill] sm:$0xff] }
 0x21e   : > { %v4823_v22 = vmax.f32 %v4791_v34, 0.0  ;;  %v4753_v59 = vadd.f32 %v4688_v32, %v4283_v44  ;;  %v4288_v8 = vadd.f32 %v5972_v19, %v9113_v38  ;;  %v4794_v55 = vadd.f32 %v8718_v60, %v4755_v43 }
 0x21f   : > { %v6007_v57 = vpop.f32.mrf.mxu0  ;;  %v4231_v20 = vpop.f32.mrf.mxu1  ;;  %v4872_v39 = vadd.f32 %v4871_v3, %v4870_v18  ;;  %v4879_v10 = vsel %vm4835_vm8, %v4825_v2, 0.0  ;;  %v3565_v43 = vadd.f32 %v9121_v50, %v3206_v63 }
 0x220   : > { %v4286_v15 = vadd.f32 %v4231_v20, %v3560_v21  ;;  %v4792_v54 = vadd.f32 %v8718_v60, %v4753_v59  ;;  %v4875_v23 = vsel %vm4835_vm8, %v4823_v22, 0.0  ;;  %v4758_v24 = vadd.f32 %v6006_v40, %v4288_v8  ;;  %v9122_v21 = vld [vmem:[#allocation13_spill] sm:$0xff] }
 0x221   : > { %v4704_v16 = vpop.f32.mrf.mxu0  ;;  %v5973_v35 = vpop.f32.mrf.mxu1  ;;  %v4874_v53 = vadd.f32 %v4873_v17, %v4872_v39  ;;  %v4826_v33 = vmax.f32 %v4794_v55, 0.0 }
 0x222   : > { %v4756_v37 = vadd.f32 %v4701_v12, %v4286_v15  ;;  %v4289_v30 = vadd.f32 %v5973_v35, %v9116_v14  ;;  %v4824_v27 = vmax.f32 %v4792_v54, 0.0  ;;  %v4797_v42 = vadd.f32 %v8718_v60, %v4758_v24 }
 0x223   : > { %v6010_v48 = vpop.f32.mrf.mxu0  ;;  %v4234_v41 = vpop.f32.mrf.mxu1  ;;  %v4876_v46 = vadd.f32 %v4875_v23, %v4874_v53  ;;  %v4881_v44 = vsel %vm4835_vm8, %v4826_v33, 0.0 }
 0x224   : > { %v4795_v52 = vadd.f32 %v8718_v60, %v4756_v37  ;;  %v4287_v29 = vadd.f32 %v4234_v41, %v3561_v62  ;;  %v4877_v32 = vsel %vm4835_vm8, %v4824_v27, 0.0  ;;  %v4759_v58 = vadd.f32 %v6007_v57, %v4289_v30 }
 0x225   : > { %v5976_v26 = vpop.f32.mrf.mxu1  ;;  %v4717_v5 = vpop.f32.mrf.mxu0  ;;  %v4878_v0 = vadd.f32 %v4877_v32, %v4876_v46  ;;  %v4829_v18 = vmax.f32 %v4797_v42, 0.0 }
 0x226   : > { %v4757_v13 = vadd.f32 %v4704_v16, %v4287_v29  ;;  %v4827_v40 = vmax.f32 %v4795_v52, 0.0  ;;  %v4292_v1 = vadd.f32 %v5976_v26, %v9120_v31  ;;  %v4798_v12 = vadd.f32 %v8718_v60, %v4759_v58 }
 0x227   : > { %v4247_v6 = vpop.f32.mrf.mxu1  ;;  %v4880_v4 = vadd.f32 %v4879_v10, %v4878_v0  ;;  %v6011_v25 = vpop.f32.mrf.mxu0  ;;  %v4887_v55 = vsel %vm4835_vm8, %v4829_v18, 0.0 }
 0x228   : > { %v4796_v34 = vadd.f32 %v8718_v60, %v4757_v13  ;;  %v4290_v45 = vadd.f32 %v4247_v6, %v3564_v49  ;;  %v4883_v57 = vsel %vm4835_vm8, %v4827_v40, 0.0  ;;  %v4762_v47 = vadd.f32 %v6010_v48, %v4292_v1 }
 0x229   : > { %v5977_v7 = vpop.f32.mrf.mxu1  ;;  %v4882_v19 = vadd.f32 %v4881_v44, %v4880_v4  ;;  %v4830_v39 = vmax.f32 %v4798_v12, 0.0  ;;  %v4720_v11 = vpop.f32.mrf.mxu0 }
 0x22a   : > { %v4828_v36 = vmax.f32 %v4796_v34, 0.0  ;;  %v4293_v3 = vadd.f32 %v5977_v7, %v9122_v21  ;;  %v4760_v22 = vadd.f32 %v4717_v5, %v4290_v45  ;;  %v4801_v54 = vadd.f32 %v8718_v60, %v4762_v47 }
 0x22b   : > { %v4250_v59 = vpop.f32.mrf.mxu1  ;;  %v4884_v38 = vadd.f32 %v4883_v57, %v4882_v19  ;;  %v4889_v53 = vsel %vm4835_vm8, %v4830_v39, 0.0 }
 0x22c   : > { %v4885_v8 = vsel %vm4835_vm8, %v4828_v36, 0.0  ;;  %v4291_v20 = vadd.f32 %v4250_v59, %v3565_v43  ;;  %v4799_v15 = vadd.f32 %v8718_v60, %v4760_v22  ;;  %v4763_v16 = vadd.f32 %v6011_v25, %v4293_v3 }
 0x22d   : > { %v4886_v62 = vadd.f32 %v4885_v8, %v4884_v38  ;;  %v4833_v48 = vmax.f32 %v4801_v54, 0.0 }
 0x22e   : > { %v4761_v17 = vadd.f32 %v4720_v11, %v4291_v20  ;;  %v4831_v35 = vmax.f32 %v4799_v15, 0.0  ;;  %v4802_v37 = vadd.f32 %v8718_v60, %v4763_v16 }
 0x22f   : > { %v4888_v28 = vadd.f32 %v4887_v55, %v4886_v62  ;;  %v4895_v46 = vsel %vm4835_vm8, %v4833_v48, 0.0 }
 0x230   : > { %v4800_v56 = vadd.f32 %v8718_v60, %v4761_v17  ;;  %v4891_v2 = vsel %vm4835_vm8, %v4831_v35, 0.0  ;;  %v4834_v24 = vmax.f32 %v4802_v37, 0.0 }
 0x231   : > { %v4890_v14 = vadd.f32 %v4889_v53, %v4888_v28 }
 0x232   : > { %v4832_v30 = vmax.f32 %v4800_v56, 0.0  ;;  %v4897_v29 = vsel %vm4835_vm8, %v4834_v24, 0.0 }
 0x233   : > { %v4892_v23 = vadd.f32 %v4891_v2, %v4890_v14 }
 0x234   : > { %v4893_v27 = vsel %vm4835_vm8, %v4832_v30, 0.0 }
 0x235   : > { %v4894_v41 = vadd.f32 %v4893_v27, %v4892_v23 }
 0x237   : > { %v4896_v52 = vadd.f32 %v4895_v46, %v4894_v41 }
 0x239   : > { %v4898_v33 = vadd.f32 %v4897_v29, %v4896_v52 }
 0x23b   : > { %v4899_v32 = vrot.slane %v4898_v33, 4 }
 0x23d   : > { %v4900_v60 = vadd.f32 %v4899_v32, %v4898_v33 }
 0x23f   : > { %v4901_v58 = vrot.slane %v4900_v60, 2 }
 0x241   : > { %v4902_v26 = vadd.f32 %v4901_v58, %v4900_v60 }
 0x243   : > { %v4903_v5 = vrot.slane %v4902_v26, 1 }
 0x245   : > { %v4904_v61 = vadd.f32 %v4903_v5, %v4902_v26 }
 0x247   : > { %v4905_v49 = vmul.f32 0.00390625, %v4904_v61 }
 0x249   : > { %4907 = vst.msk [vmem:[%s190_s12] sm:$0x1] %vm4906_vm9, %v4905_v49  ;;  %v4908_v63 = vpack.c.bf16 %v4905_v49, %v4905_v49 }
 0x24a   : > { %6127 = shalt.err (!%p6124_p3)
}
 0x24b   : > { %s6128_s7 = scalar_lea.hbm %s8849_s28, 16  ;;  %s6132_s10 = scalar_lea.hbm %s8901_s3, 32 }
 0x24c   : > { %p6129_p4 = scmp.ne.s32.totalorder %s8849_s28, %s6128_s7  ;;  %p6133_p9 = scmp.lt.s32.totalorder %s8849_s28, %s8901_s3 }
 0x24d   : > { %p6134_p10 = scmp.lt.s32.totalorder %s6132_s10, %s6128_s7 }
 0x24e   : > { %p6130_p7 = pnand %p6129_p4, %p6240_p5 }
 0x24f   : > { %p6135_p11 = por %p6134_p10, %p6133_p9 }
 0x250   : > { %p6131_p8 = pneg %p6130_p7 }
 0x252   : > { %p6136_p12 = pnand %p6135_p11, %p6131_p8 }
 0x254   : > { %6139 = shalt.err (!%p6136_p12)
}
 0x255   : > { %6025 = dma.vmem_to_hbm [thread:$0]  (%p6240_p5), %s8851_s13, 16, %s8849_s28, %s4916_s19   ;;  %v4913_v0 = vsel %vm8853_vm11, %v4908_v63, %v4912_v51 }
 0x256   : > { %4914 = vst [vmem:[%s8844_s22] sm:$0x1] %v4913_v0 }
 0x257 PF: > { %p6031_p13 = scmp.ge.s32.totalorder %s6174_s18, 2  ;;  %s4946_s14 = sand.u32 1, %s6162_s15  }
 0x258   : > { %s4947_s20 = scalar_lea.sflag [#allocation3], %s4946_s14 }
 0x259   : > { %p6028_p0 = pnand %p6031_p13, %p6244_p6 }
 0x25b   : > { %p6029_p1 = pneg %p6028_p0 }
 0x25d   : > { %6157 = dma.done.wait (%p6029_p1), %s4947_s20, 16  }
 0x25e   : > { %6159 = vsyncadd (%p6029_p1), %s4947_s20, 4294967280  ;;  %p15_p5 = scmp.ge.s32.totalorder %s6227_s21, 4   ;;  %s9125_s15 = smov %s6166_s16 }
 0x25f   : > { %s9126_s16 = smov %s6170_s17  ;;  %s9127_s17 = smov %s6238_s24 }
 0x260   : > { %s9128_s18 = smov %s6227_s21  ;;  %17 = sbr.rel (!%p15_p5) target bundleno = 3 (0x3), region = 89 }
 0x265   :  { %4957 = vsyncpa [#allocation3], 1 }
 0x266   :  { %4959 = vsyncpa [#allocation3 + $0x1], 1 }

</bundles_post_ra>
